<compile_context>
chip_gen: v5e
topology: v5e:2x2
jax: 0.10.0
libtpu: 0.0.40
codegen_flags: <defaults>
</compile_context>

<pallas_src>
import functools

import jax
import jax.numpy as jnp
from jax.experimental import pallas as pl
from jax.experimental.pallas import tpu as pltpu

LRELU_SLOPE = 0.2
BN_EPS = 1e-5
PATCH_DTYPE = jnp.bfloat16          # dtype of im2col patches (and their cotangents)


# --------------------------------------------------------------------------- #
# helpers
# --------------------------------------------------------------------------- #
def _pick_tile(m):
    """Largest lane tile (multiple of 128, <=2048) dividing m, else the full extent.

    2048 keeps per-step working sets v7x-safe (32 MiB scoped / 64 MiB physical); v5e/v6e
    (128 MiB VMEM) could go to 4096 but 2048 already amortises the ~0.35us/step overhead.
    """
    for t in (2048, 1024, 512, 256, 128):
        if m % t == 0:
            return t
    return m


def _maybe_vmem_limit(est_bytes):
    """Explicit scoped-VMEM request once residency outgrows the defaults (v7x-safe cap)."""
    if est_bytes <= (12 << 20):
        return None
    return int(min(2 * est_bytes, 48 << 20))


# --------------------------------------------------------------------------- #
# forward Pallas kernels
# --------------------------------------------------------------------------- #
def _conv_lrelu_kernel(p_ref, w_ref, b_ref, o_ref):
    """(Cout, K) @ (K, tm) + bias + LeakyReLU; lane axis carries M = N*OH*OW."""
    y = jnp.dot(w_ref[...], p_ref[...], preferred_element_type=jnp.float32)
    y = y + b_ref[...]                                  # (Cout, 1) broadcasts over lanes
    o_ref[...] = jnp.where(y >= 0, y, LRELU_SLOPE * y)


def _conv_bn_lrelu_kernel(p_ref, w_ref, b_ref, gam_ref, bet_ref,
                          o_ref, xhat_ref, inv_ref, sum_ref, sq_ref,
                          *, tm, m_total, n_tiles):
    """Fused conv + bias + train-mode BatchNorm + LeakyReLU.

    The (Cout, M) output is VMEM-resident across the M grid axis.  Per-channel sum /
    sum-of-squares are streamed into (Cout, 1) scratch on every step; the last step
    normalises the resident output tile-by-tile (bounded vreg pressure) and also emits
    xhat / inv-std residuals for the backward pass.
    """
    gamma = gam_ref[...]
    beta = bet_ref[...]
    y = jnp.dot(w_ref[...], p_ref[...], preferred_element_type=jnp.float32)
    y = y + b_ref[...]

    if n_tiles == 1:                                    # whole layer in one grid step
        mean = jnp.mean(y, axis=1, keepdims=True)
        var = jnp.mean(jnp.square(y - mean), axis=1, keepdims=True)   # biased (torch train)
        inv = jax.lax.rsqrt(var + BN_EPS)
        xh = (y - mean) * inv
        z = xh * gamma + beta
        o_ref[...] = jnp.where(z >= 0, z, LRELU_SLOPE * z)
        xhat_ref[...] = xh
        inv_ref[...] = inv
        return

    i = pl.program_id(0)

    @pl.when(i == 0)
    def _():
        sum_ref[...] = jnp.zeros_like(sum_ref)
        sq_ref[...] = jnp.zeros_like(sq_ref)

    off = pl.multiple_of(i * tm, 128)                   # tm is a 128-multiple here
    o_ref[:, pl.ds(off, tm)] = y
    sum_ref[...] += jnp.sum(y, axis=1, keepdims=True)
    sq_ref[...] += jnp.sum(y * y, axis=1, keepdims=True)

    @pl.when(i == n_tiles - 1)
    def _():
        inv_m = 1.0 / m_total
        mean = sum_ref[...] * inv_m
        var = sq_ref[...] * inv_m - mean * mean          # biased variance (streamed)
        inv = jax.lax.rsqrt(var + BN_EPS)
        inv_ref[...] = inv

        @pl.loop(0, n_tiles)
        def _(t):
            o2 = pl.multiple_of(t * tm, 128)
            yt = o_ref[:, pl.ds(o2, tm)]
            xh = (yt - mean) * inv
            xhat_ref[:, pl.ds(o2, tm)] = xh
            z = xh * gamma + beta
            o_ref[:, pl.ds(o2, tm)] = jnp.where(z >= 0, z, LRELU_SLOPE * z)


# --------------------------------------------------------------------------- #
# backward Pallas kernels (input-gradient path of torch.autograd.grad)
# --------------------------------------------------------------------------- #
def _lrelu_bwd_kernel(g_ref, o_ref, w_ref, dp_ref):
    """dpatches tile = W (contract Cout) @ (g * LReLU'(z)); bf16 MXU operands, f32 accum."""
    gp = g_ref[...] * jnp.where(o_ref[...] >= 0, 1.0, LRELU_SLOPE)
    dp = jax.lax.dot_general(w_ref[...], gp.astype(jnp.bfloat16),
                             (((0,), (0,)), ((), ())),
                             preferred_element_type=jnp.float32)
    dp_ref[...] = dp.astype(dp_ref.dtype)


def _bn_lrelu_bwd_kernel(g_ref, xh_ref, gam_ref, bet_ref, inv_ref, w_ref,
                         dp_ref, sgz_ref, sgzx_ref, *, m_total, n_tiles):
    """LeakyReLU + train-BN backward fused with the dpatches matmul (input grads only).

    2-pass grid: pass 0 streams the tiles and accumulates sum(gz), sum(gz*xhat) into
    scratch; pass 1 re-streams the tiles and writes dpatches.  xhat / inv-std are forward
    residuals, so nothing here divides by gamma or inverts the activation.
    """
    p = pl.program_id(0)
    i = pl.program_id(1)

    @pl.when((p == 0) & (i == 0))
    def _():
        sgz_ref[...] = jnp.zeros_like(sgz_ref)
        sgzx_ref[...] = jnp.zeros_like(sgzx_ref)

    gamma = gam_ref[...]
    xh = xh_ref[...]
    z = xh * gamma + bet_ref[...]                        # pre-LReLU value (no inversion)
    gz = g_ref[...] * jnp.where(z >= 0, 1.0, LRELU_SLOPE)

    @pl.when(p == 0)
    def _():
        sgz_ref[...] += jnp.sum(gz, axis=1, keepdims=True)
        sgzx_ref[...] += jnp.sum(gz * xh, axis=1, keepdims=True)

    @pl.when(p == 1)
    def _():
        inv_m = 1.0 / m_total
        dy = gamma * inv_ref[...] * (gz - sgz_ref[...] * inv_m - xh * (sgzx_ref[...] * inv_m))
        dp = jax.lax.dot_general(w_ref[...], dy.astype(jnp.bfloat16),
                                 (((0,), (0,)), ((), ())),
                                 preferred_element_type=jnp.float32)
        dp_ref[...] = dp.astype(dp_ref.dtype)


# --------------------------------------------------------------------------- #
# interpolation + penalty Pallas kernels
# --------------------------------------------------------------------------- #
def _interp_kernel(a_ref, s_ref, t_ref, o_ref):
    a = a_ref[...]                                       # (N*C, 1), broadcasts over lanes
    o_ref[...] = a * s_ref[...] + (1.0 - a) * t_ref[...]


def _gp_penalty_kernel(g_ref, o_ref, acc_ref, *, n_rows):
    i = pl.program_id(0)

    @pl.when(i == 0)
    def _():
        acc_ref[...] = jnp.zeros_like(acc_ref)

    g = g_ref[...]
    acc_ref[...] += jnp.sum(g * g, axis=1, keepdims=True)   # per-row ||.||^2, streamed over D

    @pl.when(i == pl.num_programs(0) - 1)
    def _():
        pen = jnp.square(jnp.sqrt(acc_ref[...]) - 1.0)
        o_ref[...] = jnp.sum(pen, axis=0, keepdims=True) * (1.0 / n_rows)


# --------------------------------------------------------------------------- #
# pallas_call wrappers
# --------------------------------------------------------------------------- #
def _conv_lrelu_call(patches_t, w_t, b):
    K, M = patches_t.shape
    cout = w_t.shape[0]
    tm = _pick_tile(M)
    return pl.pallas_call(
        _conv_lrelu_kernel,
        out_shape=jax.ShapeDtypeStruct((cout, M), jnp.float32),
        grid=(M // tm,),
        in_specs=[pl.BlockSpec((K, tm), lambda i: (0, i)),
                  pl.BlockSpec((cout, K), lambda i: (0, 0)),
                  pl.BlockSpec((cout, 1), lambda i: (0, 0))],
        out_specs=pl.BlockSpec((cout, tm), lambda i: (0, i)),
        compiler_params=pltpu.CompilerParams(dimension_semantics=("parallel",)),
    )(patches_t, w_t.astype(jnp.bfloat16), b)


def _conv_bn_lrelu_call(patches_t, w_t, b, gamma, beta):
    K, M = patches_t.shape
    cout = w_t.shape[0]
    tm = _pick_tile(M)
    n_tiles = M // tm
    kern = functools.partial(_conv_bn_lrelu_kernel, tm=tm, m_total=M, n_tiles=n_tiles)
    resident = 2 * cout * M * 4 + 2 * 2 * K * tm        # out + xhat + double-buffered patches
    return pl.pallas_call(
        kern,
        out_shape=(jax.ShapeDtypeStruct((cout, M), jnp.float32),    # post-LReLU output
                   jax.ShapeDtypeStruct((cout, M), jnp.float32),    # xhat residual
                   jax.ShapeDtypeStruct((cout, 1), jnp.float32)),   # inv-std residual
        grid=(n_tiles,),
        in_specs=[pl.BlockSpec((K, tm), lambda i: (0, i)),
                  pl.BlockSpec((cout, K), lambda i: (0, 0)),
                  pl.BlockSpec((cout, 1), lambda i: (0, 0)),
                  pl.BlockSpec((cout, 1), lambda i: (0, 0)),
                  pl.BlockSpec((cout, 1), lambda i: (0, 0))],
        out_specs=(pl.BlockSpec((cout, M), lambda i: (0, 0)),       # VMEM-resident
                   pl.BlockSpec((cout, M), lambda i: (0, 0)),
                   pl.BlockSpec((cout, 1), lambda i: (0, 0))),
        scratch_shapes=[pltpu.VMEM((cout, 1), jnp.float32),
                        pltpu.VMEM((cout, 1), jnp.float32)],
        compiler_params=pltpu.CompilerParams(
            dimension_semantics=("arbitrary",),
            vmem_limit_bytes=_maybe_vmem_limit(resident)),
    )(patches_t, w_t.astype(jnp.bfloat16), b, gamma, beta)


def _lrelu_bwd_call(g, out, w_t, dp_dtype):
    cout, M = g.shape
    K = w_t.shape[1]
    tm = _pick_tile(M)
    return pl.pallas_call(
        _lrelu_bwd_kernel,
        out_shape=jax.ShapeDtypeStruct((K, M), dp_dtype),
        grid=(M // tm,),
        in_specs=[pl.BlockSpec((cout, tm), lambda i: (0, i)),
                  pl.BlockSpec((cout, tm), lambda i: (0, i)),
                  pl.BlockSpec((cout, K), lambda i: (0, 0))],
        out_specs=pl.BlockSpec((K, tm), lambda i: (0, i)),
        compiler_params=pltpu.CompilerParams(dimension_semantics=("parallel",)),
    )(g, out, w_t.astype(jnp.bfloat16))


def _bn_lrelu_bwd_call(g, xhat, gamma, beta, inv, w_t, dp_dtype):
    cout, M = g.shape
    K = w_t.shape[1]
    tm = _pick_tile(M)
    n_tiles = M // tm
    kern = functools.partial(_bn_lrelu_bwd_kernel, m_total=M, n_tiles=n_tiles)
    return pl.pallas_call(
        kern,
        out_shape=jax.ShapeDtypeStruct((K, M), dp_dtype),
        grid=(2, n_tiles),                                # (stats pass, dpatches pass) x tiles
        in_specs=[pl.BlockSpec((cout, tm), lambda p, i: (0, i)),
                  pl.BlockSpec((cout, tm), lambda p, i: (0, i)),
                  pl.BlockSpec((cout, 1), lambda p, i: (0, 0)),
                  pl.BlockSpec((cout, 1), lambda p, i: (0, 0)),
                  pl.BlockSpec((cout, 1), lambda p, i: (0, 0)),
                  pl.BlockSpec((cout, K), lambda p, i: (0, 0))],
        out_specs=pl.BlockSpec((K, tm), lambda p, i: (0, i)),
        scratch_shapes=[pltpu.VMEM((cout, 1), jnp.float32),
                        pltpu.VMEM((cout, 1), jnp.float32)],
        compiler_params=pltpu.CompilerParams(
            dimension_semantics=("arbitrary", "arbitrary")),
    )(g, xhat, gamma, beta, inv, w_t.astype(jnp.bfloat16))


def interpolate(alpha, source, target):
    n, c, h, w = source.shape
    nc, hw = n * c, h * w
    tl = _pick_tile(hw)
    out = pl.pallas_call(
        _interp_kernel,
        out_shape=jax.ShapeDtypeStruct((nc, hw), jnp.float32),
        grid=(hw // tl,),
        in_specs=[pl.BlockSpec((nc, 1), lambda i: (0, 0)),
                  pl.BlockSpec((nc, tl), lambda i: (0, i)),
                  pl.BlockSpec((nc, tl), lambda i: (0, i))],
        out_specs=pl.BlockSpec((nc, tl), lambda i: (0, i)),
        compiler_params=pltpu.CompilerParams(dimension_semantics=("parallel",)),
    )(alpha.reshape(nc, 1), source.reshape(nc, hw), target.reshape(nc, hw))
    return out.reshape(n, c, h, w)


def gp_penalty(grads_flat):
    n, d = grads_flat.shape
    td = _pick_tile(d)
    kern = functools.partial(_gp_penalty_kernel, n_rows=n)
    out = pl.pallas_call(
        kern,
        out_shape=jax.ShapeDtypeStruct((1, 1), jnp.float32),
        grid=(d // td,),
        in_specs=[pl.BlockSpec((n, td), lambda i: (0, i))],
        out_specs=pl.BlockSpec((1, 1), lambda i: (0, 0)),
        scratch_shapes=[pltpu.VMEM((n, 1), jnp.float32)],
        compiler_params=pltpu.CompilerParams(dimension_semantics=("arbitrary",)),
    )(grads_flat)
    return out[0, 0]


# --------------------------------------------------------------------------- #
# differentiable layer ops (custom_vjp; both directions use Pallas kernels)
# --------------------------------------------------------------------------- #
@jax.custom_vjp
def conv_lrelu(patches_t, w_t, b):
    return _conv_lrelu_call(patches_t, w_t, b)


def _conv_lrelu_fwd(patches_t, w_t, b):
    out = _conv_lrelu_call(patches_t, w_t, b)
    return out, (w_t, b, out)


def _conv_lrelu_bwd(res, g):
    w_t, b, out = res
    dp = _lrelu_bwd_call(g, out, w_t, PATCH_DTYPE)
    # parameter cotangents are discarded by GradientPenaltyLoss (only_inputs=True)
    return dp, jnp.zeros_like(w_t), jnp.zeros_like(b)


conv_lrelu.defvjp(_conv_lrelu_fwd, _conv_lrelu_bwd)


@jax.custom_vjp
def conv_bn_lrelu(patches_t, w_t, b, gamma, beta):
    out, _, _ = _conv_bn_lrelu_call(patches_t, w_t, b, gamma, beta)
    return out


def _conv_bn_lrelu_fwd(patches_t, w_t, b, gamma, beta):
    out, xhat, inv = _conv_bn_lrelu_call(patches_t, w_t, b, gamma, beta)
    return out, (w_t, b, gamma, beta, xhat, inv)


def _conv_bn_lrelu_bwd(res, g):
    w_t, b, gamma, beta, xhat, inv = res
    dp = _bn_lrelu_bwd_call(g, xhat, gamma, beta, inv, w_t, PATCH_DTYPE)
    # parameter cotangents are discarded by GradientPenaltyLoss (only_inputs=True)
    return (dp, jnp.zeros_like(w_t), jnp.zeros_like(b),
            jnp.zeros_like(gamma), jnp.zeros_like(beta))


conv_bn_lrelu.defvjp(_conv_bn_lrelu_fwd, _conv_bn_lrelu_bwd)


# --------------------------------------------------------------------------- #
# discriminator model (glue is plain jnp and therefore jax.vjp-differentiable)
# --------------------------------------------------------------------------- #
# TODO(synk): im2col / col2im stay as XLA data-layout glue; forming patches in-kernel via
# halo DMA would remove the remaining activation round trips but complicates autodiff.
def _im2col_t(x_cnhw, kh, kw, stride, pad):
    """x in (C, N, H, W) -> patches (KH*KW*C, N*OH*OW), tap-major / channel-minor order."""
    if pad:
        x_cnhw = jnp.pad(x_cnhw, ((0, 0), (0, 0), (pad, pad), (pad, pad)))
    c, n, h, w = x_cnhw.shape
    oh = (h - kh) // stride + 1
    ow = (w - kw) // stride + 1
    cols = []
    for i in range(kh):
        for j in range(kw):
            cols.append(x_cnhw[:, :, i:i + stride * oh:stride, j:j + stride * ow:stride])
    p = jnp.stack(cols, axis=0)                          # (kh*kw, c, n, oh, ow)
    return p.reshape(kh * kw * c, n * oh * ow), oh, ow


def _w_to_2d_t(w):
    """Torch conv weight (Cout, Cin, KH, KW) -> (Cout, KH*KW*Cin) matching _im2col_t."""
    cout = w.shape[0]
    return jnp.transpose(w, (0, 2, 3, 1)).reshape(cout, -1)


def init_params(key, in_channels=3, out_channels=1, channels=8):
    """DCGAN-style init: conv W ~ N(0, 0.02), BN gamma ~ N(1, 0.02)."""
    chs = [in_channels, channels, channels * 2, channels * 4, channels * 8]
    params = {"convs": [], "bns": []}
    for li in range(4):
        key, kw = jax.random.split(key)
        w = 0.02 * jax.random.normal(kw, (chs[li + 1], chs[li], 4, 4), jnp.float32)
        b = jnp.zeros((chs[li + 1],), jnp.float32)
        params["convs"].append((w, b))
        if li > 0:
            key, kg = jax.random.split(key)
            gamma = 1.0 + 0.02 * jax.random.normal(kg, (chs[li + 1],), jnp.float32)
            beta = jnp.zeros((chs[li + 1],), jnp.float32)
            params["bns"].append((gamma, beta))
    key, kc = jax.random.split(key)
    wc = 0.02 * jax.random.normal(kc, (out_channels, chs[4], 4, 4), jnp.float32)
    bc = jnp.zeros((out_channels,), jnp.float32)
    params["classifier"] = (wc, bc)
    return params


def discriminator_forward(params, x_nchw, only_features=False):
    n = x_nchw.shape[0]
    x = jnp.transpose(x_nchw, (1, 0, 2, 3)).astype(jnp.float32)     # (C, N, H, W) internally

    for li, (w, b) in enumerate(params["convs"]):
        cout = w.shape[0]
        # cast the activation to bf16 BEFORE im2col: the 16x-inflated patch tensor is
        # formed, written and DMA'd in bf16 (MXU accumulates in f32 inside the kernels).
        patches_t, oh, ow = _im2col_t(x.astype(PATCH_DTYPE), 4, 4, stride=2, pad=1)
        w_t = _w_to_2d_t(w)
        if li == 0:
            y = conv_lrelu(patches_t, w_t, b.reshape(-1, 1))
        else:
            gamma, beta = params["bns"][li - 1]
            y = conv_bn_lrelu(patches_t, w_t, b.reshape(-1, 1),
                              gamma.reshape(-1, 1), beta.reshape(-1, 1))
        x = y.reshape(cout, n, oh, ow)

    if only_features:
        return jnp.transpose(x, (1, 0, 2, 3))

    # TODO(synk): the final 4x4 classifier conv + sigmoid is plain jnp per perf review
    # (a standalone Pallas kernel has an M=N lane width -> fully masked stores); folding
    # it into the layer-3 epilogue needs an in-kernel cross-lane relayout of the features.
    wc, bc = params["classifier"]
    patches_t, oh, ow = _im2col_t(x.astype(PATCH_DTYPE), 4, 4, stride=1, pad=0)  # (1024, N)
    logits = jnp.dot(_w_to_2d_t(wc).astype(PATCH_DTYPE), patches_t,
                     preferred_element_type=jnp.float32) + bc.reshape(-1, 1)
    y = jax.nn.sigmoid(logits)
    return jnp.transpose(y.reshape(wc.shape[0], n, oh, ow), (1, 0, 2, 3))        # (N, 1, 1, 1)


# --------------------------------------------------------------------------- #
# GradientPenaltyLoss.forward
# --------------------------------------------------------------------------- #
def gradient_penalty_loss(params, source, target, key):
    n, c, _, _ = source.shape
    alpha = jax.random.uniform(key, (n, c, 1, 1), dtype=jnp.float32)
    interp = interpolate(alpha, source.astype(jnp.float32), target.astype(jnp.float32))

    d, vjp_fn = jax.vjp(lambda xi: discriminator_forward(params, xi), interp)
    (grads,) = vjp_fn(jnp.ones_like(d))                  # == torch.autograd.grad w/ ones
    return gp_penalty(grads.reshape(n, -1))              # mean((||g||_2 - 1)^2)


if __name__ == "__main__":
    key = jax.random.PRNGKey(0)
    pkey, skey, tkey, akey = jax.random.split(key, 4)

    # structurally valid small case: 64x64 input -> 4x4 features -> 1x1 sigmoid logit
    params = init_params(pkey, in_channels=3, out_channels=1, channels=8)
    source = jax.random.normal(skey, (2, 3, 64, 64), jnp.float32)
    target = jax.random.normal(tkey, (2, 3, 64, 64), jnp.float32)

    loss = jax.jit(gradient_penalty_loss)(params, source, target, akey)
    loss = jax.block_until_ready(loss)

    assert loss.shape == (), loss.shape
    assert bool(jnp.isfinite(loss))
    assert float(loss) >= 0.0
    print("KERNEL_OK")
</pallas_src>

<mosaic_0001>
module attributes {stable_mosaic.version = 11 : i64} {
  func.func @_interp_kernel(%arg0: i32, %arg1: memref<6x1xf32, #tpu.memory_space<vmem>>, %arg2: memref<6x2048xf32, #tpu.memory_space<vmem>>, %arg3: memref<6x2048xf32, #tpu.memory_space<vmem>>, %arg4: memref<6x2048xf32, #tpu.memory_space<vmem>>) attributes {dimension_semantics = [#tpu.dimension_semantics<parallel>], iteration_bounds = array<i64: 2>, scalar_prefetch = 0 : i64, scratch_operands = 0 : i64, tpu.core_type = #tpu.core_type<tc>, window_params = [{pipeline_mode = #tpu.pipeline_mode<synchronous>, transform_indices = @transform_0, window_bounds = array<i64: 6, 1>}, {transform_indices = @transform_1, window_bounds = array<i64: 6, 2048>}, {transform_indices = @transform_2, window_bounds = array<i64: 6, 2048>}, {transform_indices = @transform_3, window_bounds = array<i64: 6, 2048>}]} {
    %c0 = arith.constant 0 : index
    %c0_0 = arith.constant 0 : index
    %0 = vector.load %arg1[%c0, %c0_0] : memref<6x1xf32, #tpu.memory_space<vmem>>, vector<6x1xf32>
    %c0_1 = arith.constant 0 : index
    %c0_2 = arith.constant 0 : index
    %1 = vector.load %arg2[%c0_1, %c0_2] : memref<6x2048xf32, #tpu.memory_space<vmem>>, vector<6x2048xf32>
    %2 = vector.broadcast %0 : vector<6x1xf32> to vector<6x2048xf32>
    %3 = arith.mulf %2, %1 : vector<6x2048xf32>
    %cst = arith.constant 1.000000e+00 : f32
    %4 = vector.broadcast %cst : f32 to vector<6x1xf32>
    %5 = arith.subf %4, %0 : vector<6x1xf32>
    %c0_3 = arith.constant 0 : index
    %c0_4 = arith.constant 0 : index
    %6 = vector.load %arg3[%c0_3, %c0_4] : memref<6x2048xf32, #tpu.memory_space<vmem>>, vector<6x2048xf32>
    %7 = vector.broadcast %5 : vector<6x1xf32> to vector<6x2048xf32>
    %8 = arith.mulf %7, %6 : vector<6x2048xf32>
    %9 = arith.addf %3, %8 : vector<6x2048xf32>
    %c0_5 = arith.constant 0 : index
    %c0_6 = arith.constant 0 : index
    %10 = vector.load %arg4[%c0_5, %c0_6] : memref<6x2048xf32, #tpu.memory_space<vmem>>, vector<6x2048xf32>
    tpu.vector_store %arg4[%c0_5, %c0_6], %9 {strides = array<i32>} : memref<6x2048xf32, #tpu.memory_space<vmem>>, vector<6x2048xf32>,
    return
  }
  func.func @transform_0(%arg0: i32) -> (i32, i32) {
    %c0_i32 = arith.constant 0 : i32
    %c0_i32_0 = arith.constant 0 : i32
    %c0_i32_1 = arith.constant 0 : i32
    return %c0_i32, %c0_i32_0 : i32, i32
  }
  func.func @transform_1(%arg0: i32) -> (i32, i32) {
    %c0_i32 = arith.constant 0 : i32
    %c0_i32_0 = arith.constant 0 : i32
    return %c0_i32, %arg0 : i32, i32
  }
  func.func @transform_2(%arg0: i32) -> (i32, i32) {
    %c0_i32 = arith.constant 0 : i32
    %c0_i32_0 = arith.constant 0 : i32
    return %c0_i32, %arg0 : i32, i32
  }
  func.func @transform_3(%arg0: i32) -> (i32, i32) {
    %c0_i32 = arith.constant 0 : i32
    %c0_i32_0 = arith.constant 0 : i32
    return %c0_i32, %arg0 : i32, i32
  }
}

module attributes {stable_mosaic.version = 11 : i64} {
  func.func @_conv_lrelu_kernel(%arg0: i32, %arg1: memref<48x2048xbf16, #tpu.memory_space<vmem>>, %arg2: memref<8x48xbf16, #tpu.memory_space<vmem>>, %arg3: memref<8x1xf32, #tpu.memory_space<vmem>>, %arg4: memref<8x2048xf32, #tpu.memory_space<vmem>>) attributes {dimension_semantics = [#tpu.dimension_semantics<parallel>], iteration_bounds = array<i64: 1>, scalar_prefetch = 0 : i64, scratch_operands = 0 : i64, tpu.core_type = #tpu.core_type<tc>, window_params = [{transform_indices = @transform_0, window_bounds = array<i64: 48, 2048>}, {pipeline_mode = #tpu.pipeline_mode<synchronous>, transform_indices = @transform_1, window_bounds = array<i64: 8, 48>}, {pipeline_mode = #tpu.pipeline_mode<synchronous>, transform_indices = @transform_2, window_bounds = array<i64: 8, 1>}, {transform_indices = @transform_3, window_bounds = array<i64: 8, 2048>}]} {
    %c0 = arith.constant 0 : index
    %c0_0 = arith.constant 0 : index
    %0 = vector.load %arg2[%c0, %c0_0] : memref<8x48xbf16, #tpu.memory_space<vmem>>, vector<8x48xbf16>
    %c0_1 = arith.constant 0 : index
    %c0_2 = arith.constant 0 : index
    %1 = vector.load %arg1[%c0_1, %c0_2] : memref<48x2048xbf16, #tpu.memory_space<vmem>>, vector<48x2048xbf16>
    %cst = arith.constant dense<0.000000e+00> : vector<8x2048xf32>
    %2 = tpu.matmul %0, %1, %cst {dimension_numbers = #tpu.dot_dimension_numbers<[1], [0], [0], [1], [0, 0, 1, 1], [], []>} : vector<8x48xbf16>, vector<48x2048xbf16>, vector<8x2048xf32> -> vector<8x2048xf32>
    %c0_3 = arith.constant 0 : index
    %c0_4 = arith.constant 0 : index
    %3 = vector.load %arg3[%c0_3, %c0_4] : memref<8x1xf32, #tpu.memory_space<vmem>>, vector<8x1xf32>
    %4 = vector.broadcast %3 : vector<8x1xf32> to vector<8x2048xf32>
    %5 = arith.addf %2, %4 : vector<8x2048xf32>
    %cst_5 = arith.constant 0.000000e+00 : f32
    %6 = vector.broadcast %cst_5 : f32 to vector<8x2048xf32>
    %7 = arith.cmpf oge, %5, %6 : vector<8x2048xf32>
    %cst_6 = arith.constant 2.000000e-01 : f32
    %8 = vector.broadcast %cst_6 : f32 to vector<8x2048xf32>
    %9 = arith.mulf %8, %5 : vector<8x2048xf32>
    %10 = arith.select %7, %5, %9 : vector<8x2048xi1>, vector<8x2048xf32>
    %c0_7 = arith.constant 0 : index
    %c0_8 = arith.constant 0 : index
    %11 = vector.load %arg4[%c0_7, %c0_8] : memref<8x2048xf32, #tpu.memory_space<vmem>>, vector<8x2048xf32>
    tpu.vector_store %arg4[%c0_7, %c0_8], %10 {strides = array<i32>} : memref<8x2048xf32, #tpu.memory_space<vmem>>, vector<8x2048xf32>,
    return
  }
  func.func @transform_0(%arg0: i32) -> (i32, i32) {
    %c0_i32 = arith.constant 0 : i32
    %c0_i32_0 = arith.constant 0 : i32
    return %c0_i32, %arg0 : i32, i32
  }
  func.func @transform_1(%arg0: i32) -> (i32, i32) {
    %c0_i32 = arith.constant 0 : i32
    %c0_i32_0 = arith.constant 0 : i32
    %c0_i32_1 = arith.constant 0 : i32
    return %c0_i32, %c0_i32_0 : i32, i32
  }
  func.func @transform_2(%arg0: i32) -> (i32, i32) {
    %c0_i32 = arith.constant 0 : i32
    %c0_i32_0 = arith.constant 0 : i32
    %c0_i32_1 = arith.constant 0 : i32
    return %c0_i32, %c0_i32_0 : i32, i32
  }
  func.func @transform_3(%arg0: i32) -> (i32, i32) {
    %c0_i32 = arith.constant 0 : i32
    %c0_i32_0 = arith.constant 0 : i32
    return %c0_i32, %arg0 : i32, i32
  }
}

module attributes {stable_mosaic.version = 11 : i64} {
  func.func @_conv_bn_lrelu_kernel(%arg0: i32, %arg1: memref<128x512xbf16, #tpu.memory_space<vmem>>, %arg2: memref<16x128xbf16, #tpu.memory_space<vmem>>, %arg3: memref<16x1xf32, #tpu.memory_space<vmem>>, %arg4: memref<16x1xf32, #tpu.memory_space<vmem>>, %arg5: memref<16x1xf32, #tpu.memory_space<vmem>>, %arg6: memref<16x512xf32, #tpu.memory_space<vmem>>, %arg7: memref<16x512xf32, #tpu.memory_space<vmem>>, %arg8: memref<16x1xf32, #tpu.memory_space<vmem>>, %arg9: memref<16x1xf32, #tpu.memory_space<vmem>>, %arg10: memref<16x1xf32, #tpu.memory_space<vmem>>) attributes {dimension_semantics = [#tpu.dimension_semantics<arbitrary>], iteration_bounds = array<i64: 1>, scalar_prefetch = 0 : i64, scratch_operands = 2 : i64, tpu.core_type = #tpu.core_type<tc>, window_params = [{transform_indices = @transform_0, window_bounds = array<i64: 128, 512>}, {pipeline_mode = #tpu.pipeline_mode<synchronous>, transform_indices = @transform_1, window_bounds = array<i64: 16, 128>}, {pipeline_mode = #tpu.pipeline_mode<synchronous>, transform_indices = @transform_2, window_bounds = array<i64: 16, 1>}, {pipeline_mode = #tpu.pipeline_mode<synchronous>, transform_indices = @transform_3, window_bounds = array<i64: 16, 1>}, {pipeline_mode = #tpu.pipeline_mode<synchronous>, transform_indices = @transform_4, window_bounds = array<i64: 16, 1>}, {pipeline_mode = #tpu.pipeline_mode<synchronous>, transform_indices = @transform_5, window_bounds = array<i64: 16, 512>}, {pipeline_mode = #tpu.pipeline_mode<synchronous>, transform_indices = @transform_6, window_bounds = array<i64: 16, 512>}, {pipeline_mode = #tpu.pipeline_mode<synchronous>, transform_indices = @transform_7, window_bounds = array<i64: 16, 1>}]} {
    %c0 = arith.constant 0 : index
    %c0_0 = arith.constant 0 : index
    %0 = vector.load %arg4[%c0, %c0_0] : memref<16x1xf32, #tpu.memory_space<vmem>>, vector<16x1xf32>
    %c0_1 = arith.constant 0 : index
    %c0_2 = arith.constant 0 : index
    %1 = vector.load %arg5[%c0_1, %c0_2] : memref<16x1xf32, #tpu.memory_space<vmem>>, vector<16x1xf32>
    %c0_3 = arith.constant 0 : index
    %c0_4 = arith.constant 0 : index
    %2 = vector.load %arg2[%c0_3, %c0_4] : memref<16x128xbf16, #tpu.memory_space<vmem>>, vector<16x128xbf16>
    %c0_5 = arith.constant 0 : index
    %c0_6 = arith.constant 0 : index
    %3 = vector.load %arg1[%c0_5, %c0_6] : memref<128x512xbf16, #tpu.memory_space<vmem>>, vector<128x512xbf16>
    %cst = arith.constant dense<0.000000e+00> : vector<16x512xf32>
    %4 = tpu.matmul %2, %3, %cst {dimension_numbers = #tpu.dot_dimension_numbers<[1], [0], [0], [1], [0, 0, 1, 1], [], []>} : vector<16x128xbf16>, vector<128x512xbf16>, vector<16x512xf32> -> vector<16x512xf32>
    %c0_7 = arith.constant 0 : index
    %c0_8 = arith.constant 0 : index
    %5 = vector.load %arg3[%c0_7, %c0_8] : memref<16x1xf32, #tpu.memory_space<vmem>>, vector<16x1xf32>
    %6 = vector.broadcast %5 : vector<16x1xf32> to vector<16x512xf32>
    %7 = arith.addf %4, %6 : vector<16x512xf32>
    %cst_9 = arith.constant dense<0.000000e+00> : vector<16xf32>
    %8 = vector.multi_reduction <add>, %7, %cst_9 [1] : vector<16x512xf32> to vector<16xf32>
    %9 = vector.shape_cast %8 : vector<16xf32> to vector<16x1xf32>
    %cst_10 = arith.constant 5.120000e+02 : f32
    %10 = vector.broadcast %cst_10 : f32 to vector<16x1xf32>
    %11 = arith.divf %9, %10 : vector<16x1xf32>
    %12 = vector.broadcast %11 : vector<16x1xf32> to vector<16x512xf32>
    %13 = arith.subf %7, %12 : vector<16x512xf32>
    %14 = arith.mulf %13, %13 : vector<16x512xf32>
    %cst_11 = arith.constant dense<0.000000e+00> : vector<16xf32>
    %15 = vector.multi_reduction <add>, %14, %cst_11 [1] : vector<16x512xf32> to vector<16xf32>
    %16 = vector.shape_cast %15 : vector<16xf32> to vector<16x1xf32>
    %cst_12 = arith.constant 5.120000e+02 : f32
    %17 = vector.broadcast %cst_12 : f32 to vector<16x1xf32>
    %18 = arith.divf %16, %17 : vector<16x1xf32>
    %cst_13 = arith.constant 9.99999974E-6 : f32
    %19 = vector.broadcast %cst_13 : f32 to vector<16x1xf32>
    %20 = arith.addf %18, %19 : vector<16x1xf32>
    %21 = math.rsqrt %20 : vector<16x1xf32>
    %22 = vector.broadcast %11 : vector<16x1xf32> to vector<16x512xf32>
    %23 = arith.subf %7, %22 : vector<16x512xf32>
    %24 = vector.broadcast %21 : vector<16x1xf32> to vector<16x512xf32>
    %25 = arith.mulf %23, %24 : vector<16x512xf32>
    %26 = vector.broadcast %0 : vector<16x1xf32> to vector<16x512xf32>
    %27 = arith.mulf %25, %26 : vector<16x512xf32>
    %28 = vector.broadcast %1 : vector<16x1xf32> to vector<16x512xf32>
    %29 = arith.addf %27, %28 : vector<16x512xf32>
    %cst_14 = arith.constant 0.000000e+00 : f32
    %30 = vector.broadcast %cst_14 : f32 to vector<16x512xf32>
    %31 = arith.cmpf oge, %29, %30 : vector<16x512xf32>
    %cst_15 = arith.constant 2.000000e-01 : f32
    %32 = vector.broadcast %cst_15 : f32 to vector<16x512xf32>
    %33 = arith.mulf %32, %29 : vector<16x512xf32>
    %34 = arith.select %31, %29, %33 : vector<16x512xi1>, vector<16x512xf32>
    %c0_16 = arith.constant 0 : index
    %c0_17 = arith.constant 0 : index
    %35 = vector.load %arg6[%c0_16, %c0_17] : memref<16x512xf32, #tpu.memory_space<vmem>>, vector<16x512xf32>
    tpu.vector_store %arg6[%c0_16, %c0_17], %34 {strides = array<i32>} : memref<16x512xf32, #tpu.memory_space<vmem>>, vector<16x512xf32>,
    %c0_18 = arith.constant 0 : index
    %c0_19 = arith.constant 0 : index
    %36 = vector.load %arg7[%c0_18, %c0_19] : memref<16x512xf32, #tpu.memory_space<vmem>>, vector<16x512xf32>
    tpu.vector_store %arg7[%c0_18, %c0_19], %25 {strides = array<i32>} : memref<16x512xf32, #tpu.memory_space<vmem>>, vector<16x512xf32>,
    %c0_20 = arith.constant 0 : index
    %c0_21 = arith.constant 0 : index
    %37 = vector.load %arg8[%c0_20, %c0_21] : memref<16x1xf32, #tpu.memory_space<vmem>>, vector<16x1xf32>
    tpu.vector_store %arg8[%c0_20, %c0_21], %21 {strides = array<i32>} : memref<16x1xf32, #tpu.memory_space<vmem>>, vector<16x1xf32>,
    return
  }
  func.func @transform_0(%arg0: i32) -> (i32, i32) {
    %c0_i32 = arith.constant 0 : i32
    %c0_i32_0 = arith.constant 0 : i32
    return %c0_i32, %arg0 : i32, i32
  }
  func.func @transform_1(%arg0: i32) -> (i32, i32) {
    %c0_i32 = arith.constant 0 : i32
    %c0_i32_0 = arith.constant 0 : i32
    %c0_i32_1 = arith.constant 0 : i32
    return %c0_i32, %c0_i32_0 : i32, i32
  }
  func.func @transform_2(%arg0: i32) -> (i32, i32) {
    %c0_i32 = arith.constant 0 : i32
    %c0_i32_0 = arith.constant 0 : i32
    %c0_i32_1 = arith.constant 0 : i32
    return %c0_i32, %c0_i32_0 : i32, i32
  }
  func.func @transform_3(%arg0: i32) -> (i32, i32) {
    %c0_i32 = arith.constant 0 : i32
    %c0_i32_0 = arith.constant 0 : i32
    %c0_i32_1 = arith.constant 0 : i32
    return %c0_i32, %c0_i32_0 : i32, i32
  }
  func.func @transform_4(%arg0: i32) -> (i32, i32) {
    %c0_i32 = arith.constant 0 : i32
    %c0_i32_0 = arith.constant 0 : i32
    %c0_i32_1 = arith.constant 0 : i32
    return %c0_i32, %c0_i32_0 : i32, i32
  }
  func.func @transform_5(%arg0: i32) -> (i32, i32) {
    %c0_i32 = arith.constant 0 : i32
    %c0_i32_0 = arith.constant 0 : i32
    %c0_i32_1 = arith.constant 0 : i32
    return %c0_i32, %c0_i32_0 : i32, i32
  }
  func.func @transform_6(%arg0: i32) -> (i32, i32) {
    %c0_i32 = arith.constant 0 : i32
    %c0_i32_0 = arith.constant 0 : i32
    %c0_i32_1 = arith.constant 0 : i32
    return %c0_i32, %c0_i32_0 : i32, i32
  }
  func.func @transform_7(%arg0: i32) -> (i32, i32) {
    %c0_i32 = arith.constant 0 : i32
    %c0_i32_0 = arith.constant 0 : i32
    %c0_i32_1 = arith.constant 0 : i32
    return %c0_i32, %c0_i32_0 : i32, i32
  }
}

module attributes {stable_mosaic.version = 11 : i64} {
  func.func @_conv_bn_lrelu_kernel(%arg0: i32, %arg1: memref<256x128xbf16, #tpu.memory_space<vmem>>, %arg2: memref<32x256xbf16, #tpu.memory_space<vmem>>, %arg3: memref<32x1xf32, #tpu.memory_space<vmem>>, %arg4: memref<32x1xf32, #tpu.memory_space<vmem>>, %arg5: memref<32x1xf32, #tpu.memory_space<vmem>>, %arg6: memref<32x128xf32, #tpu.memory_space<vmem>>, %arg7: memref<32x128xf32, #tpu.memory_space<vmem>>, %arg8: memref<32x1xf32, #tpu.memory_space<vmem>>, %arg9: memref<32x1xf32, #tpu.memory_space<vmem>>, %arg10: memref<32x1xf32, #tpu.memory_space<vmem>>) attributes {dimension_semantics = [#tpu.dimension_semantics<arbitrary>], iteration_bounds = array<i64: 1>, scalar_prefetch = 0 : i64, scratch_operands = 2 : i64, tpu.core_type = #tpu.core_type<tc>, window_params = [{transform_indices = @transform_0, window_bounds = array<i64: 256, 128>}, {pipeline_mode = #tpu.pipeline_mode<synchronous>, transform_indices = @transform_1, window_bounds = array<i64: 32, 256>}, {pipeline_mode = #tpu.pipeline_mode<synchronous>, transform_indices = @transform_2, window_bounds = array<i64: 32, 1>}, {pipeline_mode = #tpu.pipeline_mode<synchronous>, transform_indices = @transform_3, window_bounds = array<i64: 32, 1>}, {pipeline_mode = #tpu.pipeline_mode<synchronous>, transform_indices = @transform_4, window_bounds = array<i64: 32, 1>}, {pipeline_mode = #tpu.pipeline_mode<synchronous>, transform_indices = @transform_5, window_bounds = array<i64: 32, 128>}, {pipeline_mode = #tpu.pipeline_mode<synchronous>, transform_indices = @transform_6, window_bounds = array<i64: 32, 128>}, {pipeline_mode = #tpu.pipeline_mode<synchronous>, transform_indices = @transform_7, window_bounds = array<i64: 32, 1>}]} {
    %c0 = arith.constant 0 : index
    %c0_0 = arith.constant 0 : index
    %0 = vector.load %arg4[%c0, %c0_0] : memref<32x1xf32, #tpu.memory_space<vmem>>, vector<32x1xf32>
    %c0_1 = arith.constant 0 : index
    %c0_2 = arith.constant 0 : index
    %1 = vector.load %arg5[%c0_1, %c0_2] : memref<32x1xf32, #tpu.memory_space<vmem>>, vector<32x1xf32>
    %c0_3 = arith.constant 0 : index
    %c0_4 = arith.constant 0 : index
    %2 = vector.load %arg2[%c0_3, %c0_4] : memref<32x256xbf16, #tpu.memory_space<vmem>>, vector<32x256xbf16>
    %c0_5 = arith.constant 0 : index
    %c0_6 = arith.constant 0 : index
    %3 = vector.load %arg1[%c0_5, %c0_6] : memref<256x128xbf16, #tpu.memory_space<vmem>>, vector<256x128xbf16>
    %cst = arith.constant dense<0.000000e+00> : vector<32x128xf32>
    %4 = tpu.matmul %2, %3, %cst {dimension_numbers = #tpu.dot_dimension_numbers<[1], [0], [0], [1], [0, 0, 1, 1], [], []>} : vector<32x256xbf16>, vector<256x128xbf16>, vector<32x128xf32> -> vector<32x128xf32>
    %c0_7 = arith.constant 0 : index
    %c0_8 = arith.constant 0 : index
    %5 = vector.load %arg3[%c0_7, %c0_8] : memref<32x1xf32, #tpu.memory_space<vmem>>, vector<32x1xf32>
    %6 = vector.broadcast %5 : vector<32x1xf32> to vector<32x128xf32>
    %7 = arith.addf %4, %6 : vector<32x128xf32>
    %cst_9 = arith.constant dense<0.000000e+00> : vector<32xf32>
    %8 = vector.multi_reduction <add>, %7, %cst_9 [1] : vector<32x128xf32> to vector<32xf32>
    %9 = vector.shape_cast %8 : vector<32xf32> to vector<32x1xf32>
    %cst_10 = arith.constant 1.280000e+02 : f32
    %10 = vector.broadcast %cst_10 : f32 to vector<32x1xf32>
    %11 = arith.divf %9, %10 : vector<32x1xf32>
    %12 = vector.broadcast %11 : vector<32x1xf32> to vector<32x128xf32>
    %13 = arith.subf %7, %12 : vector<32x128xf32>
    %14 = arith.mulf %13, %13 : vector<32x128xf32>
    %cst_11 = arith.constant dense<0.000000e+00> : vector<32xf32>
    %15 = vector.multi_reduction <add>, %14, %cst_11 [1] : vector<32x128xf32> to vector<32xf32>
    %16 = vector.shape_cast %15 : vector<32xf32> to vector<32x1xf32>
    %cst_12 = arith.constant 1.280000e+02 : f32
    %17 = vector.broadcast %cst_12 : f32 to vector<32x1xf32>
    %18 = arith.divf %16, %17 : vector<32x1xf32>
    %cst_13 = arith.constant 9.99999974E-6 : f32
    %19 = vector.broadcast %cst_13 : f32 to vector<32x1xf32>
    %20 = arith.addf %18, %19 : vector<32x1xf32>
    %21 = math.rsqrt %20 : vector<32x1xf32>
    %22 = vector.broadcast %11 : vector<32x1xf32> to vector<32x128xf32>
    %23 = arith.subf %7, %22 : vector<32x128xf32>
    %24 = vector.broadcast %21 : vector<32x1xf32> to vector<32x128xf32>
    %25 = arith.mulf %23, %24 : vector<32x128xf32>
    %26 = vector.broadcast %0 : vector<32x1xf32> to vector<32x128xf32>
    %27 = arith.mulf %25, %26 : vector<32x128xf32>
    %28 = vector.broadcast %1 : vector<32x1xf32> to vector<32x128xf32>
    %29 = arith.addf %27, %28 : vector<32x128xf32>
    %cst_14 = arith.constant 0.000000e+00 : f32
    %30 = vector.broadcast %cst_14 : f32 to vector<32x128xf32>
    %31 = arith.cmpf oge, %29, %30 : vector<32x128xf32>
    %cst_15 = arith.constant 2.000000e-01 : f32
    %32 = vector.broadcast %cst_15 : f32 to vector<32x128xf32>
    %33 = arith.mulf %32, %29 : vector<32x128xf32>
    %34 = arith.select %31, %29, %33 : vector<32x128xi1>, vector<32x128xf32>
    %c0_16 = arith.constant 0 : index
    %c0_17 = arith.constant 0 : index
    %35 = vector.load %arg6[%c0_16, %c0_17] : memref<32x128xf32, #tpu.memory_space<vmem>>, vector<32x128xf32>
    tpu.vector_store %arg6[%c0_16, %c0_17], %34 {strides = array<i32>} : memref<32x128xf32, #tpu.memory_space<vmem>>, vector<32x128xf32>,
    %c0_18 = arith.constant 0 : index
    %c0_19 = arith.constant 0 : index
    %36 = vector.load %arg7[%c0_18, %c0_19] : memref<32x128xf32, #tpu.memory_space<vmem>>, vector<32x128xf32>
    tpu.vector_store %arg7[%c0_18, %c0_19], %25 {strides = array<i32>} : memref<32x128xf32, #tpu.memory_space<vmem>>, vector<32x128xf32>,
    %c0_20 = arith.constant 0 : index
    %c0_21 = arith.constant 0 : index
    %37 = vector.load %arg8[%c0_20, %c0_21] : memref<32x1xf32, #tpu.memory_space<vmem>>, vector<32x1xf32>
    tpu.vector_store %arg8[%c0_20, %c0_21], %21 {strides = array<i32>} : memref<32x1xf32, #tpu.memory_space<vmem>>, vector<32x1xf32>,
    return
  }
  func.func @transform_0(%arg0: i32) -> (i32, i32) {
    %c0_i32 = arith.constant 0 : i32
    %c0_i32_0 = arith.constant 0 : i32
    return %c0_i32, %arg0 : i32, i32
  }
  func.func @transform_1(%arg0: i32) -> (i32, i32) {
    %c0_i32 = arith.constant 0 : i32
    %c0_i32_0 = arith.constant 0 : i32
    %c0_i32_1 = arith.constant 0 : i32
    return %c0_i32, %c0_i32_0 : i32, i32
  }
  func.func @transform_2(%arg0: i32) -> (i32, i32) {
    %c0_i32 = arith.constant 0 : i32
    %c0_i32_0 = arith.constant 0 : i32
    %c0_i32_1 = arith.constant 0 : i32
    return %c0_i32, %c0_i32_0 : i32, i32
  }
  func.func @transform_3(%arg0: i32) -> (i32, i32) {
    %c0_i32 = arith.constant 0 : i32
    %c0_i32_0 = arith.constant 0 : i32
    %c0_i32_1 = arith.constant 0 : i32
    return %c0_i32, %c0_i32_0 : i32, i32
  }
  func.func @transform_4(%arg0: i32) -> (i32, i32) {
    %c0_i32 = arith.constant 0 : i32
    %c0_i32_0 = arith.constant 0 : i32
    %c0_i32_1 = arith.constant 0 : i32
    return %c0_i32, %c0_i32_0 : i32, i32
  }
  func.func @transform_5(%arg0: i32) -> (i32, i32) {
    %c0_i32 = arith.constant 0 : i32
    %c0_i32_0 = arith.constant 0 : i32
    %c0_i32_1 = arith.constant 0 : i32
    return %c0_i32, %c0_i32_0 : i32, i32
  }
  func.func @transform_6(%arg0: i32) -> (i32, i32) {
    %c0_i32 = arith.constant 0 : i32
    %c0_i32_0 = arith.constant 0 : i32
    %c0_i32_1 = arith.constant 0 : i32
    return %c0_i32, %c0_i32_0 : i32, i32
  }
  func.func @transform_7(%arg0: i32) -> (i32, i32) {
    %c0_i32 = arith.constant 0 : i32
    %c0_i32_0 = arith.constant 0 : i32
    %c0_i32_1 = arith.constant 0 : i32
    return %c0_i32, %c0_i32_0 : i32, i32
  }
}

module attributes {stable_mosaic.version = 11 : i64} {
  func.func @_conv_bn_lrelu_kernel(%arg0: i32, %arg1: memref<512x32xbf16, #tpu.memory_space<vmem>>, %arg2: memref<64x512xbf16, #tpu.memory_space<vmem>>, %arg3: memref<64x1xf32, #tpu.memory_space<vmem>>, %arg4: memref<64x1xf32, #tpu.memory_space<vmem>>, %arg5: memref<64x1xf32, #tpu.memory_space<vmem>>, %arg6: memref<64x32xf32, #tpu.memory_space<vmem>>, %arg7: memref<64x32xf32, #tpu.memory_space<vmem>>, %arg8: memref<64x1xf32, #tpu.memory_space<vmem>>, %arg9: memref<64x1xf32, #tpu.memory_space<vmem>>, %arg10: memref<64x1xf32, #tpu.memory_space<vmem>>) attributes {dimension_semantics = [#tpu.dimension_semantics<arbitrary>], iteration_bounds = array<i64: 1>, scalar_prefetch = 0 : i64, scratch_operands = 2 : i64, tpu.core_type = #tpu.core_type<tc>, window_params = [{transform_indices = @transform_0, window_bounds = array<i64: 512, 32>}, {pipeline_mode = #tpu.pipeline_mode<synchronous>, transform_indices = @transform_1, window_bounds = array<i64: 64, 512>}, {pipeline_mode = #tpu.pipeline_mode<synchronous>, transform_indices = @transform_2, window_bounds = array<i64: 64, 1>}, {pipeline_mode = #tpu.pipeline_mode<synchronous>, transform_indices = @transform_3, window_bounds = array<i64: 64, 1>}, {pipeline_mode = #tpu.pipeline_mode<synchronous>, transform_indices = @transform_4, window_bounds = array<i64: 64, 1>}, {pipeline_mode = #tpu.pipeline_mode<synchronous>, transform_indices = @transform_5, window_bounds = array<i64: 64, 32>}, {pipeline_mode = #tpu.pipeline_mode<synchronous>, transform_indices = @transform_6, window_bounds = array<i64: 64, 32>}, {pipeline_mode = #tpu.pipeline_mode<synchronous>, transform_indices = @transform_7, window_bounds = array<i64: 64, 1>}]} {
    %c0 = arith.constant 0 : index
    %c0_0 = arith.constant 0 : index
    %0 = vector.load %arg4[%c0, %c0_0] : memref<64x1xf32, #tpu.memory_space<vmem>>, vector<64x1xf32>
    %c0_1 = arith.constant 0 : index
    %c0_2 = arith.constant 0 : index
    %1 = vector.load %arg5[%c0_1, %c0_2] : memref<64x1xf32, #tpu.memory_space<vmem>>, vector<64x1xf32>
    %c0_3 = arith.constant 0 : index
    %c0_4 = arith.constant 0 : index
    %2 = vector.load %arg2[%c0_3, %c0_4] : memref<64x512xbf16, #tpu.memory_space<vmem>>, vector<64x512xbf16>
    %c0_5 = arith.constant 0 : index
    %c0_6 = arith.constant 0 : index
    %3 = vector.load %arg1[%c0_5, %c0_6] : memref<512x32xbf16, #tpu.memory_space<vmem>>, vector<512x32xbf16>
    %cst = arith.constant dense<0.000000e+00> : vector<64x32xf32>
    %4 = tpu.matmul %2, %3, %cst {dimension_numbers = #tpu.dot_dimension_numbers<[1], [0], [0], [1], [0, 0, 1, 1], [], []>} : vector<64x512xbf16>, vector<512x32xbf16>, vector<64x32xf32> -> vector<64x32xf32>
    %c0_7 = arith.constant 0 : index
    %c0_8 = arith.constant 0 : index
    %5 = vector.load %arg3[%c0_7, %c0_8] : memref<64x1xf32, #tpu.memory_space<vmem>>, vector<64x1xf32>
    %6 = vector.broadcast %5 : vector<64x1xf32> to vector<64x32xf32>
    %7 = arith.addf %4, %6 : vector<64x32xf32>
    %cst_9 = arith.constant dense<0.000000e+00> : vector<64xf32>
    %8 = vector.multi_reduction <add>, %7, %cst_9 [1] : vector<64x32xf32> to vector<64xf32>
    %9 = vector.shape_cast %8 : vector<64xf32> to vector<64x1xf32>
    %cst_10 = arith.constant 3.200000e+01 : f32
    %10 = vector.broadcast %cst_10 : f32 to vector<64x1xf32>
    %11 = arith.divf %9, %10 : vector<64x1xf32>
    %12 = vector.broadcast %11 : vector<64x1xf32> to vector<64x32xf32>
    %13 = arith.subf %7, %12 : vector<64x32xf32>
    %14 = arith.mulf %13, %13 : vector<64x32xf32>
    %cst_11 = arith.constant dense<0.000000e+00> : vector<64xf32>
    %15 = vector.multi_reduction <add>, %14, %cst_11 [1] : vector<64x32xf32> to vector<64xf32>
    %16 = vector.shape_cast %15 : vector<64xf32> to vector<64x1xf32>
    %cst_12 = arith.constant 3.200000e+01 : f32
    %17 = vector.broadcast %cst_12 : f32 to vector<64x1xf32>
    %18 = arith.divf %16, %17 : vector<64x1xf32>
    %cst_13 = arith.constant 9.99999974E-6 : f32
    %19 = vector.broadcast %cst_13 : f32 to vector<64x1xf32>
    %20 = arith.addf %18, %19 : vector<64x1xf32>
    %21 = math.rsqrt %20 : vector<64x1xf32>
    %22 = vector.broadcast %11 : vector<64x1xf32> to vector<64x32xf32>
    %23 = arith.subf %7, %22 : vector<64x32xf32>
    %24 = vector.broadcast %21 : vector<64x1xf32> to vector<64x32xf32>
    %25 = arith.mulf %23, %24 : vector<64x32xf32>
    %26 = vector.broadcast %0 : vector<64x1xf32> to vector<64x32xf32>
    %27 = arith.mulf %25, %26 : vector<64x32xf32>
    %28 = vector.broadcast %1 : vector<64x1xf32> to vector<64x32xf32>
    %29 = arith.addf %27, %28 : vector<64x32xf32>
    %cst_14 = arith.constant 0.000000e+00 : f32
    %30 = vector.broadcast %cst_14 : f32 to vector<64x32xf32>
    %31 = arith.cmpf oge, %29, %30 : vector<64x32xf32>
    %cst_15 = arith.constant 2.000000e-01 : f32
    %32 = vector.broadcast %cst_15 : f32 to vector<64x32xf32>
    %33 = arith.mulf %32, %29 : vector<64x32xf32>
    %34 = arith.select %31, %29, %33 : vector<64x32xi1>, vector<64x32xf32>
    %c0_16 = arith.constant 0 : index
    %c0_17 = arith.constant 0 : index
    %35 = vector.load %arg6[%c0_16, %c0_17] : memref<64x32xf32, #tpu.memory_space<vmem>>, vector<64x32xf32>
    tpu.vector_store %arg6[%c0_16, %c0_17], %34 {strides = array<i32>} : memref<64x32xf32, #tpu.memory_space<vmem>>, vector<64x32xf32>,
    %c0_18 = arith.constant 0 : index
    %c0_19 = arith.constant 0 : index
    %36 = vector.load %arg7[%c0_18, %c0_19] : memref<64x32xf32, #tpu.memory_space<vmem>>, vector<64x32xf32>
    tpu.vector_store %arg7[%c0_18, %c0_19], %25 {strides = array<i32>} : memref<64x32xf32, #tpu.memory_space<vmem>>, vector<64x32xf32>,
    %c0_20 = arith.constant 0 : index
    %c0_21 = arith.constant 0 : index
    %37 = vector.load %arg8[%c0_20, %c0_21] : memref<64x1xf32, #tpu.memory_space<vmem>>, vector<64x1xf32>
    tpu.vector_store %arg8[%c0_20, %c0_21], %21 {strides = array<i32>} : memref<64x1xf32, #tpu.memory_space<vmem>>, vector<64x1xf32>,
    return
  }
  func.func @transform_0(%arg0: i32) -> (i32, i32) {
    %c0_i32 = arith.constant 0 : i32
    %c0_i32_0 = arith.constant 0 : i32
    return %c0_i32, %arg0 : i32, i32
  }
  func.func @transform_1(%arg0: i32) -> (i32, i32) {
    %c0_i32 = arith.constant 0 : i32
    %c0_i32_0 = arith.constant 0 : i32
    %c0_i32_1 = arith.constant 0 : i32
    return %c0_i32, %c0_i32_0 : i32, i32
  }
  func.func @transform_2(%arg0: i32) -> (i32, i32) {
    %c0_i32 = arith.constant 0 : i32
    %c0_i32_0 = arith.constant 0 : i32
    %c0_i32_1 = arith.constant 0 : i32
    return %c0_i32, %c0_i32_0 : i32, i32
  }
  func.func @transform_3(%arg0: i32) -> (i32, i32) {
    %c0_i32 = arith.constant 0 : i32
    %c0_i32_0 = arith.constant 0 : i32
    %c0_i32_1 = arith.constant 0 : i32
    return %c0_i32, %c0_i32_0 : i32, i32
  }
  func.func @transform_4(%arg0: i32) -> (i32, i32) {
    %c0_i32 = arith.constant 0 : i32
    %c0_i32_0 = arith.constant 0 : i32
    %c0_i32_1 = arith.constant 0 : i32
    return %c0_i32, %c0_i32_0 : i32, i32
  }
  func.func @transform_5(%arg0: i32) -> (i32, i32) {
    %c0_i32 = arith.constant 0 : i32
    %c0_i32_0 = arith.constant 0 : i32
    %c0_i32_1 = arith.constant 0 : i32
    return %c0_i32, %c0_i32_0 : i32, i32
  }
  func.func @transform_6(%arg0: i32) -> (i32, i32) {
    %c0_i32 = arith.constant 0 : i32
    %c0_i32_0 = arith.constant 0 : i32
    %c0_i32_1 = arith.constant 0 : i32
    return %c0_i32, %c0_i32_0 : i32, i32
  }
  func.func @transform_7(%arg0: i32) -> (i32, i32) {
    %c0_i32 = arith.constant 0 : i32
    %c0_i32_0 = arith.constant 0 : i32
    %c0_i32_1 = arith.constant 0 : i32
    return %c0_i32, %c0_i32_0 : i32, i32
  }
}

module attributes {stable_mosaic.version = 11 : i64} {
  func.func @_bn_lrelu_bwd_kernel(%arg0: i32, %arg1: i32, %arg2: memref<64x32xf32, #tpu.memory_space<vmem>>, %arg3: memref<64x32xf32, #tpu.memory_space<vmem>>, %arg4: memref<64x1xf32, #tpu.memory_space<vmem>>, %arg5: memref<64x1xf32, #tpu.memory_space<vmem>>, %arg6: memref<64x1xf32, #tpu.memory_space<vmem>>, %arg7: memref<64x512xbf16, #tpu.memory_space<vmem>>, %arg8: memref<512x32xbf16, #tpu.memory_space<vmem>>, %arg9: memref<64x1xf32, #tpu.memory_space<vmem>>, %arg10: memref<64x1xf32, #tpu.memory_space<vmem>>) attributes {dimension_semantics = [#tpu.dimension_semantics<arbitrary>, #tpu.dimension_semantics<arbitrary>], iteration_bounds = array<i64: 2, 1>, scalar_prefetch = 0 : i64, scratch_operands = 2 : i64, tpu.core_type = #tpu.core_type<tc>, window_params = [{transform_indices = @transform_0, window_bounds = array<i64: 64, 32>}, {transform_indices = @transform_1, window_bounds = array<i64: 64, 32>}, {pipeline_mode = #tpu.pipeline_mode<synchronous>, transform_indices = @transform_2, window_bounds = array<i64: 64, 1>}, {pipeline_mode = #tpu.pipeline_mode<synchronous>, transform_indices = @transform_3, window_bounds = array<i64: 64, 1>}, {pipeline_mode = #tpu.pipeline_mode<synchronous>, transform_indices = @transform_4, window_bounds = array<i64: 64, 1>}, {pipeline_mode = #tpu.pipeline_mode<synchronous>, transform_indices = @transform_5, window_bounds = array<i64: 64, 512>}, {transform_indices = @transform_6, window_bounds = array<i64: 512, 32>}]} {
    %c0_i32 = arith.constant 0 : i32
    %0 = arith.cmpi eq, %arg0, %c0_i32 : i32
    %c0_i32_0 = arith.constant 0 : i32
    %1 = arith.cmpi eq, %arg1, %c0_i32_0 : i32
    %2 = arith.andi %0, %1 : i1
    %3 = arith.extui %2 : i1 to i32
    %c0_i32_1 = arith.constant 0 : i32
    %4 = arith.cmpi ne, %3, %c0_i32_1 : i32
    scf.if %4 {
      %cst_14 = arith.constant 0.000000e+00 : f32
      %25 = vector.broadcast %cst_14 : f32 to vector<64x1xf32>
      %c0_15 = arith.constant 0 : index
      %c0_16 = arith.constant 0 : index
      %26 = vector.load %arg9[%c0_15, %c0_16] : memref<64x1xf32, #tpu.memory_space<vmem>>, vector<64x1xf32>
      tpu.vector_store %arg9[%c0_15, %c0_16], %25 {strides = array<i32>} : memref<64x1xf32, #tpu.memory_space<vmem>>, vector<64x1xf32>,
      %cst_17 = arith.constant 0.000000e+00 : f32
      %27 = vector.broadcast %cst_17 : f32 to vector<64x1xf32>
      %c0_18 = arith.constant 0 : index
      %c0_19 = arith.constant 0 : index
      %28 = vector.load %arg10[%c0_18, %c0_19] : memref<64x1xf32, #tpu.memory_space<vmem>>, vector<64x1xf32>
      tpu.vector_store %arg10[%c0_18, %c0_19], %27 {strides = array<i32>} : memref<64x1xf32, #tpu.memory_space<vmem>>, vector<64x1xf32>,
    } else {
    }
    %c0 = arith.constant 0 : index
    %c0_2 = arith.constant 0 : index
    %5 = vector.load %arg4[%c0, %c0_2] : memref<64x1xf32, #tpu.memory_space<vmem>>, vector<64x1xf32>
    %c0_3 = arith.constant 0 : index
    %c0_4 = arith.constant 0 : index
    %6 = vector.load %arg3[%c0_3, %c0_4] : memref<64x32xf32, #tpu.memory_space<vmem>>, vector<64x32xf32>
    %7 = vector.broadcast %5 : vector<64x1xf32> to vector<64x32xf32>
    %8 = arith.mulf %6, %7 : vector<64x32xf32>
    %c0_5 = arith.constant 0 : index
    %c0_6 = arith.constant 0 : index
    %9 = vector.load %arg5[%c0_5, %c0_6] : memref<64x1xf32, #tpu.memory_space<vmem>>, vector<64x1xf32>
    %10 = vector.broadcast %9 : vector<64x1xf32> to vector<64x32xf32>
    %11 = arith.addf %8, %10 : vector<64x32xf32>
    %c0_7 = arith.constant 0 : index
    %c0_8 = arith.constant 0 : index
    %12 = vector.load %arg2[%c0_7, %c0_8] : memref<64x32xf32, #tpu.memory_space<vmem>>, vector<64x32xf32>
    %cst = arith.constant 0.000000e+00 : f32
    %13 = vector.broadcast %cst : f32 to vector<64x32xf32>
    %14 = arith.cmpf oge, %11, %13 : vector<64x32xf32>
    %cst_9 = arith.constant 1.000000e+00 : f32
    %cst_10 = arith.constant 2.000000e-01 : f32
    %15 = vector.broadcast %cst_9 : f32 to vector<64x32xf32>
    %16 = vector.broadcast %cst_10 : f32 to vector<64x32xf32>
    %17 = arith.select %14, %15, %16 : vector<64x32xi1>, vector<64x32xf32>
    %18 = arith.mulf %12, %17 : vector<64x32xf32>
    %c0_i32_11 = arith.constant 0 : i32
    %19 = arith.cmpi eq, %arg0, %c0_i32_11 : i32
    %20 = arith.extui %19 : i1 to i32
    %c0_i32_12 = arith.constant 0 : i32
    %21 = arith.cmpi ne, %20, %c0_i32_12 : i32
    scf.if %21 {
      %c0_14 = arith.constant 0 : index
      %c0_15 = arith.constant 0 : index
      %25 = vector.load %arg9[%c0_14, %c0_15] : memref<64x1xf32, #tpu.memory_space<vmem>>, vector<64x1xf32>
      %cst_16 = arith.constant dense<0.000000e+00> : vector<64xf32>
      %26 = vector.multi_reduction <add>, %18, %cst_16 [1] : vector<64x32xf32> to vector<64xf32>
      %27 = vector.shape_cast %26 : vector<64xf32> to vector<64x1xf32>
      %28 = arith.addf %25, %27 : vector<64x1xf32>
      %c0_17 = arith.constant 0 : index
      %c0_18 = arith.constant 0 : index
      %29 = vector.load %arg9[%c0_17, %c0_18] : memref<64x1xf32, #tpu.memory_space<vmem>>, vector<64x1xf32>
      tpu.vector_store %arg9[%c0_17, %c0_18], %28 {strides = array<i32>} : memref<64x1xf32, #tpu.memory_space<vmem>>, vector<64x1xf32>,
      %c0_19 = arith.constant 0 : index
      %c0_20 = arith.constant 0 : index
      %30 = vector.load %arg10[%c0_19, %c0_20] : memref<64x1xf32, #tpu.memory_space<vmem>>, vector<64x1xf32>
      %31 = arith.mulf %18, %6 : vector<64x32xf32>
      %cst_21 = arith.constant dense<0.000000e+00> : vector<64xf32>
      %32 = vector.multi_reduction <add>, %31, %cst_21 [1] : vector<64x32xf32> to vector<64xf32>
      %33 = vector.shape_cast %32 : vector<64xf32> to vector<64x1xf32>
      %34 = arith.addf %30, %33 : vector<64x1xf32>
      %c0_22 = arith.constant 0 : index
      %c0_23 = arith.constant 0 : index
      %35 = vector.load %arg10[%c0_22, %c0_23] : memref<64x1xf32, #tpu.memory_space<vmem>>, vector<64x1xf32>
      tpu.vector_store %arg10[%c0_22, %c0_23], %34 {strides = array<i32>} : memref<64x1xf32, #tpu.memory_space<vmem>>, vector<64x1xf32>,
    } else {
    }
    %c1_i32 = arith.constant 1 : i32
    %22 = arith.cmpi eq, %arg0, %c1_i32 : i32
    %23 = arith.extui %22 : i1 to i32
    %c0_i32_13 = arith.constant 0 : i32
    %24 = arith.cmpi ne, %23, %c0_i32_13 : i32
    scf.if %24 {
      %c0_14 = arith.constant 0 : index
      %c0_15 = arith.constant 0 : index
      %25 = vector.load %arg6[%c0_14, %c0_15] : memref<64x1xf32, #tpu.memory_space<vmem>>, vector<64x1xf32>
      %26 = arith.mulf %5, %25 : vector<64x1xf32>
      %c0_16 = arith.constant 0 : index
      %c0_17 = arith.constant 0 : index
      %27 = vector.load %arg9[%c0_16, %c0_17] : memref<64x1xf32, #tpu.memory_space<vmem>>, vector<64x1xf32>
      %cst_18 = arith.constant 3.125000e-02 : f32
      %28 = vector.broadcast %cst_18 : f32 to vector<64x1xf32>
      %29 = arith.mulf %27, %28 : vector<64x1xf32>
      %30 = vector.broadcast %29 : vector<64x1xf32> to vector<64x32xf32>
      %31 = arith.subf %18, %30 : vector<64x32xf32>
      %c0_19 = arith.constant 0 : index
      %c0_20 = arith.constant 0 : index
      %32 = vector.load %arg10[%c0_19, %c0_20] : memref<64x1xf32, #tpu.memory_space<vmem>>, vector<64x1xf32>
      %cst_21 = arith.constant 3.125000e-02 : f32
      %33 = vector.broadcast %cst_21 : f32 to vector<64x1xf32>
      %34 = arith.mulf %32, %33 : vector<64x1xf32>
      %35 = vector.broadcast %34 : vector<64x1xf32> to vector<64x32xf32>
      %36 = arith.mulf %6, %35 : vector<64x32xf32>
      %37 = arith.subf %31, %36 : vector<64x32xf32>
      %38 = vector.broadcast %26 : vector<64x1xf32> to vector<64x32xf32>
      %39 = arith.mulf %38, %37 : vector<64x32xf32>
      %c0_22 = arith.constant 0 : index
      %c0_23 = arith.constant 0 : index
      %40 = vector.load %arg7[%c0_22, %c0_23] : memref<64x512xbf16, #tpu.memory_space<vmem>>, vector<64x512xbf16>
      %41 = arith.truncf %39 : vector<64x32xf32> to vector<64x32xbf16>
      %cst_24 = arith.constant dense<0.000000e+00> : vector<512x32xf32>
      %42 = tpu.matmul %40, %41, %cst_24 {dimension_numbers = #tpu.dot_dimension_numbers<[0], [0], [1], [1], [0, 1, 1, 1], [], []>} : vector<64x512xbf16>, vector<64x32xbf16>, vector<512x32xf32> -> vector<512x32xf32>
      %43 = arith.truncf %42 : vector<512x32xf32> to vector<512x32xbf16>
      %c0_25 = arith.constant 0 : index
      %c0_26 = arith.constant 0 : index
      %44 = vector.load %arg8[%c0_25, %c0_26] : memref<512x32xbf16, #tpu.memory_space<vmem>>, vector<512x32xbf16>
      tpu.vector_store %arg8[%c0_25, %c0_26], %43 {strides = array<i32>} : memref<512x32xbf16, #tpu.memory_space<vmem>>, vector<512x32xbf16>,
    } else {
    }
    return
  }
  func.func @transform_0(%arg0: i32, %arg1: i32) -> (i32, i32) {
    %c0_i32 = arith.constant 0 : i32
    %c0_i32_0 = arith.constant 0 : i32
    return %c0_i32, %arg1 : i32, i32
  }
  func.func @transform_1(%arg0: i32, %arg1: i32) -> (i32, i32) {
    %c0_i32 = arith.constant 0 : i32
    %c0_i32_0 = arith.constant 0 : i32
    return %c0_i32, %arg1 : i32, i32
  }
  func.func @transform_2(%arg0: i32, %arg1: i32) -> (i32, i32) {
    %c0_i32 = arith.constant 0 : i32
    %c0_i32_0 = arith.constant 0 : i32
    %c0_i32_1 = arith.constant 0 : i32
    return %c0_i32, %c0_i32_0 : i32, i32
  }
  func.func @transform_3(%arg0: i32, %arg1: i32) -> (i32, i32) {
    %c0_i32 = arith.constant 0 : i32
    %c0_i32_0 = arith.constant 0 : i32
    %c0_i32_1 = arith.constant 0 : i32
    return %c0_i32, %c0_i32_0 : i32, i32
  }
  func.func @transform_4(%arg0: i32, %arg1: i32) -> (i32, i32) {
    %c0_i32 = arith.constant 0 : i32
    %c0_i32_0 = arith.constant 0 : i32
    %c0_i32_1 = arith.constant 0 : i32
    return %c0_i32, %c0_i32_0 : i32, i32
  }
  func.func @transform_5(%arg0: i32, %arg1: i32) -> (i32, i32) {
    %c0_i32 = arith.constant 0 : i32
    %c0_i32_0 = arith.constant 0 : i32
    %c0_i32_1 = arith.constant 0 : i32
    return %c0_i32, %c0_i32_0 : i32, i32
  }
  func.func @transform_6(%arg0: i32, %arg1: i32) -> (i32, i32) {
    %c0_i32 = arith.constant 0 : i32
    %c0_i32_0 = arith.constant 0 : i32
    return %c0_i32, %arg1 : i32, i32
  }
}

module attributes {stable_mosaic.version = 11 : i64} {
  func.func @_bn_lrelu_bwd_kernel(%arg0: i32, %arg1: i32, %arg2: memref<32x128xf32, #tpu.memory_space<vmem>>, %arg3: memref<32x128xf32, #tpu.memory_space<vmem>>, %arg4: memref<32x1xf32, #tpu.memory_space<vmem>>, %arg5: memref<32x1xf32, #tpu.memory_space<vmem>>, %arg6: memref<32x1xf32, #tpu.memory_space<vmem>>, %arg7: memref<32x256xbf16, #tpu.memory_space<vmem>>, %arg8: memref<256x128xbf16, #tpu.memory_space<vmem>>, %arg9: memref<32x1xf32, #tpu.memory_space<vmem>>, %arg10: memref<32x1xf32, #tpu.memory_space<vmem>>) attributes {dimension_semantics = [#tpu.dimension_semantics<arbitrary>, #tpu.dimension_semantics<arbitrary>], iteration_bounds = array<i64: 2, 1>, scalar_prefetch = 0 : i64, scratch_operands = 2 : i64, tpu.core_type = #tpu.core_type<tc>, window_params = [{transform_indices = @transform_0, window_bounds = array<i64: 32, 128>}, {transform_indices = @transform_1, window_bounds = array<i64: 32, 128>}, {pipeline_mode = #tpu.pipeline_mode<synchronous>, transform_indices = @transform_2, window_bounds = array<i64: 32, 1>}, {pipeline_mode = #tpu.pipeline_mode<synchronous>, transform_indices = @transform_3, window_bounds = array<i64: 32, 1>}, {pipeline_mode = #tpu.pipeline_mode<synchronous>, transform_indices = @transform_4, window_bounds = array<i64: 32, 1>}, {pipeline_mode = #tpu.pipeline_mode<synchronous>, transform_indices = @transform_5, window_bounds = array<i64: 32, 256>}, {transform_indices = @transform_6, window_bounds = array<i64: 256, 128>}]} {
    %c0_i32 = arith.constant 0 : i32
    %0 = arith.cmpi eq, %arg0, %c0_i32 : i32
    %c0_i32_0 = arith.constant 0 : i32
    %1 = arith.cmpi eq, %arg1, %c0_i32_0 : i32
    %2 = arith.andi %0, %1 : i1
    %3 = arith.extui %2 : i1 to i32
    %c0_i32_1 = arith.constant 0 : i32
    %4 = arith.cmpi ne, %3, %c0_i32_1 : i32
    scf.if %4 {
      %cst_14 = arith.constant 0.000000e+00 : f32
      %25 = vector.broadcast %cst_14 : f32 to vector<32x1xf32>
      %c0_15 = arith.constant 0 : index
      %c0_16 = arith.constant 0 : index
      %26 = vector.load %arg9[%c0_15, %c0_16] : memref<32x1xf32, #tpu.memory_space<vmem>>, vector<32x1xf32>
      tpu.vector_store %arg9[%c0_15, %c0_16], %25 {strides = array<i32>} : memref<32x1xf32, #tpu.memory_space<vmem>>, vector<32x1xf32>,
      %cst_17 = arith.constant 0.000000e+00 : f32
      %27 = vector.broadcast %cst_17 : f32 to vector<32x1xf32>
      %c0_18 = arith.constant 0 : index
      %c0_19 = arith.constant 0 : index
      %28 = vector.load %arg10[%c0_18, %c0_19] : memref<32x1xf32, #tpu.memory_space<vmem>>, vector<32x1xf32>
      tpu.vector_store %arg10[%c0_18, %c0_19], %27 {strides = array<i32>} : memref<32x1xf32, #tpu.memory_space<vmem>>, vector<32x1xf32>,
    } else {
    }
    %c0 = arith.constant 0 : index
    %c0_2 = arith.constant 0 : index
    %5 = vector.load %arg4[%c0, %c0_2] : memref<32x1xf32, #tpu.memory_space<vmem>>, vector<32x1xf32>
    %c0_3 = arith.constant 0 : index
    %c0_4 = arith.constant 0 : index
    %6 = vector.load %arg3[%c0_3, %c0_4] : memref<32x128xf32, #tpu.memory_space<vmem>>, vector<32x128xf32>
    %7 = vector.broadcast %5 : vector<32x1xf32> to vector<32x128xf32>
    %8 = arith.mulf %6, %7 : vector<32x128xf32>
    %c0_5 = arith.constant 0 : index
    %c0_6 = arith.constant 0 : index
    %9 = vector.load %arg5[%c0_5, %c0_6] : memref<32x1xf32, #tpu.memory_space<vmem>>, vector<32x1xf32>
    %10 = vector.broadcast %9 : vector<32x1xf32> to vector<32x128xf32>
    %11 = arith.addf %8, %10 : vector<32x128xf32>
    %c0_7 = arith.constant 0 : index
    %c0_8 = arith.constant 0 : index
    %12 = vector.load %arg2[%c0_7, %c0_8] : memref<32x128xf32, #tpu.memory_space<vmem>>, vector<32x128xf32>
    %cst = arith.constant 0.000000e+00 : f32
    %13 = vector.broadcast %cst : f32 to vector<32x128xf32>
    %14 = arith.cmpf oge, %11, %13 : vector<32x128xf32>
    %cst_9 = arith.constant 1.000000e+00 : f32
    %cst_10 = arith.constant 2.000000e-01 : f32
    %15 = vector.broadcast %cst_9 : f32 to vector<32x128xf32>
    %16 = vector.broadcast %cst_10 : f32 to vector<32x128xf32>
    %17 = arith.select %14, %15, %16 : vector<32x128xi1>, vector<32x128xf32>
    %18 = arith.mulf %12, %17 : vector<32x128xf32>
    %c0_i32_11 = arith.constant 0 : i32
    %19 = arith.cmpi eq, %arg0, %c0_i32_11 : i32
    %20 = arith.extui %19 : i1 to i32
    %c0_i32_12 = arith.constant 0 : i32
    %21 = arith.cmpi ne, %20, %c0_i32_12 : i32
    scf.if %21 {
      %c0_14 = arith.constant 0 : index
      %c0_15 = arith.constant 0 : index
      %25 = vector.load %arg9[%c0_14, %c0_15] : memref<32x1xf32, #tpu.memory_space<vmem>>, vector<32x1xf32>
      %cst_16 = arith.constant dense<0.000000e+00> : vector<32xf32>
      %26 = vector.multi_reduction <add>, %18, %cst_16 [1] : vector<32x128xf32> to vector<32xf32>
      %27 = vector.shape_cast %26 : vector<32xf32> to vector<32x1xf32>
      %28 = arith.addf %25, %27 : vector<32x1xf32>
      %c0_17 = arith.constant 0 : index
      %c0_18 = arith.constant 0 : index
      %29 = vector.load %arg9[%c0_17, %c0_18] : memref<32x1xf32, #tpu.memory_space<vmem>>, vector<32x1xf32>
      tpu.vector_store %arg9[%c0_17, %c0_18], %28 {strides = array<i32>} : memref<32x1xf32, #tpu.memory_space<vmem>>, vector<32x1xf32>,
      %c0_19 = arith.constant 0 : index
      %c0_20 = arith.constant 0 : index
      %30 = vector.load %arg10[%c0_19, %c0_20] : memref<32x1xf32, #tpu.memory_space<vmem>>, vector<32x1xf32>
      %31 = arith.mulf %18, %6 : vector<32x128xf32>
      %cst_21 = arith.constant dense<0.000000e+00> : vector<32xf32>
      %32 = vector.multi_reduction <add>, %31, %cst_21 [1] : vector<32x128xf32> to vector<32xf32>
      %33 = vector.shape_cast %32 : vector<32xf32> to vector<32x1xf32>
      %34 = arith.addf %30, %33 : vector<32x1xf32>
      %c0_22 = arith.constant 0 : index
      %c0_23 = arith.constant 0 : index
      %35 = vector.load %arg10[%c0_22, %c0_23] : memref<32x1xf32, #tpu.memory_space<vmem>>, vector<32x1xf32>
      tpu.vector_store %arg10[%c0_22, %c0_23], %34 {strides = array<i32>} : memref<32x1xf32, #tpu.memory_space<vmem>>, vector<32x1xf32>,
    } else {
    }
    %c1_i32 = arith.constant 1 : i32
    %22 = arith.cmpi eq, %arg0, %c1_i32 : i32
    %23 = arith.extui %22 : i1 to i32
    %c0_i32_13 = arith.constant 0 : i32
    %24 = arith.cmpi ne, %23, %c0_i32_13 : i32
    scf.if %24 {
      %c0_14 = arith.constant 0 : index
      %c0_15 = arith.constant 0 : index
      %25 = vector.load %arg6[%c0_14, %c0_15] : memref<32x1xf32, #tpu.memory_space<vmem>>, vector<32x1xf32>
      %26 = arith.mulf %5, %25 : vector<32x1xf32>
      %c0_16 = arith.constant 0 : index
      %c0_17 = arith.constant 0 : index
      %27 = vector.load %arg9[%c0_16, %c0_17] : memref<32x1xf32, #tpu.memory_space<vmem>>, vector<32x1xf32>
      %cst_18 = arith.constant 7.812500e-03 : f32
      %28 = vector.broadcast %cst_18 : f32 to vector<32x1xf32>
      %29 = arith.mulf %27, %28 : vector<32x1xf32>
      %30 = vector.broadcast %29 : vector<32x1xf32> to vector<32x128xf32>
      %31 = arith.subf %18, %30 : vector<32x128xf32>
      %c0_19 = arith.constant 0 : index
      %c0_20 = arith.constant 0 : index
      %32 = vector.load %arg10[%c0_19, %c0_20] : memref<32x1xf32, #tpu.memory_space<vmem>>, vector<32x1xf32>
      %cst_21 = arith.constant 7.812500e-03 : f32
      %33 = vector.broadcast %cst_21 : f32 to vector<32x1xf32>
      %34 = arith.mulf %32, %33 : vector<32x1xf32>
      %35 = vector.broadcast %34 : vector<32x1xf32> to vector<32x128xf32>
      %36 = arith.mulf %6, %35 : vector<32x128xf32>
      %37 = arith.subf %31, %36 : vector<32x128xf32>
      %38 = vector.broadcast %26 : vector<32x1xf32> to vector<32x128xf32>
      %39 = arith.mulf %38, %37 : vector<32x128xf32>
      %c0_22 = arith.constant 0 : index
      %c0_23 = arith.constant 0 : index
      %40 = vector.load %arg7[%c0_22, %c0_23] : memref<32x256xbf16, #tpu.memory_space<vmem>>, vector<32x256xbf16>
      %41 = arith.truncf %39 : vector<32x128xf32> to vector<32x128xbf16>
      %cst_24 = arith.constant dense<0.000000e+00> : vector<256x128xf32>
      %42 = tpu.matmul %40, %41, %cst_24 {dimension_numbers = #tpu.dot_dimension_numbers<[0], [0], [1], [1], [0, 1, 1, 1], [], []>} : vector<32x256xbf16>, vector<32x128xbf16>, vector<256x128xf32> -> vector<256x128xf32>
      %43 = arith.truncf %42 : vector<256x128xf32> to vector<256x128xbf16>
      %c0_25 = arith.constant 0 : index
      %c0_26 = arith.constant 0 : index
      %44 = vector.load %arg8[%c0_25, %c0_26] : memref<256x128xbf16, #tpu.memory_space<vmem>>, vector<256x128xbf16>
      tpu.vector_store %arg8[%c0_25, %c0_26], %43 {strides = array<i32>} : memref<256x128xbf16, #tpu.memory_space<vmem>>, vector<256x128xbf16>,
    } else {
    }
    return
  }
  func.func @transform_0(%arg0: i32, %arg1: i32) -> (i32, i32) {
    %c0_i32 = arith.constant 0 : i32
    %c0_i32_0 = arith.constant 0 : i32
    return %c0_i32, %arg1 : i32, i32
  }
  func.func @transform_1(%arg0: i32, %arg1: i32) -> (i32, i32) {
    %c0_i32 = arith.constant 0 : i32
    %c0_i32_0 = arith.constant 0 : i32
    return %c0_i32, %arg1 : i32, i32
  }
  func.func @transform_2(%arg0: i32, %arg1: i32) -> (i32, i32) {
    %c0_i32 = arith.constant 0 : i32
    %c0_i32_0 = arith.constant 0 : i32
    %c0_i32_1 = arith.constant 0 : i32
    return %c0_i32, %c0_i32_0 : i32, i32
  }
  func.func @transform_3(%arg0: i32, %arg1: i32) -> (i32, i32) {
    %c0_i32 = arith.constant 0 : i32
    %c0_i32_0 = arith.constant 0 : i32
    %c0_i32_1 = arith.constant 0 : i32
    return %c0_i32, %c0_i32_0 : i32, i32
  }
  func.func @transform_4(%arg0: i32, %arg1: i32) -> (i32, i32) {
    %c0_i32 = arith.constant 0 : i32
    %c0_i32_0 = arith.constant 0 : i32
    %c0_i32_1 = arith.constant 0 : i32
    return %c0_i32, %c0_i32_0 : i32, i32
  }
  func.func @transform_5(%arg0: i32, %arg1: i32) -> (i32, i32) {
    %c0_i32 = arith.constant 0 : i32
    %c0_i32_0 = arith.constant 0 : i32
    %c0_i32_1 = arith.constant 0 : i32
    return %c0_i32, %c0_i32_0 : i32, i32
  }
  func.func @transform_6(%arg0: i32, %arg1: i32) -> (i32, i32) {
    %c0_i32 = arith.constant 0 : i32
    %c0_i32_0 = arith.constant 0 : i32
    return %c0_i32, %arg1 : i32, i32
  }
}

module attributes {stable_mosaic.version = 11 : i64} {
  func.func @_bn_lrelu_bwd_kernel(%arg0: i32, %arg1: i32, %arg2: memref<16x512xf32, #tpu.memory_space<vmem>>, %arg3: memref<16x512xf32, #tpu.memory_space<vmem>>, %arg4: memref<16x1xf32, #tpu.memory_space<vmem>>, %arg5: memref<16x1xf32, #tpu.memory_space<vmem>>, %arg6: memref<16x1xf32, #tpu.memory_space<vmem>>, %arg7: memref<16x128xbf16, #tpu.memory_space<vmem>>, %arg8: memref<128x512xbf16, #tpu.memory_space<vmem>>, %arg9: memref<16x1xf32, #tpu.memory_space<vmem>>, %arg10: memref<16x1xf32, #tpu.memory_space<vmem>>) attributes {dimension_semantics = [#tpu.dimension_semantics<arbitrary>, #tpu.dimension_semantics<arbitrary>], iteration_bounds = array<i64: 2, 1>, scalar_prefetch = 0 : i64, scratch_operands = 2 : i64, tpu.core_type = #tpu.core_type<tc>, window_params = [{transform_indices = @transform_0, window_bounds = array<i64: 16, 512>}, {transform_indices = @transform_1, window_bounds = array<i64: 16, 512>}, {pipeline_mode = #tpu.pipeline_mode<synchronous>, transform_indices = @transform_2, window_bounds = array<i64: 16, 1>}, {pipeline_mode = #tpu.pipeline_mode<synchronous>, transform_indices = @transform_3, window_bounds = array<i64: 16, 1>}, {pipeline_mode = #tpu.pipeline_mode<synchronous>, transform_indices = @transform_4, window_bounds = array<i64: 16, 1>}, {pipeline_mode = #tpu.pipeline_mode<synchronous>, transform_indices = @transform_5, window_bounds = array<i64: 16, 128>}, {transform_indices = @transform_6, window_bounds = array<i64: 128, 512>}]} {
    %c0_i32 = arith.constant 0 : i32
    %0 = arith.cmpi eq, %arg0, %c0_i32 : i32
    %c0_i32_0 = arith.constant 0 : i32
    %1 = arith.cmpi eq, %arg1, %c0_i32_0 : i32
    %2 = arith.andi %0, %1 : i1
    %3 = arith.extui %2 : i1 to i32
    %c0_i32_1 = arith.constant 0 : i32
    %4 = arith.cmpi ne, %3, %c0_i32_1 : i32
    scf.if %4 {
      %cst_14 = arith.constant 0.000000e+00 : f32
      %25 = vector.broadcast %cst_14 : f32 to vector<16x1xf32>
      %c0_15 = arith.constant 0 : index
      %c0_16 = arith.constant 0 : index
      %26 = vector.load %arg9[%c0_15, %c0_16] : memref<16x1xf32, #tpu.memory_space<vmem>>, vector<16x1xf32>
      tpu.vector_store %arg9[%c0_15, %c0_16], %25 {strides = array<i32>} : memref<16x1xf32, #tpu.memory_space<vmem>>, vector<16x1xf32>,
      %cst_17 = arith.constant 0.000000e+00 : f32
      %27 = vector.broadcast %cst_17 : f32 to vector<16x1xf32>
      %c0_18 = arith.constant 0 : index
      %c0_19 = arith.constant 0 : index
      %28 = vector.load %arg10[%c0_18, %c0_19] : memref<16x1xf32, #tpu.memory_space<vmem>>, vector<16x1xf32>
      tpu.vector_store %arg10[%c0_18, %c0_19], %27 {strides = array<i32>} : memref<16x1xf32, #tpu.memory_space<vmem>>, vector<16x1xf32>,
    } else {
    }
    %c0 = arith.constant 0 : index
    %c0_2 = arith.constant 0 : index
    %5 = vector.load %arg4[%c0, %c0_2] : memref<16x1xf32, #tpu.memory_space<vmem>>, vector<16x1xf32>
    %c0_3 = arith.constant 0 : index
    %c0_4 = arith.constant 0 : index
    %6 = vector.load %arg3[%c0_3, %c0_4] : memref<16x512xf32, #tpu.memory_space<vmem>>, vector<16x512xf32>
    %7 = vector.broadcast %5 : vector<16x1xf32> to vector<16x512xf32>
    %8 = arith.mulf %6, %7 : vector<16x512xf32>
    %c0_5 = arith.constant 0 : index
    %c0_6 = arith.constant 0 : index
    %9 = vector.load %arg5[%c0_5, %c0_6] : memref<16x1xf32, #tpu.memory_space<vmem>>, vector<16x1xf32>
    %10 = vector.broadcast %9 : vector<16x1xf32> to vector<16x512xf32>
    %11 = arith.addf %8, %10 : vector<16x512xf32>
    %c0_7 = arith.constant 0 : index
    %c0_8 = arith.constant 0 : index
    %12 = vector.load %arg2[%c0_7, %c0_8] : memref<16x512xf32, #tpu.memory_space<vmem>>, vector<16x512xf32>
    %cst = arith.constant 0.000000e+00 : f32
    %13 = vector.broadcast %cst : f32 to vector<16x512xf32>
    %14 = arith.cmpf oge, %11, %13 : vector<16x512xf32>
    %cst_9 = arith.constant 1.000000e+00 : f32
    %cst_10 = arith.constant 2.000000e-01 : f32
    %15 = vector.broadcast %cst_9 : f32 to vector<16x512xf32>
    %16 = vector.broadcast %cst_10 : f32 to vector<16x512xf32>
    %17 = arith.select %14, %15, %16 : vector<16x512xi1>, vector<16x512xf32>
    %18 = arith.mulf %12, %17 : vector<16x512xf32>
    %c0_i32_11 = arith.constant 0 : i32
    %19 = arith.cmpi eq, %arg0, %c0_i32_11 : i32
    %20 = arith.extui %19 : i1 to i32
    %c0_i32_12 = arith.constant 0 : i32
    %21 = arith.cmpi ne, %20, %c0_i32_12 : i32
    scf.if %21 {
      %c0_14 = arith.constant 0 : index
      %c0_15 = arith.constant 0 : index
      %25 = vector.load %arg9[%c0_14, %c0_15] : memref<16x1xf32, #tpu.memory_space<vmem>>, vector<16x1xf32>
      %cst_16 = arith.constant dense<0.000000e+00> : vector<16xf32>
      %26 = vector.multi_reduction <add>, %18, %cst_16 [1] : vector<16x512xf32> to vector<16xf32>
      %27 = vector.shape_cast %26 : vector<16xf32> to vector<16x1xf32>
      %28 = arith.addf %25, %27 : vector<16x1xf32>
      %c0_17 = arith.constant 0 : index
      %c0_18 = arith.constant 0 : index
      %29 = vector.load %arg9[%c0_17, %c0_18] : memref<16x1xf32, #tpu.memory_space<vmem>>, vector<16x1xf32>
      tpu.vector_store %arg9[%c0_17, %c0_18], %28 {strides = array<i32>} : memref<16x1xf32, #tpu.memory_space<vmem>>, vector<16x1xf32>,
      %c0_19 = arith.constant 0 : index
      %c0_20 = arith.constant 0 : index
      %30 = vector.load %arg10[%c0_19, %c0_20] : memref<16x1xf32, #tpu.memory_space<vmem>>, vector<16x1xf32>
      %31 = arith.mulf %18, %6 : vector<16x512xf32>
      %cst_21 = arith.constant dense<0.000000e+00> : vector<16xf32>
      %32 = vector.multi_reduction <add>, %31, %cst_21 [1] : vector<16x512xf32> to vector<16xf32>
      %33 = vector.shape_cast %32 : vector<16xf32> to vector<16x1xf32>
      %34 = arith.addf %30, %33 : vector<16x1xf32>
      %c0_22 = arith.constant 0 : index
      %c0_23 = arith.constant 0 : index
      %35 = vector.load %arg10[%c0_22, %c0_23] : memref<16x1xf32, #tpu.memory_space<vmem>>, vector<16x1xf32>
      tpu.vector_store %arg10[%c0_22, %c0_23], %34 {strides = array<i32>} : memref<16x1xf32, #tpu.memory_space<vmem>>, vector<16x1xf32>,
    } else {
    }
    %c1_i32 = arith.constant 1 : i32
    %22 = arith.cmpi eq, %arg0, %c1_i32 : i32
    %23 = arith.extui %22 : i1 to i32
    %c0_i32_13 = arith.constant 0 : i32
    %24 = arith.cmpi ne, %23, %c0_i32_13 : i32
    scf.if %24 {
      %c0_14 = arith.constant 0 : index
      %c0_15 = arith.constant 0 : index
      %25 = vector.load %arg6[%c0_14, %c0_15] : memref<16x1xf32, #tpu.memory_space<vmem>>, vector<16x1xf32>
      %26 = arith.mulf %5, %25 : vector<16x1xf32>
      %c0_16 = arith.constant 0 : index
      %c0_17 = arith.constant 0 : index
      %27 = vector.load %arg9[%c0_16, %c0_17] : memref<16x1xf32, #tpu.memory_space<vmem>>, vector<16x1xf32>
      %cst_18 = arith.constant 0.001953125 : f32
      %28 = vector.broadcast %cst_18 : f32 to vector<16x1xf32>
      %29 = arith.mulf %27, %28 : vector<16x1xf32>
      %30 = vector.broadcast %29 : vector<16x1xf32> to vector<16x512xf32>
      %31 = arith.subf %18, %30 : vector<16x512xf32>
      %c0_19 = arith.constant 0 : index
      %c0_20 = arith.constant 0 : index
      %32 = vector.load %arg10[%c0_19, %c0_20] : memref<16x1xf32, #tpu.memory_space<vmem>>, vector<16x1xf32>
      %cst_21 = arith.constant 0.001953125 : f32
      %33 = vector.broadcast %cst_21 : f32 to vector<16x1xf32>
      %34 = arith.mulf %32, %33 : vector<16x1xf32>
      %35 = vector.broadcast %34 : vector<16x1xf32> to vector<16x512xf32>
      %36 = arith.mulf %6, %35 : vector<16x512xf32>
      %37 = arith.subf %31, %36 : vector<16x512xf32>
      %38 = vector.broadcast %26 : vector<16x1xf32> to vector<16x512xf32>
      %39 = arith.mulf %38, %37 : vector<16x512xf32>
      %c0_22 = arith.constant 0 : index
      %c0_23 = arith.constant 0 : index
      %40 = vector.load %arg7[%c0_22, %c0_23] : memref<16x128xbf16, #tpu.memory_space<vmem>>, vector<16x128xbf16>
      %41 = arith.truncf %39 : vector<16x512xf32> to vector<16x512xbf16>
      %cst_24 = arith.constant dense<0.000000e+00> : vector<128x512xf32>
      %42 = tpu.matmul %40, %41, %cst_24 {dimension_numbers = #tpu.dot_dimension_numbers<[0], [0], [1], [1], [0, 1, 1, 1], [], []>} : vector<16x128xbf16>, vector<16x512xbf16>, vector<128x512xf32> -> vector<128x512xf32>
      %43 = arith.truncf %42 : vector<128x512xf32> to vector<128x512xbf16>
      %c0_25 = arith.constant 0 : index
      %c0_26 = arith.constant 0 : index
      %44 = vector.load %arg8[%c0_25, %c0_26] : memref<128x512xbf16, #tpu.memory_space<vmem>>, vector<128x512xbf16>
      tpu.vector_store %arg8[%c0_25, %c0_26], %43 {strides = array<i32>} : memref<128x512xbf16, #tpu.memory_space<vmem>>, vector<128x512xbf16>,
    } else {
    }
    return
  }
  func.func @transform_0(%arg0: i32, %arg1: i32) -> (i32, i32) {
    %c0_i32 = arith.constant 0 : i32
    %c0_i32_0 = arith.constant 0 : i32
    return %c0_i32, %arg1 : i32, i32
  }
  func.func @transform_1(%arg0: i32, %arg1: i32) -> (i32, i32) {
    %c0_i32 = arith.constant 0 : i32
    %c0_i32_0 = arith.constant 0 : i32
    return %c0_i32, %arg1 : i32, i32
  }
  func.func @transform_2(%arg0: i32, %arg1: i32) -> (i32, i32) {
    %c0_i32 = arith.constant 0 : i32
    %c0_i32_0 = arith.constant 0 : i32
    %c0_i32_1 = arith.constant 0 : i32
    return %c0_i32, %c0_i32_0 : i32, i32
  }
  func.func @transform_3(%arg0: i32, %arg1: i32) -> (i32, i32) {
    %c0_i32 = arith.constant 0 : i32
    %c0_i32_0 = arith.constant 0 : i32
    %c0_i32_1 = arith.constant 0 : i32
    return %c0_i32, %c0_i32_0 : i32, i32
  }
  func.func @transform_4(%arg0: i32, %arg1: i32) -> (i32, i32) {
    %c0_i32 = arith.constant 0 : i32
    %c0_i32_0 = arith.constant 0 : i32
    %c0_i32_1 = arith.constant 0 : i32
    return %c0_i32, %c0_i32_0 : i32, i32
  }
  func.func @transform_5(%arg0: i32, %arg1: i32) -> (i32, i32) {
    %c0_i32 = arith.constant 0 : i32
    %c0_i32_0 = arith.constant 0 : i32
    %c0_i32_1 = arith.constant 0 : i32
    return %c0_i32, %c0_i32_0 : i32, i32
  }
  func.func @transform_6(%arg0: i32, %arg1: i32) -> (i32, i32) {
    %c0_i32 = arith.constant 0 : i32
    %c0_i32_0 = arith.constant 0 : i32
    return %c0_i32, %arg1 : i32, i32
  }
}

module attributes {stable_mosaic.version = 11 : i64} {
  func.func @_lrelu_bwd_kernel(%arg0: i32, %arg1: memref<8x2048xf32, #tpu.memory_space<vmem>>, %arg2: memref<8x2048xf32, #tpu.memory_space<vmem>>, %arg3: memref<8x48xbf16, #tpu.memory_space<vmem>>, %arg4: memref<48x2048xbf16, #tpu.memory_space<vmem>>) attributes {dimension_semantics = [#tpu.dimension_semantics<parallel>], iteration_bounds = array<i64: 1>, scalar_prefetch = 0 : i64, scratch_operands = 0 : i64, tpu.core_type = #tpu.core_type<tc>, window_params = [{transform_indices = @transform_0, window_bounds = array<i64: 8, 2048>}, {transform_indices = @transform_1, window_bounds = array<i64: 8, 2048>}, {pipeline_mode = #tpu.pipeline_mode<synchronous>, transform_indices = @transform_2, window_bounds = array<i64: 8, 48>}, {transform_indices = @transform_3, window_bounds = array<i64: 48, 2048>}]} {
    %c0 = arith.constant 0 : index
    %c0_0 = arith.constant 0 : index
    %0 = vector.load %arg1[%c0, %c0_0] : memref<8x2048xf32, #tpu.memory_space<vmem>>, vector<8x2048xf32>
    %c0_1 = arith.constant 0 : index
    %c0_2 = arith.constant 0 : index
    %1 = vector.load %arg2[%c0_1, %c0_2] : memref<8x2048xf32, #tpu.memory_space<vmem>>, vector<8x2048xf32>
    %cst = arith.constant 0.000000e+00 : f32
    %2 = vector.broadcast %cst : f32 to vector<8x2048xf32>
    %3 = arith.cmpf oge, %1, %2 : vector<8x2048xf32>
    %cst_3 = arith.constant 1.000000e+00 : f32
    %cst_4 = arith.constant 2.000000e-01 : f32
    %4 = vector.broadcast %cst_3 : f32 to vector<8x2048xf32>
    %5 = vector.broadcast %cst_4 : f32 to vector<8x2048xf32>
    %6 = arith.select %3, %4, %5 : vector<8x2048xi1>, vector<8x2048xf32>
    %7 = arith.mulf %0, %6 : vector<8x2048xf32>
    %c0_5 = arith.constant 0 : index
    %c0_6 = arith.constant 0 : index
    %8 = vector.load %arg3[%c0_5, %c0_6] : memref<8x48xbf16, #tpu.memory_space<vmem>>, vector<8x48xbf16>
    %9 = arith.truncf %7 : vector<8x2048xf32> to vector<8x2048xbf16>
    %cst_7 = arith.constant dense<0.000000e+00> : vector<48x2048xf32>
    %10 = tpu.matmul %8, %9, %cst_7 {dimension_numbers = #tpu.dot_dimension_numbers<[0], [0], [1], [1], [0, 1, 1, 1], [], []>} : vector<8x48xbf16>, vector<8x2048xbf16>, vector<48x2048xf32> -> vector<48x2048xf32>
    %11 = arith.truncf %10 : vector<48x2048xf32> to vector<48x2048xbf16>
    %c0_8 = arith.constant 0 : index
    %c0_9 = arith.constant 0 : index
    %12 = vector.load %arg4[%c0_8, %c0_9] : memref<48x2048xbf16, #tpu.memory_space<vmem>>, vector<48x2048xbf16>
    tpu.vector_store %arg4[%c0_8, %c0_9], %11 {strides = array<i32>} : memref<48x2048xbf16, #tpu.memory_space<vmem>>, vector<48x2048xbf16>,
    return
  }
  func.func @transform_0(%arg0: i32) -> (i32, i32) {
    %c0_i32 = arith.constant 0 : i32
    %c0_i32_0 = arith.constant 0 : i32
    return %c0_i32, %arg0 : i32, i32
  }
  func.func @transform_1(%arg0: i32) -> (i32, i32) {
    %c0_i32 = arith.constant 0 : i32
    %c0_i32_0 = arith.constant 0 : i32
    return %c0_i32, %arg0 : i32, i32
  }
  func.func @transform_2(%arg0: i32) -> (i32, i32) {
    %c0_i32 = arith.constant 0 : i32
    %c0_i32_0 = arith.constant 0 : i32
    %c0_i32_1 = arith.constant 0 : i32
    return %c0_i32, %c0_i32_0 : i32, i32
  }
  func.func @transform_3(%arg0: i32) -> (i32, i32) {
    %c0_i32 = arith.constant 0 : i32
    %c0_i32_0 = arith.constant 0 : i32
    return %c0_i32, %arg0 : i32, i32
  }
}

module attributes {stable_mosaic.version = 11 : i64} {
  func.func @_gp_penalty_kernel(%arg0: i32, %arg1: memref<2x2048xf32, #tpu.memory_space<vmem>>, %arg2: memref<1x1xf32, #tpu.memory_space<vmem>>, %arg3: memref<2x1xf32, #tpu.memory_space<vmem>>) attributes {dimension_semantics = [#tpu.dimension_semantics<arbitrary>], iteration_bounds = array<i64: 6>, scalar_prefetch = 0 : i64, scratch_operands = 1 : i64, tpu.core_type = #tpu.core_type<tc>, window_params = [{transform_indices = @transform_0, window_bounds = array<i64: 2, 2048>}, {pipeline_mode = #tpu.pipeline_mode<synchronous>, transform_indices = @transform_1, window_bounds = array<i64: 1, 1>}]} {
    %c0_i32 = arith.constant 0 : i32
    %0 = arith.cmpi eq, %arg0, %c0_i32 : i32
    %1 = arith.extui %0 : i1 to i32
    %c0_i32_0 = arith.constant 0 : i32
    %2 = arith.cmpi ne, %1, %c0_i32_0 : i32
    scf.if %2 {
      %cst_7 = arith.constant 0.000000e+00 : f32
      %13 = vector.broadcast %cst_7 : f32 to vector<2x1xf32>
      %c0_8 = arith.constant 0 : index
      %c0_9 = arith.constant 0 : index
      %14 = vector.load %arg3[%c0_8, %c0_9] : memref<2x1xf32, #tpu.memory_space<vmem>>, vector<2x1xf32>
      tpu.vector_store %arg3[%c0_8, %c0_9], %13 {strides = array<i32>} : memref<2x1xf32, #tpu.memory_space<vmem>>, vector<2x1xf32>,
    } else {
    }
    %c0 = arith.constant 0 : index
    %c0_1 = arith.constant 0 : index
    %3 = vector.load %arg1[%c0, %c0_1] : memref<2x2048xf32, #tpu.memory_space<vmem>>, vector<2x2048xf32>
    %c0_2 = arith.constant 0 : index
    %c0_3 = arith.constant 0 : index
    %4 = vector.load %arg3[%c0_2, %c0_3] : memref<2x1xf32, #tpu.memory_space<vmem>>, vector<2x1xf32>
    %5 = arith.mulf %3, %3 : vector<2x2048xf32>
    %cst = arith.constant dense<0.000000e+00> : vector<2xf32>
    %6 = vector.multi_reduction <add>, %5, %cst [1] : vector<2x2048xf32> to vector<2xf32>
    %7 = vector.shape_cast %6 : vector<2xf32> to vector<2x1xf32>
    %8 = arith.addf %4, %7 : vector<2x1xf32>
    %c0_4 = arith.constant 0 : index
    %c0_5 = arith.constant 0 : index
    %9 = vector.load %arg3[%c0_4, %c0_5] : memref<2x1xf32, #tpu.memory_space<vmem>>, vector<2x1xf32>
    tpu.vector_store %arg3[%c0_4, %c0_5], %8 {strides = array<i32>} : memref<2x1xf32, #tpu.memory_space<vmem>>, vector<2x1xf32>,
    %c5_i32 = arith.constant 5 : i32
    %10 = arith.cmpi eq, %arg0, %c5_i32 : i32
    %11 = arith.extui %10 : i1 to i32
    %c0_i32_6 = arith.constant 0 : i32
    %12 = arith.cmpi ne, %11, %c0_i32_6 : i32
    scf.if %12 {
      %c0_7 = arith.constant 0 : index
      %c0_8 = arith.constant 0 : index
      %13 = vector.load %arg3[%c0_7, %c0_8] : memref<2x1xf32, #tpu.memory_space<vmem>>, vector<2x1xf32>
      %14 = math.sqrt %13 : vector<2x1xf32>
      %cst_9 = arith.constant 1.000000e+00 : f32
      %15 = vector.broadcast %cst_9 : f32 to vector<2x1xf32>
      %16 = arith.subf %14, %15 : vector<2x1xf32>
      %17 = arith.mulf %16, %16 : vector<2x1xf32>
      %cst_10 = arith.constant dense<0.000000e+00> : vector<1xf32>
      %18 = vector.multi_reduction <add>, %17, %cst_10 [0] : vector<2x1xf32> to vector<1xf32>
      %19 = vector.shape_cast %18 : vector<1xf32> to vector<1x1xf32>
      %cst_11 = arith.constant 5.000000e-01 : f32
      %20 = vector.broadcast %cst_11 : f32 to vector<1x1xf32>
      %21 = arith.mulf %19, %20 : vector<1x1xf32>
      %c0_12 = arith.constant 0 : index
      %c0_13 = arith.constant 0 : index
      %22 = vector.load %arg2[%c0_12, %c0_13] : memref<1x1xf32, #tpu.memory_space<vmem>>, vector<1x1xf32>
      tpu.vector_store %arg2[%c0_12, %c0_13], %21 {strides = array<i32>} : memref<1x1xf32, #tpu.memory_space<vmem>>, vector<1x1xf32>,
    } else {
    }
    return
  }
  func.func @transform_0(%arg0: i32) -> (i32, i32) {
    %c0_i32 = arith.constant 0 : i32
    %c0_i32_0 = arith.constant 0 : i32
    return %c0_i32, %arg0 : i32, i32
  }
  func.func @transform_1(%arg0: i32) -> (i32, i32) {
    %c0_i32 = arith.constant 0 : i32
    %c0_i32_0 = arith.constant 0 : i32
    %c0_i32_1 = arith.constant 0 : i32
    return %c0_i32, %c0_i32_0 : i32, i32
  }
}

</mosaic_0001>

<bundles_post_ra>
// kernel: gradient_penalty_loss.2
= control target key start
LH: loop header
LB: loop body
LE: loop exit
PB: predicated region body
PF: predicated region fallthrough
CT: control target
= control target key end

     0   :  { %s424_s12 = smov 0   ;;  %s537_s0 = inlined_call_operand.vmem [shape: f32[6,1], index: 0, kind: input, shape index: {}]   ;;  %s538_s1 = inlined_call_operand.vmem [shape: f32[6,4096], index: 1, kind: input, shape index: {}]   ;;  %s539_s2 = inlined_call_operand.vmem [shape: f32[6,4096], index: 2, kind: input, shape index: {}]   ;;  %s540_s3 = inlined_call_operand.vmem [shape: f32[6,4096], index: 3, kind: output, shape index: {}]  }
   0x1 LB: > { %s372_s13 = sadd.s32 4294967295, %s401_s12   ;;  %p376_p0 = scmp.ge.s32.totalorder %s401_s12, 1  ;;  %s401_s12 = sphi %s424_s12, %s13_s12  }
   0x2   : > { %p149_p1 = scmp.lt.s32.totalorder %s401_s12, 3 }
   0x4   : > { %p150_p2 = pnand %p376_p0, %p149_p1 }
   0x5   : > { %s377_s16 = sshll.u32 (!%p150_p2), %s372_s13, 4 }
   0x6   : > { %153 = sbr.rel (%p150_p2) target bundleno = 156 (0x9c), region = 32  ;;  %p179_p3 = scmp.lt.s32.totalorder (!%p150_p2), %s377_s16, 31 }
   0xb   : > { %v196_v0 = vld [vmem:[%s537_s0] sm:$0x3f]  ;;  %v403_v1 = vmov 0   ;;  %s542_s16 = smov (!%p179_p3, %s377_s16), 31 }
   0xc   : > { %394 = vset.pattern.permute.xlu0 %v403_v1  ;;  %v234_v2 = vsub.f32 1.0, %v196_v0  ;;  %s378_s17 = sshll.u32 %s542_s16, 3 }
   0xd   : > { %215 = vperm.xlu0 %394, %v196_v0   ;;  %s440_s20 = scalar_lea.vmem %s539_s2, %s378_s17  ;;  %s445_s23 = scalar_lea.vmem %s538_s1, %s378_s17 }
   0xe   : > { %v235_v4 = vld [vmem:[%s440_s20] sm:$0x3f]  ;;  %v236_v5 = vld [vmem:[%s440_s20 + $0x8] sm:$0x3f]  ;;  %v237_v6 = vld [vmem:[%s440_s20 + $0x10] sm:$0x3f]  ;;  %s474_s26 = scalar_lea.vmem %s540_s3, %s378_s17 }
   0xf   : > { %v197_v7 = vld [vmem:[%s445_s23] sm:$0x3f]  ;;  %v238_v8 = vld [vmem:[%s440_s20 + $0x18] sm:$0x3f]  ;;  %v198_v10 = vld [vmem:[%s445_s23 + $0x8] sm:$0x3f] }
  0x10   : > { %v199_v11 = vld [vmem:[%s445_s23 + $0x10] sm:$0x3f]  ;;  %v239_v12 = vld [vmem:[%s440_s20 + $0x20] sm:$0x3f]  ;;  %v200_v13 = vld [vmem:[%s445_s23 + $0x18] sm:$0x3f] }
  0x11   : > { %v201_v14 = vld [vmem:[%s445_s23 + $0x20] sm:$0x3f]  ;;  %v240_v15 = vld [vmem:[%s440_s20 + $0x28] sm:$0x3f]  ;;  %v241_v19 = vld [vmem:[%s440_s20 + $0x30] sm:$0x3f] }
  0x12   : > { %v202_v21 = vld [vmem:[%s445_s23 + $0x28] sm:$0x3f]  ;;  %v242_v25 = vld [vmem:[%s440_s20 + $0x38] sm:$0x3f]  ;;  %v203_v27 = vld [vmem:[%s445_s23 + $0x30] sm:$0x3f] }
  0x13   : > { %v243_v30 = vld [vmem:[%s440_s20 + $0x40] sm:$0x3f]  ;;  %v204_v32 = vld [vmem:[%s445_s23 + $0x38] sm:$0x3f]  ;;  %v244_v33 = vld [vmem:[%s440_s20 + $0x48] sm:$0x3f] }
  0x14   : > { %v205_v38 = vld [vmem:[%s445_s23 + $0x40] sm:$0x3f]  ;;  %v245_v40 = vld [vmem:[%s440_s20 + $0x50] sm:$0x3f]  ;;  %v206_v43 = vld [vmem:[%s445_s23 + $0x48] sm:$0x3f] }
  0x15   : > { %253 = vperm.xlu0 %394, %v234_v2   ;;  %v246_v45 = vld [vmem:[%s440_s20 + $0x58] sm:$0x3f]  ;;  %v207_v48 = vld [vmem:[%s445_s23 + $0x50] sm:$0x3f]  ;;  %v247_v50 = vld [vmem:[%s440_s20 + $0x60] sm:$0x3f] }
  0x16   : > { %v208_v53 = vld [vmem:[%s445_s23 + $0x58] sm:$0x3f]  ;;  %v248_v55 = vld [vmem:[%s440_s20 + $0x68] sm:$0x3f]  ;;  %v209_v58 = vld [vmem:[%s445_s23 + $0x60] sm:$0x3f] }
  0x17   : > { %v249_v60 = vld [vmem:[%s440_s20 + $0x70] sm:$0x3f]  ;;  %v210_v63 = vld [vmem:[%s445_s23 + $0x68] sm:$0x3f]  ;;  %v250_v1 = vld [vmem:[%s440_s20 + $0x78] sm:$0x3f] }
  0x7f   : > { %v435_v3 = vpop.permute.xlu0 %215 }
  0x80   : > { %v218_v22 = vmul.f32 %v435_v3, %v197_v7  ;;  %v219_v23 = vmul.f32 %v435_v3, %v198_v10  ;;  %v220_v24 = vmul.f32 %v435_v3, %v199_v11  ;;  %v221_v28 = vmul.f32 %v435_v3, %v200_v13  ;;  %v212_v10 = vld [vmem:[%s445_s23 + $0x78] sm:$0x3f] }
  0x81   : > { %v222_v29 = vmul.f32 %v435_v3, %v201_v14  ;;  %v223_v39 = vmul.f32 %v435_v3, %v202_v21  ;;  %v224_v44 = vmul.f32 %v435_v3, %v203_v27  ;;  %v225_v49 = vmul.f32 %v435_v3, %v204_v32 }
  0x82   : > { %v226_v54 = vmul.f32 %v435_v3, %v205_v38  ;;  %v227_v59 = vmul.f32 %v435_v3, %v206_v43  ;;  %v228_v0 = vmul.f32 %v435_v3, %v207_v48  ;;  %v230_v11 = vmul.f32 %v435_v3, %v209_v58 }
  0x83   : > { %v231_v14 = vmul.f32 %v435_v3, %v210_v63 }
  0x87   : > { %v452_v9 = vpop.permute.xlu0 %253 }
  0x88   : > { %v256_v16 = vmul.f32 %v452_v9, %v235_v4  ;;  %v257_v17 = vmul.f32 %v452_v9, %v236_v5  ;;  %v258_v18 = vmul.f32 %v452_v9, %v237_v6  ;;  %v259_v20 = vmul.f32 %v452_v9, %v238_v8  ;;  %v211_v5 = vld [vmem:[%s445_s23 + $0x70] sm:$0x3f] }
  0x89   : > { %v260_v26 = vmul.f32 %v452_v9, %v239_v12  ;;  %v261_v31 = vmul.f32 %v452_v9, %v240_v15  ;;  %v262_v34 = vmul.f32 %v452_v9, %v241_v19  ;;  %v263_v41 = vmul.f32 %v452_v9, %v242_v25 }
  0x8a   : > { %v272_v35 = vadd.f32 %v256_v16, %v218_v22  ;;  %v273_v36 = vadd.f32 %v257_v17, %v219_v23  ;;  %v274_v37 = vadd.f32 %v258_v18, %v220_v24  ;;  %v275_v42 = vadd.f32 %v259_v20, %v221_v28 }
  0x8b   : > { %v264_v46 = vmul.f32 %v452_v9, %v243_v30  ;;  %v276_v47 = vadd.f32 %v260_v26, %v222_v29  ;;  %v265_v51 = vmul.f32 %v452_v9, %v244_v33  ;;  %v277_v52 = vadd.f32 %v261_v31, %v223_v39 }
  0x8c   : > { %288 = vst [vmem:[%s474_s26] sm:$0x3f] %v272_v35  ;;  %v266_v56 = vmul.f32 %v452_v9, %v245_v40  ;;  %v278_v57 = vadd.f32 %v262_v34, %v224_v44  ;;  %v267_v61 = vmul.f32 %v452_v9, %v246_v45  ;;  %v279_v62 = vadd.f32 %v263_v41, %v225_v49 }
  0x8d   : > { %289 = vst [vmem:[%s474_s26 + $0x8] sm:$0x3f] %v273_v36  ;;  %v268_v2 = vmul.f32 %v452_v9, %v247_v50  ;;  %v280_v4 = vadd.f32 %v264_v46, %v226_v54  ;;  %v229_v6 = vmul.f32 %v435_v3, %v208_v53  ;;  %v269_v7 = vmul.f32 %v452_v9, %v248_v55 }
  0x8e   : > { %290 = vst [vmem:[%s474_s26 + $0x10] sm:$0x3f] %v274_v37  ;;  %v281_v8 = vadd.f32 %v265_v51, %v227_v59  ;;  %v270_v12 = vmul.f32 %v452_v9, %v249_v60  ;;  %v282_v13 = vadd.f32 %v266_v56, %v228_v0  ;;  %v271_v15 = vmul.f32 %v452_v9, %v250_v1 }
  0x8f   : > { %291 = vst [vmem:[%s474_s26 + $0x18] sm:$0x3f] %v275_v42  ;;  %v283_v16 = vadd.f32 %v267_v61, %v229_v6  ;;  %v232_v17 = vmul.f32 %v435_v3, %v211_v5  ;;  %v284_v18 = vadd.f32 %v268_v2, %v230_v11  ;;  %v233_v19 = vmul.f32 %v435_v3, %v212_v10 }
  0x90   : > { %292 = vst [vmem:[%s474_s26 + $0x20] sm:$0x3f] %v276_v47  ;;  %v285_v20 = vadd.f32 %v269_v7, %v231_v14 }
  0x91   : > { %293 = vst [vmem:[%s474_s26 + $0x28] sm:$0x3f] %v277_v52  ;;  %v286_v21 = vadd.f32 %v270_v12, %v232_v17  ;;  %v287_v22 = vadd.f32 %v271_v15, %v233_v19 }
  0x92   : > { %294 = vst [vmem:[%s474_s26 + $0x30] sm:$0x3f] %v278_v57 }
  0x93   : > { %295 = vst [vmem:[%s474_s26 + $0x38] sm:$0x3f] %v279_v62 }
  0x94   : > { %296 = vst [vmem:[%s474_s26 + $0x40] sm:$0x3f] %v280_v4 }
  0x95   : > { %297 = vst [vmem:[%s474_s26 + $0x48] sm:$0x3f] %v281_v8 }
  0x96   : > { %298 = vst [vmem:[%s474_s26 + $0x50] sm:$0x3f] %v282_v13 }
  0x97   : > { %299 = vst [vmem:[%s474_s26 + $0x58] sm:$0x3f] %v283_v16 }
  0x98   : > { %300 = vst [vmem:[%s474_s26 + $0x60] sm:$0x3f] %v284_v18 }
  0x99   : > { %301 = vst [vmem:[%s474_s26 + $0x68] sm:$0x3f] %v285_v20 }
  0x9a   : > { %302 = vst [vmem:[%s474_s26 + $0x70] sm:$0x3f] %v286_v21 }
  0x9b   : > { %303 = vst [vmem:[%s474_s26 + $0x78] sm:$0x3f] %v287_v22 }
  0x9c PF: > { %s13_s12 = sadd.s32 1, %s401_s12  }
  0x9d   : > { %p10_p4 = scmp.ge.s32.totalorder %s13_s12, 4  }
  0x9f   :  { %12 = sbr.rel (!%p10_p4) target bundleno = 1 (0x1), region = 65 }

// kernel: jvp__.4
= control target key start
LH: loop header
LB: loop body
LE: loop exit
PB: predicated region body
PF: predicated region fallthrough
CT: control target
= control target key end

     0   :  { %v848_v3 = vmov 0   ;;  %vm310_vm0 = vcmask 392192   ;;  %s1263_s0 = inlined_call_operand.vmem [shape: bf16[48,2048], index: 0, kind: input, shape index: {}]   ;;  %s1264_s1 = inlined_call_operand.vmem [shape: bf16[8,48], index: 1, kind: input, shape index: {}]   ;;  %s1265_s2 = inlined_call_operand.vmem [shape: f32[8,1], index: 2, kind: input, shape index: {}]   ;;  %s1266_s3 = inlined_call_operand.vmem [shape: f32[8,2048], index: 3, kind: output, shape index: {}]  }
   0x1   :  { %v720_v0 = vld [vmem:[%s1263_s0 + $0x100] sm:$0xf]  ;;  %v830_v2 = vld [vmem:[%s1263_s0 + $0x104] sm:$0xf]  ;;  %847 = vset.pattern.permute.xlu0 %v848_v3  ;;  %v728_v6 = vld [vmem:[%s1263_s0 + $0x108] sm:$0xf] }
   0x2   :  { %v838_v1 = vld [vmem:[%s1263_s0 + $0x13c] sm:$0xf0]  ;;  %v722_v5 = vld [vmem:[%s1263_s0 + $0x140] sm:$0xf0]  ;;  %v839_v7 = vld [vmem:[%s1263_s0 + $0x144] sm:$0xf0] }
   0x3   :  { %v721_v4 = vor.u32 %v838_v1, %v720_v0  ;;  %v725_v8 = vor.u32 %v830_v2, %v722_v5  ;;  %v729_v9 = vor.u32 %v839_v7, %v728_v6  ;;  %v831_v10 = vld [vmem:[%s1263_s0 + $0x10c] sm:$0xf]  ;;  %v656_v12 = vld [vmem:[%s1263_s0 + $0x80] sm:$0xf]  ;;  %v814_v15 = vld [vmem:[%s1263_s0 + $0x84] sm:$0xf] }
   0x4   :  { %v730_v11 = vld [vmem:[%s1263_s0 + $0x148] sm:$0xf0]  ;;  %v822_v14 = vld [vmem:[%s1263_s0 + $0xbc] sm:$0xf0]  ;;  %v658_v16 = vld [vmem:[%s1263_s0 + $0xc0] sm:$0xf0] }
   0x5   :  { %319 = vmatpush.bf16.msra.mxu0 %v721_v4  ;;  %v733_v13 = vor.u32 %v831_v10, %v730_v11  ;;  %332 = vmatpush.bf16.msra.mxu1 %v725_v8  ;;  %v657_v17 = vor.u32 %v822_v14, %v656_v12  ;;  %v661_v18 = vor.u32 %v814_v15, %v658_v16  ;;  %v664_v19 = vld [vmem:[%s1263_s0 + $0x88] sm:$0xf]  ;;  %v815_v21 = vld [vmem:[%s1263_s0 + $0x8c] sm:$0xf]  ;;  %v592_v24 = vld [vmem:[%s1263_s0] sm:$0xf] }
   0x6   :  { %345 = vmatpush.bf16.msra.mxu2 %v729_v9  ;;  %v823_v20 = vld [vmem:[%s1263_s0 + $0xc4] sm:$0xf0]  ;;  %v666_v23 = vld [vmem:[%s1263_s0 + $0xc8] sm:$0xf0]  ;;  %v806_v25 = vld [vmem:[%s1263_s0 + $0x3c] sm:$0xf0] }
   0x7   :  { %358 = vmatpush.bf16.msra.mxu3 %v733_v13  ;;  %v665_v22 = vor.u32 %v823_v20, %v664_v19  ;;  %v669_v26 = vor.u32 %v815_v21, %v666_v23  ;;  %v798_v27 = vld [vmem:[%s1263_s0 + $0x4] sm:$0xf]  ;;  %v600_v29 = vld [vmem:[%s1263_s0 + $0x8] sm:$0xf]  ;;  %v593_v30 = vor.u32 %v806_v25, %v592_v24  ;;  %v799_v32 = vld [vmem:[%s1263_s0 + $0xc] sm:$0xf] }
   0x8   :  { %v594_v28 = vld [vmem:[%s1263_s0 + $0x40] sm:$0xf0]  ;;  %v807_v31 = vld [vmem:[%s1263_s0 + $0x44] sm:$0xf0]  ;;  %v602_v33 = vld [vmem:[%s1263_s0 + $0x48] sm:$0xf0] }
   0x9   :  { %320 = vmatpush.bf16.msra.mxu0 %v657_v17  ;;  %333 = vmatpush.bf16.msra.mxu1 %v661_v18  ;;  %v597_v34 = vor.u32 %v798_v27, %v594_v28  ;;  %v601_v35 = vor.u32 %v807_v31, %v600_v29  ;;  %v744_v36 = vld [vmem:[%s1263_s0 + $0x118] sm:$0xf]  ;;  %v605_v38 = vor.u32 %v799_v32, %v602_v33  ;;  %v950_v39 = vld [vmem:[%s1264_s1] sm:$0xf]  ;;  %v833_v41 = vld [vmem:[%s1263_s0 + $0x11c] sm:$0xf] }
   0xa   :  { %346 = vmatpush.bf16.msra.mxu2 %v665_v22  ;;  %v841_v37 = vld [vmem:[%s1263_s0 + $0x154] sm:$0xf0]  ;;  %v746_v42 = vld [vmem:[%s1263_s0 + $0x158] sm:$0xf0]  ;;  %v736_v43 = vld [vmem:[%s1263_s0 + $0x110] sm:$0xf] }
   0xb   :  { %359 = vmatpush.bf16.msra.mxu3 %v669_v26  ;;  %v745_v40 = vor.u32 %v841_v37, %v744_v36  ;;  %v749_v44 = vor.u32 %v833_v41, %v746_v42  ;;  %v840_v45 = vld [vmem:[%s1263_s0 + $0x14c] sm:$0xf0]  ;;  %v832_v46 = vld [vmem:[%s1263_s0 + $0x114] sm:$0xf]  ;;  %v680_v48 = vld [vmem:[%s1263_s0 + $0x98] sm:$0xf] }
   0xc   :  { %v738_v47 = vld [vmem:[%s1263_s0 + $0x150] sm:$0xf0]  ;;  %v825_v49 = vld [vmem:[%s1263_s0 + $0xd4] sm:$0xf0]  ;;  %v817_v50 = vld [vmem:[%s1263_s0 + $0x9c] sm:$0xf]  ;;  %v737_v51 = vor.u32 %v840_v45, %v736_v43 }
   0xd   :  { %321 = vmatpush.bf16.msra.mxu0 %v593_v30  ;;  %334 = vmatpush.bf16.msra.mxu1 %v597_v34  ;;  %v682_v52 = vld [vmem:[%s1263_s0 + $0xd8] sm:$0xf0]  ;;  %v672_v53 = vld [vmem:[%s1263_s0 + $0x90] sm:$0xf]  ;;  %v741_v54 = vor.u32 %v832_v46, %v738_v47  ;;  %v681_v55 = vor.u32 %v825_v49, %v680_v48  ;;  %v816_v57 = vld [vmem:[%s1263_s0 + $0x94] sm:$0xf] }
   0xe   :  { %347 = vmatpush.bf16.msra.mxu2 %v601_v35  ;;  %v824_v56 = vld [vmem:[%s1263_s0 + $0xcc] sm:$0xf0]  ;;  %v674_v58 = vld [vmem:[%s1263_s0 + $0xd0] sm:$0xf0]  ;;  %v685_v59 = vor.u32 %v817_v50, %v682_v52  ;;  %v616_v60 = vld [vmem:[%s1263_s0 + $0x18] sm:$0xf] }
   0xf   :  { %360 = vmatpush.bf16.msra.mxu3 %v605_v38  ;;  %v809_v61 = vld [vmem:[%s1263_s0 + $0x54] sm:$0xf0]  ;;  %v801_v62 = vld [vmem:[%s1263_s0 + $0x1c] sm:$0xf]  ;;  %v608_v0 = vld [vmem:[%s1263_s0 + $0x10] sm:$0xf]  ;;  %v673_v2 = vor.u32 %v824_v56, %v672_v53  ;;  %v677_v7 = vor.u32 %v816_v57, %v674_v58 }
  0x10   :  { %782 = vmatmul.msk.bf16.vlgmr.msra.gmra.mxu0 %vm310_vm0, %v950_v39  ;;  %783 = vmatmul.msk.bf16.vlgmr.msra.gmra.mxu1 %vm310_vm0, %v950_v39  ;;  %v618_v63 = vld [vmem:[%s1263_s0 + $0x58] sm:$0xf0]  ;;  %v808_v1 = vld [vmem:[%s1263_s0 + $0x4c] sm:$0xf0]  ;;  %v800_v3 = vld [vmem:[%s1263_s0 + $0x14] sm:$0xf]  ;;  %v617_v8 = vor.u32 %v809_v61, %v616_v60 }
  0x11   :  { %784 = vmatmul.msk.bf16.vlgmr.msra.gmra.mxu2 %vm310_vm0, %v950_v39  ;;  %371 = vmatpush.bf16.msrb.mxu0 %v737_v51  ;;  %v610_v4 = vld [vmem:[%s1263_s0 + $0x50] sm:$0xf0]  ;;  %v64_v5 = vld [vmem:[%s1265_s2] sm:$0xff]  ;;  %v760_v6 = vld [vmem:[%s1263_s0 + $0x128] sm:$0xf]  ;;  %v621_v12 = vor.u32 %v801_v62, %v618_v63  ;;  %v609_v21 = vor.u32 %v808_v1, %v608_v0 }
  0x12   :  { %397 = vmatpush.bf16.msrb.mxu2 %v745_v40  ;;  %785 = vmatmul.msk.bf16.vlgmr.msra.gmra.mxu3 %vm310_vm0, %v950_v39  ;;  %v843_v9 = vld [vmem:[%s1263_s0 + $0x164] sm:$0xf0]  ;;  %v835_v10 = vld [vmem:[%s1263_s0 + $0x12c] sm:$0xf]  ;;  %v752_v14 = vld [vmem:[%s1263_s0 + $0x120] sm:$0xf]  ;;  %v613_v24 = vor.u32 %v800_v3, %v610_v4 }
  0x13   :  { %410 = vmatpush.bf16.msrb.mxu3 %v749_v44  ;;  %384 = vmatpush.bf16.msrb.mxu1 %v741_v54  ;;  %v762_v11 = vld [vmem:[%s1263_s0 + $0x168] sm:$0xf0]  ;;  %v761_v13 = vor.u32 %v843_v9, %v760_v6  ;;  %v842_v15 = vld [vmem:[%s1263_s0 + $0x15c] sm:$0xf0]  ;;  %v834_v16 = vld [vmem:[%s1263_s0 + $0x124] sm:$0xf] }
  0x14   :  { %67 = vperm.xlu0 %847, %v64_v5   ;;  %v765_v17 = vor.u32 %v835_v10, %v762_v11  ;;  %v754_v18 = vld [vmem:[%s1263_s0 + $0x160] sm:$0xf0]  ;;  %v696_v19 = vld [vmem:[%s1263_s0 + $0xa8] sm:$0xf]  ;;  %v819_v22 = vld [vmem:[%s1263_s0 + $0xac] sm:$0xf]  ;;  %v753_v25 = vor.u32 %v842_v15, %v752_v14 }
  0x15   :  { %v827_v20 = vld [vmem:[%s1263_s0 + $0xe4] sm:$0xf0]  ;;  %372 = vmatpush.bf16.msrb.mxu0 %v673_v2  ;;  %v698_v23 = vld [vmem:[%s1263_s0 + $0xe8] sm:$0xf0]  ;;  %v757_v26 = vor.u32 %v834_v16, %v754_v18  ;;  %v688_v28 = vld [vmem:[%s1263_s0 + $0xa0] sm:$0xf] }
  0x16   :  { %398 = vmatpush.bf16.msrb.mxu2 %v681_v55  ;;  %v697_v27 = vor.u32 %v827_v20, %v696_v19  ;;  %v826_v29 = vld [vmem:[%s1263_s0 + $0xdc] sm:$0xf0]  ;;  %v701_v30 = vor.u32 %v819_v22, %v698_v23  ;;  %v818_v31 = vld [vmem:[%s1263_s0 + $0xa4] sm:$0xf]  ;;  %v632_v33 = vld [vmem:[%s1263_s0 + $0x28] sm:$0xf] }
  0x17   :  { %411 = vmatpush.bf16.msrb.mxu3 %v685_v59  ;;  %385 = vmatpush.bf16.msrb.mxu1 %v677_v7  ;;  %v690_v32 = vld [vmem:[%s1263_s0 + $0xe0] sm:$0xf0]  ;;  %v811_v34 = vld [vmem:[%s1263_s0 + $0x64] sm:$0xf0]  ;;  %v689_v35 = vor.u32 %v826_v29, %v688_v28  ;;  %v803_v36 = vld [vmem:[%s1263_s0 + $0x2c] sm:$0xf] }
  0x18   :  { %v634_v37 = vld [vmem:[%s1263_s0 + $0x68] sm:$0xf0]  ;;  %v624_v38 = vld [vmem:[%s1263_s0 + $0x20] sm:$0xf]  ;;  %v693_v40 = vor.u32 %v818_v31, %v690_v32  ;;  %v802_v42 = vld [vmem:[%s1263_s0 + $0x24] sm:$0xf]  ;;  %v633_v47 = vor.u32 %v811_v34, %v632_v33 }
  0x19   :  { %373 = vmatpush.bf16.msrb.mxu0 %v609_v21  ;;  %v810_v41 = vld [vmem:[%s1263_s0 + $0x5c] sm:$0xf0]  ;;  %v626_v43 = vld [vmem:[%s1263_s0 + $0x60] sm:$0xf0]  ;;  %v776_v44 = vld [vmem:[%s1263_s0 + $0x138] sm:$0xf]  ;;  %v637_v51 = vor.u32 %v803_v36, %v634_v37 }
  0x1a   :  { %399 = vmatpush.bf16.msrb.mxu2 %v617_v8  ;;  %v845_v45 = vld [vmem:[%s1263_s0 + $0x174] sm:$0xf0]  ;;  %v837_v46 = vld [vmem:[%s1263_s0 + $0x13c] sm:$0xf]  ;;  %v768_v49 = vld [vmem:[%s1263_s0 + $0x130] sm:$0xf]  ;;  %v625_v52 = vor.u32 %v810_v41, %v624_v38  ;;  %v629_v55 = vor.u32 %v802_v42, %v626_v43 }
  0x1b   :  { %412 = vmatpush.bf16.msrb.mxu3 %v621_v12  ;;  %386 = vmatpush.bf16.msrb.mxu1 %v613_v24  ;;  %v778_v48 = vld [vmem:[%s1263_s0 + $0x178] sm:$0xf0]  ;;  %v844_v50 = vld [vmem:[%s1263_s0 + $0x16c] sm:$0xf0]  ;;  %v836_v53 = vld [vmem:[%s1263_s0 + $0x134] sm:$0xf]  ;;  %v777_v56 = vor.u32 %v845_v45, %v776_v44 }
  0x1c   :  { %v770_v54 = vld [vmem:[%s1263_s0 + $0x170] sm:$0xf0]  ;;  %v781_v57 = vor.u32 %v837_v46, %v778_v48  ;;  %v769_v58 = vor.u32 %v844_v50, %v768_v49  ;;  %v712_v59 = vld [vmem:[%s1263_s0 + $0xb8] sm:$0xf]  ;;  %v821_v61 = vld [vmem:[%s1263_s0 + $0xbc] sm:$0xf] }
  0x1d   :  { %423 = vmatpush.bf16.msra.mxu0 %v753_v25  ;;  %v829_v60 = vld [vmem:[%s1263_s0 + $0xf4] sm:$0xf0]  ;;  %v773_v62 = vor.u32 %v836_v53, %v770_v54  ;;  %v714_v63 = vld [vmem:[%s1263_s0 + $0xf8] sm:$0xf0]  ;;  %v704_v0 = vld [vmem:[%s1263_s0 + $0xb0] sm:$0xf] }
  0x1e   :  { %449 = vmatpush.bf16.msra.mxu2 %v761_v13  ;;  %v828_v1 = vld [vmem:[%s1263_s0 + $0xec] sm:$0xf0]  ;;  %v820_v2 = vld [vmem:[%s1263_s0 + $0xb4] sm:$0xf]  ;;  %v713_v4 = vor.u32 %v829_v60, %v712_v59  ;;  %v717_v5 = vor.u32 %v821_v61, %v714_v63  ;;  %v648_v7 = vld [vmem:[%s1263_s0 + $0x38] sm:$0xf] }
  0x1f   :  { %462 = vmatpush.bf16.msra.mxu3 %v765_v17  ;;  %436 = vmatpush.bf16.msra.mxu1 %v757_v26  ;;  %v706_v3 = vld [vmem:[%s1263_s0 + $0xf0] sm:$0xf0]  ;;  %v705_v6 = vor.u32 %v828_v1, %v704_v0  ;;  %v813_v8 = vld [vmem:[%s1263_s0 + $0x74] sm:$0xf0]  ;;  %v805_v9 = vld [vmem:[%s1263_s0 + $0x3c] sm:$0xf] }
  0x20   :  { %786 = vmatmul.msk.bf16.vlgmr.msrb.gmra.mxu0 %vm310_vm0, %v950_v39  ;;  %787 = vmatmul.msk.bf16.vlgmr.msrb.gmra.mxu1 %vm310_vm0, %v950_v39  ;;  %v709_v10 = vor.u32 %v820_v2, %v706_v3  ;;  %v650_v11 = vld [vmem:[%s1263_s0 + $0x78] sm:$0xf0]  ;;  %v640_v12 = vld [vmem:[%s1263_s0 + $0x30] sm:$0xf]  ;;  %v804_v14 = vld [vmem:[%s1263_s0 + $0x34] sm:$0xf]  ;;  %v649_v16 = vor.u32 %v813_v8, %v648_v7 }
  0x21   :  { %424 = vmatpush.bf16.msra.mxu0 %v689_v35  ;;  %788 = vmatmul.msk.bf16.vlgmr.msrb.gmra.mxu2 %vm310_vm0, %v950_v39  ;;  %v812_v13 = vld [vmem:[%s1263_s0 + $0x6c] sm:$0xf0]  ;;  %v642_v15 = vld [vmem:[%s1263_s0 + $0x70] sm:$0xf0]  ;;  %v653_v17 = vor.u32 %v805_v9, %v650_v11 }
  0x22   :  { %450 = vmatpush.bf16.msra.mxu2 %v697_v27  ;;  %789 = vmatmul.msk.bf16.vlgmr.msrb.gmra.mxu3 %vm310_vm0, %v950_v39  ;;  %v641_v18 = vor.u32 %v812_v13, %v640_v12  ;;  %v645_v19 = vor.u32 %v804_v14, %v642_v15 }
  0x23   :  { %463 = vmatpush.bf16.msra.mxu3 %v701_v30  ;;  %437 = vmatpush.bf16.msra.mxu1 %v693_v40 }
  0x25   :  { %425 = vmatpush.bf16.msra.mxu0 %v625_v52 }
  0x26   :  { %451 = vmatpush.bf16.msra.mxu2 %v633_v47 }
  0x27   :  { %464 = vmatpush.bf16.msra.mxu3 %v637_v51  ;;  %438 = vmatpush.bf16.msra.mxu1 %v629_v55 }
  0x29   :  { %475 = vmatpush.bf16.msrb.mxu0 %v769_v58 }
  0x2a   :  { %501 = vmatpush.bf16.msrb.mxu2 %v777_v56 }
  0x2b   :  { %514 = vmatpush.bf16.msrb.mxu3 %v781_v57  ;;  %488 = vmatpush.bf16.msrb.mxu1 %v773_v62 }
  0x2d   :  { %476 = vmatpush.bf16.msrb.mxu0 %v705_v6 }
  0x2e   :  { %502 = vmatpush.bf16.msrb.mxu2 %v713_v4 }
  0x2f   :  { %515 = vmatpush.bf16.msrb.mxu3 %v717_v5  ;;  %489 = vmatpush.bf16.msrb.mxu1 %v709_v10 }
  0x30   :  { %790 = vmatmul.msk.bf16.vlgmr.msra.gmra.mxu0 %vm310_vm0, %v950_v39  ;;  %791 = vmatmul.msk.bf16.vlgmr.msra.gmra.mxu1 %vm310_vm0, %v950_v39 }
  0x31   :  { %477 = vmatpush.bf16.msrb.mxu0 %v641_v18  ;;  %792 = vmatmul.msk.bf16.vlgmr.msra.gmra.mxu2 %vm310_vm0, %v950_v39 }
  0x32   :  { %503 = vmatpush.bf16.msrb.mxu2 %v649_v16  ;;  %793 = vmatmul.msk.bf16.vlgmr.msra.gmra.mxu3 %vm310_vm0, %v950_v39 }
  0x33   :  { %516 = vmatpush.bf16.msrb.mxu3 %v653_v17  ;;  %490 = vmatpush.bf16.msrb.mxu1 %v645_v19 }
  0x40   :  { %794 = vmatmul.msk.bf16.vlgmr.msrb.gmra.mxu0 %vm310_vm0, %v950_v39  ;;  %795 = vmatmul.msk.bf16.vlgmr.msrb.gmra.mxu1 %vm310_vm0, %v950_v39 }
  0x41   :  { %796 = vmatmul.msk.bf16.vlgmr.msrb.gmra.mxu2 %vm310_vm0, %v950_v39 }
  0x42   :  { %797 = vmatmul.msk.bf16.vlgmr.msrb.gmra.mxu3 %vm310_vm0, %v950_v39 }
  0x86   :  { %v1197_v20 = vpop.permute.xlu0 %67 }
  0x8d   :  { %v323_v21 = vpop.f32.mrf.mxu0  ;;  %v336_v22 = vpop.f32.mrf.mxu1 }
  0x8e   :  { %v324_v23 = vadd.f32 %v323_v21, %v1197_v20  ;;  %v337_v24 = vadd.f32 %v336_v22, %v1197_v20 }
  0x90   :  { %vm522_vm1 = vcmp.ge.f32.partialorder %v324_v23, 0.0  ;;  %v538_v25 = vmul.f32 0.2, %v324_v23  ;;  %vm523_vm2 = vcmp.ge.f32.partialorder %v337_v24, 0.0  ;;  %v539_v26 = vmul.f32 0.2, %v337_v24 }
  0x92   :  { %v554_v27 = vsel %vm522_vm1, %v324_v23, %v538_v25  ;;  %v555_v28 = vsel %vm523_vm2, %v337_v24, %v539_v26 }
  0x93   :  { %570 = vst [vmem:[%s1266_s3] sm:$0xff] %v554_v27 }
  0x94   :  { %571 = vst [vmem:[%s1266_s3 + $0x8] sm:$0xff] %v555_v28  ;;  %v349_v39 = vpop.f32.mrf.mxu2 }
  0x95   :  { %v350_v29 = vadd.f32 %v349_v39, %v1197_v20  ;;  %v362_v30 = vpop.f32.mrf.mxu3  ;;  %v325_v31 = vpop.f32.mrf.mxu0 }
  0x96   :  { %v363_v32 = vadd.f32 %v362_v30, %v1197_v20  ;;  %v338_v33 = vpop.f32.mrf.mxu1 }
  0x97   :  { %vm524_vm3 = vcmp.ge.f32.partialorder %v350_v29, 0.0  ;;  %v540_v34 = vmul.f32 0.2, %v350_v29 }
  0x98   :  { %vm525_vm4 = vcmp.ge.f32.partialorder %v363_v32, 0.0  ;;  %v541_v35 = vmul.f32 0.2, %v363_v32 }
  0x99   :  { %v556_v36 = vsel %vm524_vm3, %v350_v29, %v540_v34 }
  0x9a   :  { %572 = vst [vmem:[%s1266_s3 + $0x10] sm:$0xff] %v556_v36  ;;  %v557_v37 = vsel %vm525_vm4, %v363_v32, %v541_v35 }
  0x9b   :  { %573 = vst [vmem:[%s1266_s3 + $0x18] sm:$0xff] %v557_v37 }
  0x9c   :  { %v351_v38 = vpop.f32.mrf.mxu2 }
  0x9d   :  { %v364_v40 = vpop.f32.mrf.mxu3  ;;  %v375_v41 = vpop.f32.mrf.mxu0 }
  0x9e   :  { %v376_v42 = vadd.f32 %v375_v41, %v1197_v20  ;;  %v388_v43 = vpop.f32.mrf.mxu1 }
  0x9f   :  { %v389_v44 = vadd.f32 %v388_v43, %v1197_v20 }
  0xa0   :  { %vm526_vm5 = vcmp.ge.f32.partialorder %v376_v42, 0.0  ;;  %v542_v45 = vmul.f32 0.2, %v376_v42 }
  0xa1   :  { %vm527_vm6 = vcmp.ge.f32.partialorder %v389_v44, 0.0  ;;  %v543_v46 = vmul.f32 0.2, %v389_v44 }
  0xa2   :  { %v558_v47 = vsel %vm526_vm5, %v376_v42, %v542_v45 }
  0xa3   :  { %574 = vst [vmem:[%s1266_s3 + $0x20] sm:$0xff] %v558_v47  ;;  %v559_v48 = vsel %vm527_vm6, %v389_v44, %v543_v46 }
  0xa4   :  { %575 = vst [vmem:[%s1266_s3 + $0x28] sm:$0xff] %v559_v48  ;;  %v401_v49 = vpop.f32.mrf.mxu2 }
  0xa5   :  { %v402_v50 = vadd.f32 %v401_v49, %v1197_v20  ;;  %v414_v51 = vpop.f32.mrf.mxu3  ;;  %v377_v52 = vpop.f32.mrf.mxu0 }
  0xa6   :  { %v415_v53 = vadd.f32 %v414_v51, %v1197_v20  ;;  %v390_v54 = vpop.f32.mrf.mxu1 }
  0xa7   :  { %vm528_vm7 = vcmp.ge.f32.partialorder %v402_v50, 0.0  ;;  %v544_v55 = vmul.f32 0.2, %v402_v50 }
  0xa8   :  { %vm529_vm8 = vcmp.ge.f32.partialorder %v415_v53, 0.0  ;;  %v545_v56 = vmul.f32 0.2, %v415_v53 }
  0xa9   :  { %v560_v57 = vsel %vm528_vm7, %v402_v50, %v544_v55 }
  0xaa   :  { %576 = vst [vmem:[%s1266_s3 + $0x30] sm:$0xff] %v560_v57  ;;  %v561_v58 = vsel %vm529_vm8, %v415_v53, %v545_v56 }
  0xab   :  { %577 = vst [vmem:[%s1266_s3 + $0x38] sm:$0xff] %v561_v58 }
  0xac   :  { %v403_v59 = vpop.f32.mrf.mxu2 }
  0xad   :  { %v416_v60 = vpop.f32.mrf.mxu3  ;;  %v427_v61 = vpop.f32.mrf.mxu0 }
  0xae   :  { %v428_v62 = vadd.f32 %v427_v61, %v1197_v20  ;;  %v440_v63 = vpop.f32.mrf.mxu1 }
  0xaf   :  { %v441_v0 = vadd.f32 %v440_v63, %v1197_v20 }
  0xb0   :  { %vm530_vm9 = vcmp.ge.f32.partialorder %v428_v62, 0.0  ;;  %v546_v1 = vmul.f32 0.2, %v428_v62 }
  0xb1   :  { %vm531_vm10 = vcmp.ge.f32.partialorder %v441_v0, 0.0  ;;  %v547_v2 = vmul.f32 0.2, %v441_v0 }
  0xb2   :  { %v562_v3 = vsel %vm530_vm9, %v428_v62, %v546_v1 }
  0xb3   :  { %578 = vst [vmem:[%s1266_s3 + $0x40] sm:$0xff] %v562_v3  ;;  %v563_v4 = vsel %vm531_vm10, %v441_v0, %v547_v2 }
  0xb4   :  { %579 = vst [vmem:[%s1266_s3 + $0x48] sm:$0xff] %v563_v4  ;;  %v453_v5 = vpop.f32.mrf.mxu2 }
  0xb5   :  { %v454_v6 = vadd.f32 %v453_v5, %v1197_v20  ;;  %v466_v7 = vpop.f32.mrf.mxu3  ;;  %v429_v8 = vpop.f32.mrf.mxu0 }
  0xb6   :  { %v467_v9 = vadd.f32 %v466_v7, %v1197_v20  ;;  %v442_v10 = vpop.f32.mrf.mxu1 }
  0xb7   :  { %vm532_vm11 = vcmp.ge.f32.partialorder %v454_v6, 0.0  ;;  %v548_v11 = vmul.f32 0.2, %v454_v6 }
  0xb8   :  { %vm533_vm12 = vcmp.ge.f32.partialorder %v467_v9, 0.0  ;;  %v549_v12 = vmul.f32 0.2, %v467_v9 }
  0xb9   :  { %v564_v13 = vsel %vm532_vm11, %v454_v6, %v548_v11 }
  0xba   :  { %580 = vst [vmem:[%s1266_s3 + $0x50] sm:$0xff] %v564_v13  ;;  %v565_v14 = vsel %vm533_vm12, %v467_v9, %v549_v12 }
  0xbb   :  { %581 = vst [vmem:[%s1266_s3 + $0x58] sm:$0xff] %v565_v14 }
  0xbc   :  { %v455_v15 = vpop.f32.mrf.mxu2 }
  0xbd   :  { %v468_v16 = vpop.f32.mrf.mxu3  ;;  %v479_v17 = vpop.f32.mrf.mxu0 }
  0xbe   :  { %v480_v18 = vadd.f32 %v479_v17, %v1197_v20  ;;  %v492_v19 = vpop.f32.mrf.mxu1 }
  0xbf   :  { %v493_v21 = vadd.f32 %v492_v19, %v1197_v20 }
  0xc0   :  { %vm534_vm13 = vcmp.ge.f32.partialorder %v480_v18, 0.0  ;;  %v550_v22 = vmul.f32 0.2, %v480_v18 }
  0xc1   :  { %vm535_vm14 = vcmp.ge.f32.partialorder %v493_v21, 0.0  ;;  %v551_v23 = vmul.f32 0.2, %v493_v21 }
  0xc2   :  { %v566_v24 = vsel %vm534_vm13, %v480_v18, %v550_v22 }
  0xc3   :  { %582 = vst [vmem:[%s1266_s3 + $0x60] sm:$0xff] %v566_v24  ;;  %v567_v25 = vsel %vm535_vm14, %v493_v21, %v551_v23 }
  0xc4   :  { %583 = vst [vmem:[%s1266_s3 + $0x68] sm:$0xff] %v567_v25  ;;  %v505_v26 = vpop.f32.mrf.mxu2 }
  0xc5   :  { %v506_v27 = vadd.f32 %v505_v26, %v1197_v20  ;;  %v518_v28 = vpop.f32.mrf.mxu3  ;;  %v481_v39 = vpop.f32.mrf.mxu0 }
  0xc6   :  { %v519_v29 = vadd.f32 %v518_v28, %v1197_v20  ;;  %v494_v30 = vpop.f32.mrf.mxu1 }
  0xc7   :  { %vm536_vm15 = vcmp.ge.f32.partialorder %v506_v27, 0.0  ;;  %v552_v31 = vmul.f32 0.2, %v506_v27 }
  0xc8   :  { %vm537_vm0 = vcmp.ge.f32.partialorder %v519_v29, 0.0  ;;  %v553_v32 = vmul.f32 0.2, %v519_v29 }
  0xc9   :  { %v568_v33 = vsel %vm536_vm15, %v506_v27, %v552_v31 }
  0xca   :  { %584 = vst [vmem:[%s1266_s3 + $0x70] sm:$0xff] %v568_v33  ;;  %v569_v34 = vsel %vm537_vm0, %v519_v29, %v553_v32 }
  0xcb   :  { %585 = vst [vmem:[%s1266_s3 + $0x78] sm:$0xff] %v569_v34 }
  0xcc   :  { %v507_v35 = vpop.f32.mrf.mxu2 }
  0xcd   :  { %v520_v36 = vpop.f32.mrf.mxu3 }

// kernel: jvp__.5
= control target key start
LH: loop header
LB: loop body
LE: loop exit
PB: predicated region body
PF: predicated region fallthrough
CT: control target
= control target key end

     0   :  { %v639_v3 = vmov 0   ;;  %vm448_vm2 = vcmask 7168   ;;  %s971_s0 = inlined_call_operand.vmem [shape: bf16[128,512], index: 0, kind: input, shape index: {}]   ;;  %s972_s2 = inlined_call_operand.vmem [shape: f32[16,1], index: 2, kind: input, shape index: {}]   ;;  %s973_s1 = inlined_call_operand.vmem [shape: bf16[16,128], index: 1, kind: input, shape index: {}]   ;;  %s974_s3 = inlined_call_operand.vmem [shape: f32[16,1], index: 3, kind: input, shape index: {}]   ;;  %s975_s4 = inlined_call_operand.vmem [shape: f32[16,1], index: 4, kind: input, shape index: {}]   ;;  %s976_s7 = inlined_call_operand.vmem [shape: f32[16,1], index: 7, kind: output, shape index: {2}]   ;;  %s977_s6 = inlined_call_operand.vmem [shape: f32[16,512], index: 6, kind: output, shape index: {1}]   ;;  %s978_s5 = inlined_call_operand.vmem [shape: f32[16,512], index: 5, kind: output, shape index: {0}]  }
   0x1   :  { %v581_v0 = vld [vmem:[%s971_s0 + $0xe0] sm:$0xf]  ;;  %v626_v1 = vld [vmem:[%s971_s0 + $0xec] sm:$0xf0]  ;;  %v624_v2 = vld [vmem:[%s971_s0 + $0xe4] sm:$0xf]  ;;  %630 = vset.pattern.permute.xlu0 %v639_v3  ;;  %631 = vset.pattern.permute.xlu1 %v639_v3 }
   0x2   :  { %v582_v4 = vor.u32 %v626_v1, %v581_v0  ;;  %v583_v5 = vld [vmem:[%s971_s0 + $0xf0] sm:$0xf0]  ;;  %v589_v6 = vld [vmem:[%s971_s0 + $0xe8] sm:$0xf]  ;;  %v627_v7 = vld [vmem:[%s971_s0 + $0xf4] sm:$0xf0]  ;;  %632 = vset.pattern.permute.xlu2 %v639_v3 }
   0x3   :  { %v586_v8 = vor.u32 %v624_v2, %v583_v5  ;;  %v590_v9 = vor.u32 %v627_v7, %v589_v6  ;;  %v625_v10 = vld [vmem:[%s971_s0 + $0xec] sm:$0xf]  ;;  %v591_v11 = vld [vmem:[%s971_s0 + $0xf8] sm:$0xf0]  ;;  %v565_v12 = vld [vmem:[%s971_s0 + $0xc0] sm:$0xf] }
   0x4   :  { %239 = vmatpush.bf16.msra.mxu0 %v582_v4  ;;  %v594_v13 = vor.u32 %v625_v10, %v591_v11  ;;  %v622_v14 = vld [vmem:[%s971_s0 + $0xcc] sm:$0xf0]  ;;  %v620_v15 = vld [vmem:[%s971_s0 + $0xc4] sm:$0xf]  ;;  %v567_v16 = vld [vmem:[%s971_s0 + $0xd0] sm:$0xf0] }
   0x5   :  { %253 = vmatpush.bf16.msra.mxu1 %v586_v8  ;;  %267 = vmatpush.bf16.msra.mxu2 %v590_v9  ;;  %v566_v17 = vor.u32 %v622_v14, %v565_v12  ;;  %v570_v18 = vor.u32 %v620_v15, %v567_v16  ;;  %v573_v19 = vld [vmem:[%s971_s0 + $0xc8] sm:$0xf]  ;;  %v623_v20 = vld [vmem:[%s971_s0 + $0xd4] sm:$0xf0]  ;;  %v621_v21 = vld [vmem:[%s971_s0 + $0xcc] sm:$0xf] }
   0x6   :  { %281 = vmatpush.bf16.msra.mxu3 %v594_v13  ;;  %v574_v22 = vor.u32 %v623_v20, %v573_v19  ;;  %v575_v23 = vld [vmem:[%s971_s0 + $0xd8] sm:$0xf0]  ;;  %v549_v24 = vld [vmem:[%s971_s0 + $0xa0] sm:$0xf]  ;;  %v618_v25 = vld [vmem:[%s971_s0 + $0xac] sm:$0xf0] }
   0x7   :  { %v578_v26 = vor.u32 %v621_v21, %v575_v23  ;;  %v616_v27 = vld [vmem:[%s971_s0 + $0xa4] sm:$0xf]  ;;  %v551_v28 = vld [vmem:[%s971_s0 + $0xb0] sm:$0xf0]  ;;  %v557_v29 = vld [vmem:[%s971_s0 + $0xa8] sm:$0xf]  ;;  %v550_v30 = vor.u32 %v618_v25, %v549_v24 }
   0x8   :  { %240 = vmatpush.bf16.msra.mxu0 %v566_v17  ;;  %v619_v31 = vld [vmem:[%s971_s0 + $0xb4] sm:$0xf0]  ;;  %v617_v32 = vld [vmem:[%s971_s0 + $0xac] sm:$0xf]  ;;  %v559_v33 = vld [vmem:[%s971_s0 + $0xb8] sm:$0xf0]  ;;  %v554_v34 = vor.u32 %v616_v27, %v551_v28 }
   0x9   :  { %254 = vmatpush.bf16.msra.mxu1 %v570_v18  ;;  %268 = vmatpush.bf16.msra.mxu2 %v574_v22  ;;  %v558_v35 = vor.u32 %v619_v31, %v557_v29  ;;  %v533_v36 = vld [vmem:[%s971_s0 + $0x80] sm:$0xf]  ;;  %v614_v37 = vld [vmem:[%s971_s0 + $0x8c] sm:$0xf0]  ;;  %v612_v38 = vld [vmem:[%s971_s0 + $0x84] sm:$0xf]  ;;  %v562_v39 = vor.u32 %v617_v32, %v559_v33 }
   0xa   :  { %282 = vmatpush.bf16.msra.mxu3 %v578_v26  ;;  %v535_v40 = vld [vmem:[%s971_s0 + $0x90] sm:$0xf0]  ;;  %v541_v41 = vld [vmem:[%s971_s0 + $0x88] sm:$0xf]  ;;  %v615_v42 = vld [vmem:[%s971_s0 + $0x94] sm:$0xf0]  ;;  %v534_v45 = vor.u32 %v614_v37, %v533_v36 }
   0xb   :  { %v613_v43 = vld [vmem:[%s971_s0 + $0x8c] sm:$0xf]  ;;  %v543_v44 = vld [vmem:[%s971_s0 + $0x98] sm:$0xf0]  ;;  %v538_v46 = vor.u32 %v612_v38, %v535_v40  ;;  %v542_v47 = vor.u32 %v615_v42, %v541_v41  ;;  %v517_v48 = vld [vmem:[%s971_s0 + $0x60] sm:$0xf] }
   0xc   :  { %241 = vmatpush.bf16.msra.mxu0 %v550_v30  ;;  %v610_v49 = vld [vmem:[%s971_s0 + $0x6c] sm:$0xf0]  ;;  %v608_v50 = vld [vmem:[%s971_s0 + $0x64] sm:$0xf]  ;;  %v546_v51 = vor.u32 %v613_v43, %v543_v44  ;;  %v519_v52 = vld [vmem:[%s971_s0 + $0x70] sm:$0xf0] }
   0xd   :  { %255 = vmatpush.bf16.msra.mxu1 %v554_v34  ;;  %269 = vmatpush.bf16.msra.mxu2 %v558_v35  ;;  %v525_v53 = vld [vmem:[%s971_s0 + $0x68] sm:$0xf]  ;;  %v611_v54 = vld [vmem:[%s971_s0 + $0x74] sm:$0xf0]  ;;  %v609_v55 = vld [vmem:[%s971_s0 + $0x6c] sm:$0xf]  ;;  %v518_v57 = vor.u32 %v610_v49, %v517_v48  ;;  %v522_v59 = vor.u32 %v608_v50, %v519_v52 }
   0xe   :  { %283 = vmatpush.bf16.msra.mxu3 %v562_v39  ;;  %v527_v56 = vld [vmem:[%s971_s0 + $0x78] sm:$0xf0]  ;;  %v501_v58 = vld [vmem:[%s971_s0 + $0x40] sm:$0xf]  ;;  %v526_v60 = vor.u32 %v611_v54, %v525_v53  ;;  %v606_v61 = vld [vmem:[%s971_s0 + $0x4c] sm:$0xf0] }
   0xf   :  { %v604_v62 = vld [vmem:[%s971_s0 + $0x44] sm:$0xf]  ;;  %v530_v0 = vor.u32 %v609_v55, %v527_v56  ;;  %v503_v1 = vld [vmem:[%s971_s0 + $0x50] sm:$0xf0]  ;;  %v509_v2 = vld [vmem:[%s971_s0 + $0x48] sm:$0xf]  ;;  %v502_v6 = vor.u32 %v606_v61, %v501_v58 }
  0x10   :  { %242 = vmatpush.bf16.msra.mxu0 %v534_v45  ;;  %v61_v63 = vld [vmem:[%s972_s2] sm:$0xff]  ;;  %v607_v3 = vld [vmem:[%s971_s0 + $0x54] sm:$0xf0]  ;;  %v605_v4 = vld [vmem:[%s971_s0 + $0x4c] sm:$0xf]  ;;  %v506_v7 = vor.u32 %v604_v62, %v503_v1  ;;  %v640_v62 = vmov 512.0  }
  0x11   :  { %256 = vmatpush.bf16.msra.mxu1 %v538_v46  ;;  %270 = vmatpush.bf16.msra.mxu2 %v542_v47  ;;  %v511_v5 = vld [vmem:[%s971_s0 + $0x58] sm:$0xf0]  ;;  %v510_v8 = vor.u32 %v607_v3, %v509_v2  ;;  %v485_v9 = vld [vmem:[%s971_s0 + $0x20] sm:$0xf]  ;;  %v602_v10 = vld [vmem:[%s971_s0 + $0x2c] sm:$0xf0]  ;;  %633 = vrcp.f32 %v640_v62 }
  0x12   :  { %284 = vmatpush.bf16.msra.mxu3 %v546_v51  ;;  %65 = vperm.xlu0 %630, %v61_v63   ;;  %v600_v11 = vld [vmem:[%s971_s0 + $0x24] sm:$0xf]  ;;  %v514_v12 = vor.u32 %v605_v4, %v511_v5  ;;  %v487_v13 = vld [vmem:[%s971_s0 + $0x30] sm:$0xf0]  ;;  %v493_v14 = vld [vmem:[%s971_s0 + $0x28] sm:$0xf]  ;;  %v486_v19 = vor.u32 %v602_v10, %v485_v9 }
  0x13   :  { %v603_v15 = vld [vmem:[%s971_s0 + $0x34] sm:$0xf0]  ;;  %v601_v16 = vld [vmem:[%s971_s0 + $0x2c] sm:$0xf]  ;;  %v495_v17 = vld [vmem:[%s971_s0 + $0x38] sm:$0xf0]  ;;  %v490_v20 = vor.u32 %v600_v11, %v487_v13 }
  0x14   :  { %243 = vmatpush.bf16.msra.mxu0 %v518_v57  ;;  %v62_v18 = vld [vmem:[%s972_s2 + $0x8] sm:$0xff]  ;;  %v494_v21 = vor.u32 %v603_v15, %v493_v14  ;;  %v469_v22 = vld [vmem:[%s971_s0] sm:$0xf]  ;;  %v598_v23 = vld [vmem:[%s971_s0 + $0xc] sm:$0xf0]  ;;  %v498_v25 = vor.u32 %v601_v16, %v495_v17 }
  0x15   :  { %257 = vmatpush.bf16.msra.mxu1 %v522_v59  ;;  %271 = vmatpush.bf16.msra.mxu2 %v526_v60  ;;  %v596_v24 = vld [vmem:[%s971_s0 + $0x4] sm:$0xf]  ;;  %v471_v26 = vld [vmem:[%s971_s0 + $0x10] sm:$0xf0]  ;;  %v477_v27 = vld [vmem:[%s971_s0 + $0x8] sm:$0xf]  ;;  %v470_v31 = vor.u32 %v598_v23, %v469_v22 }
  0x16   :  { %285 = vmatpush.bf16.msra.mxu3 %v530_v0  ;;  %v599_v28 = vld [vmem:[%s971_s0 + $0x14] sm:$0xf0]  ;;  %v597_v29 = vld [vmem:[%s971_s0 + $0xc] sm:$0xf]  ;;  %v479_v30 = vld [vmem:[%s971_s0 + $0x18] sm:$0xf0]  ;;  %v474_v32 = vor.u32 %v596_v24, %v471_v26 }
  0x17   :  { %v478_v33 = vor.u32 %v599_v28, %v477_v27  ;;  %v482_v34 = vor.u32 %v597_v29, %v479_v30  ;;  %v595_v35 = vld [vmem:[%s973_s1] sm:$0xff]  ;;  %v26_v37 = vld [vmem:[%s975_s4 + $0x8] sm:$0xff]  ;;  %v634_v63 = vpop.eup %633 }
  0x18   :  { %244 = vmatpush.bf16.msra.mxu0 %v502_v6  ;;  %v23_v36 = vld [vmem:[%s974_s3] sm:$0xff]  ;;  %v306_v0 = vmul.f32 512.0, %v634_v63  ;;  %v24_v2 = vld [vmem:[%s974_s3 + $0x8] sm:$0xff]  ;;  %vm310_vm0 = vweird.f32 %v634_v63 }
  0x19   :  { %258 = vmatpush.bf16.msra.mxu1 %v506_v7  ;;  %272 = vmatpush.bf16.msra.mxu2 %v510_v8 }
  0x1a   :  { %286 = vmatpush.bf16.msra.mxu3 %v514_v12  ;;  %70 = vperm.xlu0 %630, %v62_v18   ;;  %v307_v1 = vsub.f32 1.0, %v306_v0 }
  0x1c   :  { %245 = vmatpush.bf16.msra.mxu0 %v486_v19  ;;  %v308_v3 = vmul.f32 %v634_v63, %v307_v1 }
  0x1d   :  { %259 = vmatpush.bf16.msra.mxu1 %v490_v20  ;;  %273 = vmatpush.bf16.msra.mxu2 %v494_v21 }
  0x1e   :  { %287 = vmatpush.bf16.msra.mxu3 %v498_v25  ;;  %v309_v4 = vadd.f32 %v634_v63, %v308_v3 }
  0x20   :  { %246 = vmatpush.bf16.msra.mxu0 %v470_v31  ;;  %v311_v5 = vsel %vm310_vm0, %v634_v63, %v309_v4 }
  0x21   :  { %260 = vmatpush.bf16.msra.mxu1 %v474_v32  ;;  %274 = vmatpush.bf16.msra.mxu2 %v478_v33  ;;  %v25_v32 = vld [vmem:[%s975_s4] sm:$0xff] }
  0x22   :  { %288 = vmatpush.bf16.msra.mxu3 %v482_v34  ;;  %374 = vperm.xlu0 %630, %v23_v36  }
  0x23   :  { %247 = vmatmul.bf16.vlgmr.msra.gmra.mxu0 %v595_v35 }
  0x24   :  { %261 = vmatmul.bf16.vlgmr.msra.gmra.mxu1 %v595_v35  ;;  %275 = vmatmul.bf16.vlgmr.msra.gmra.mxu2 %v595_v35 }
  0x25   :  { %289 = vmatmul.bf16.vlgmr.msra.gmra.mxu3 %v595_v35 }
  0x2a   :  { %397 = vperm.xlu0 %630, %v26_v37  }
  0x84   :  { %v66_v39 = vpop.permute.xlu0 %65 }
  0x8c   :  { %v71_v51 = vpop.permute.xlu0 %70 }
  0xa0   :  { %v248_v38 = vpop.f32.mrf.mxu0 }
  0xa1   :  { %v262_v40 = vpop.f32.mrf.mxu1  ;;  %v249_v41 = vadd.f32 %v248_v38, %v66_v39 }
  0xa2   :  { %v263_v42 = vadd.f32 %v262_v40, %v66_v39 }
  0xa4   :  { %v295_v43 = vadd.f32 %v263_v42, %v249_v41 }
  0xa7   :  { %v276_v44 = vpop.f32.mrf.mxu2 }
  0xa8   :  { %v277_v45 = vadd.f32 %v276_v44, %v66_v39  ;;  %v290_v46 = vpop.f32.mrf.mxu3  ;;  %v250_v47 = vpop.f32.mrf.mxu0 }
  0xa9   :  { %v264_v48 = vpop.f32.mrf.mxu1  ;;  %v291_v49 = vadd.f32 %v290_v46, %v66_v39  ;;  %v251_v52 = vadd.f32 %v250_v47, %v71_v51 }
  0xaa   :  { %v296_v50 = vadd.f32 %v295_v43, %v277_v45  ;;  %v265_v53 = vadd.f32 %v264_v48, %v71_v51 }
  0xac   :  { %v297_v54 = vadd.f32 %v296_v50, %v291_v49  ;;  %v300_v56 = vadd.f32 %v265_v53, %v251_v52 }
  0xae   :  { %298 = vadd.xlane.f32.xlu1 %v297_v54 }
  0xaf   :  { %v278_v55 = vpop.f32.mrf.mxu2 }
  0xb0   :  { %v279_v57 = vadd.f32 %v278_v55, %v71_v51  ;;  %v292_v58 = vpop.f32.mrf.mxu3 }
  0xb1   :  { %v293_v60 = vadd.f32 %v292_v58, %v71_v51 }
  0xb2   :  { %v301_v59 = vadd.f32 %v300_v56, %v279_v57 }
  0xb4   :  { %v302_v61 = vadd.f32 %v301_v59, %v293_v60 }
  0xb6   :  { %303 = vadd.xlane.f32.xlu1 %v302_v61 }
  0xcf   :  { %379 = vperm.xlu1 %631, %v24_v2  }
 0x121   :  { %v299_v6 = vpop.xlane.xlu1 %298 }
 0x122   :  { %v312_v7 = vmul.f32 %v311_v5, %v299_v6 }
 0x124   :  { %v314_v8 = vsub.f32 %v249_v41, %v312_v7  ;;  %v315_v9 = vsub.f32 %v263_v42, %v312_v7  ;;  %v316_v10 = vsub.f32 %v277_v45, %v312_v7  ;;  %v317_v11 = vsub.f32 %v291_v49, %v312_v7 }
 0x126   :  { %v322_v12 = vmul.f32 %v314_v8, %v314_v8  ;;  %v323_v13 = vmul.f32 %v315_v9, %v315_v9  ;;  %v324_v14 = vmul.f32 %v316_v10, %v316_v10  ;;  %v325_v18 = vmul.f32 %v317_v11, %v317_v11 }
 0x128   :  { %v330_v15 = vadd.f32 %v323_v13, %v322_v12 }
 0x129   :  { %v304_v16 = vpop.xlane.xlu1 %303 }
 0x12a   :  { %v313_v17 = vmul.f32 %v311_v5, %v304_v16  ;;  %v331_v19 = vadd.f32 %v330_v15, %v324_v14 }
 0x12c   :  { %v891_v20 = vsub.f32 %v251_v52, %v313_v17  ;;  %v893_v21 = vsub.f32 %v265_v53, %v313_v17  ;;  %v332_v22 = vadd.f32 %v331_v19, %v325_v18  ;;  %v895_v23 = vsub.f32 %v279_v57, %v313_v17  ;;  %v375_v53 = vpop.permute.xlu0 %374 }
 0x12d   :  { %v897_v24 = vsub.f32 %v293_v60, %v313_v17 }
 0x12e   :  { %333 = vadd.xlane.f32.xlu2 %v332_v22  ;;  %v326_v25 = vmul.f32 %v891_v20, %v891_v20  ;;  %v327_v26 = vmul.f32 %v893_v21, %v893_v21  ;;  %v328_v27 = vmul.f32 %v895_v23, %v895_v23 }
 0x12f   :  { %v329_v29 = vmul.f32 %v897_v24, %v897_v24 }
 0x130   :  { %v335_v28 = vadd.f32 %v327_v26, %v326_v25 }
 0x132   :  { %v336_v30 = vadd.f32 %v335_v28, %v328_v27 }
 0x134   :  { %v337_v31 = vadd.f32 %v336_v30, %v329_v29  ;;  %v398_v19 = vpop.permute.xlu0 %397 }
 0x136   :  { %338 = vadd.xlane.f32.xlu2 %v337_v31 }
 0x141   :  { %v380_v6 = vpop.permute.xlu1 %379 }
 0x14e   :  { %392 = vperm.xlu2 %632, %v25_v32  }
 0x1a1   :  { %v334_v33 = vpop.xlane.xlu2 %333 }
 0x1a2   :  { %v340_v34 = vmul.f32 %v334_v33, %v311_v5 }
 0x1a4   :  { %v342_v35 = vadd.f32 1e-05, %v340_v34 }
 0x1a6   :  { %635 = vrsqrt.f32 %v342_v35  ;;  %vm350_vm3 = vweird.f32 %v342_v35 }
 0x1a9   :  { %v339_v36 = vpop.xlane.xlu2 %338 }
 0x1aa   :  { %v341_v37 = vmul.f32 %v339_v36, %v311_v5 }
 0x1ac   :  { %v636_v38 = vpop.eup %635  ;;  %v343_v39 = vadd.f32 1e-05, %v341_v37 }
 0x1ad   :  { %v345_v40 = vmul.f32 %v636_v38, %v342_v35  ;;  %vm351_vm1 = vweird.f32 %v636_v38 }
 0x1ae   :  { %637 = vrsqrt.f32 %v343_v39  ;;  %vm352_vm4 = vmor %vm350_vm3, %vm351_vm1  ;;  %vm360_vm6 = vweird.f32 %v343_v39 }
 0x1af   :  { %v346_v41 = vmul.f32 %v636_v38, %v345_v40 }
 0x1b1   :  { %v347_v42 = vmul.f32 0.5, %v346_v41  ;;  %v393_v55 = vpop.permute.xlu2 %392 }
 0x1b3   :  { %v348_v43 = vsub.f32 1.5, %v347_v42 }
 0x1b4   :  { %v638_v44 = vpop.eup %637 }
 0x1b5   :  { %v349_v45 = vmul.f32 %v636_v38, %v348_v43  ;;  %v355_v46 = vmul.f32 %v638_v44, %v343_v39  ;;  %vm361_vm5 = vweird.f32 %v638_v44 }
 0x1b6   :  { %vm362_vm7 = vmor %vm360_vm6, %vm361_vm5 }
 0x1b7   :  { %v353_v47 = vsel %vm352_vm4, %v636_v38, %v349_v45  ;;  %v356_v48 = vmul.f32 %v638_v44, %v355_v46 }
 0x1b8   :  { %449 = vst.msk [vmem:[%s976_s7] sm:$0xff] %vm448_vm2, %v353_v47  ;;  %v364_v49 = vmul.f32 %v353_v47, %v314_v8  ;;  %v365_v50 = vmul.f32 %v353_v47, %v315_v9  ;;  %v366_v51 = vmul.f32 %v353_v47, %v316_v10  ;;  %v367_v52 = vmul.f32 %v353_v47, %v317_v11 }
 0x1b9   :  { %v357_v54 = vmul.f32 0.5, %v356_v48 }
 0x1ba   :  { %v382_v56 = vmul.f32 %v375_v53, %v364_v49  ;;  %v383_v57 = vmul.f32 %v375_v53, %v365_v50  ;;  %v384_v58 = vmul.f32 %v375_v53, %v366_v51  ;;  %v385_v59 = vmul.f32 %v375_v53, %v367_v52  ;;  %440 = vst [vmem:[%s977_s6] sm:$0xff] %v364_v49 }
 0x1bb   :  { %v358_v60 = vsub.f32 1.5, %v357_v54  ;;  %441 = vst [vmem:[%s977_s6 + $0x8] sm:$0xff] %v365_v50 }
 0x1bc   :  { %442 = vst [vmem:[%s977_s6 + $0x10] sm:$0xff] %v366_v51  ;;  %v400_v61 = vadd.f32 %v393_v55, %v382_v56  ;;  %v401_v62 = vadd.f32 %v393_v55, %v383_v57  ;;  %v402_v63 = vadd.f32 %v393_v55, %v384_v58  ;;  %v403_v0 = vadd.f32 %v393_v55, %v385_v59 }
 0x1bd   :  { %v359_v1 = vmul.f32 %v638_v44, %v358_v60  ;;  %443 = vst [vmem:[%s977_s6 + $0x18] sm:$0xff] %v367_v52 }
 0x1be   :  { %vm408_vm8 = vcmp.ge.f32.partialorder %v400_v61, 0.0  ;;  %vm409_vm9 = vcmp.ge.f32.partialorder %v401_v62, 0.0  ;;  %vm410_vm10 = vcmp.ge.f32.partialorder %v402_v63, 0.0  ;;  %vm411_vm11 = vcmp.ge.f32.partialorder %v403_v0, 0.0 }
 0x1bf   :  { %v363_v2 = vsel %vm362_vm7, %v638_v44, %v359_v1  ;;  %v416_v3 = vmul.f32 0.2, %v400_v61  ;;  %v417_v4 = vmul.f32 0.2, %v401_v62  ;;  %v418_v5 = vmul.f32 0.2, %v402_v63 }
 0x1c0   :  { %450 = vst.msk [vmem:[%s976_s7 + $0x8] sm:$0xff] %vm448_vm2, %v363_v2  ;;  %v419_v7 = vmul.f32 0.2, %v403_v0  ;;  %v368_v8 = vmul.f32 %v363_v2, %v891_v20  ;;  %v369_v9 = vmul.f32 %v363_v2, %v893_v21  ;;  %v370_v10 = vmul.f32 %v363_v2, %v895_v23 }
 0x1c1   :  { %v424_v11 = vsel %vm408_vm8, %v400_v61, %v416_v3  ;;  %v425_v12 = vsel %vm409_vm9, %v401_v62, %v417_v4  ;;  %v426_v13 = vsel %vm410_vm10, %v402_v63, %v418_v5  ;;  %v371_v14 = vmul.f32 %v363_v2, %v897_v24 }
 0x1c2   :  { %v427_v15 = vsel %vm411_vm11, %v403_v0, %v419_v7  ;;  %432 = vst [vmem:[%s978_s5] sm:$0xff] %v424_v11  ;;  %v386_v16 = vmul.f32 %v380_v6, %v368_v8  ;;  %v387_v17 = vmul.f32 %v380_v6, %v369_v9  ;;  %v388_v18 = vmul.f32 %v380_v6, %v370_v10 }
 0x1c3   :  { %433 = vst [vmem:[%s978_s5 + $0x8] sm:$0xff] %v425_v12  ;;  %v389_v20 = vmul.f32 %v380_v6, %v371_v14 }
 0x1c4   :  { %434 = vst [vmem:[%s978_s5 + $0x10] sm:$0xff] %v426_v13  ;;  %v404_v21 = vadd.f32 %v398_v19, %v386_v16  ;;  %v405_v22 = vadd.f32 %v398_v19, %v387_v17  ;;  %v406_v23 = vadd.f32 %v398_v19, %v388_v18 }
 0x1c5   :  { %435 = vst [vmem:[%s978_s5 + $0x18] sm:$0xff] %v427_v15  ;;  %v407_v24 = vadd.f32 %v398_v19, %v389_v20 }
 0x1c6   :  { %444 = vst [vmem:[%s977_s6 + $0x20] sm:$0xff] %v368_v8  ;;  %vm412_vm12 = vcmp.ge.f32.partialorder %v404_v21, 0.0  ;;  %vm413_vm13 = vcmp.ge.f32.partialorder %v405_v22, 0.0  ;;  %vm414_vm14 = vcmp.ge.f32.partialorder %v406_v23, 0.0  ;;  %v420_v25 = vmul.f32 0.2, %v404_v21 }
 0x1c7   :  { %445 = vst [vmem:[%s977_s6 + $0x28] sm:$0xff] %v369_v9  ;;  %vm415_vm15 = vcmp.ge.f32.partialorder %v407_v24, 0.0  ;;  %v421_v26 = vmul.f32 0.2, %v405_v22  ;;  %v422_v27 = vmul.f32 0.2, %v406_v23 }
 0x1c8   :  { %446 = vst [vmem:[%s977_s6 + $0x30] sm:$0xff] %v370_v10  ;;  %v423_v28 = vmul.f32 0.2, %v407_v24  ;;  %v428_v29 = vsel %vm412_vm12, %v404_v21, %v420_v25 }
 0x1c9   :  { %447 = vst [vmem:[%s977_s6 + $0x38] sm:$0xff] %v371_v14  ;;  %v429_v30 = vsel %vm413_vm13, %v405_v22, %v421_v26  ;;  %v430_v31 = vsel %vm414_vm14, %v406_v23, %v422_v27 }
 0x1ca   :  { %v431_v32 = vsel %vm415_vm15, %v407_v24, %v423_v28  ;;  %436 = vst [vmem:[%s978_s5 + $0x20] sm:$0xff] %v428_v29 }
 0x1cb   :  { %437 = vst [vmem:[%s978_s5 + $0x28] sm:$0xff] %v429_v30 }
 0x1cc   :  { %438 = vst [vmem:[%s978_s5 + $0x30] sm:$0xff] %v430_v31 }
 0x1cd   :  { %439 = vst [vmem:[%s978_s5 + $0x38] sm:$0xff] %v431_v32 }

// kernel: jvp__.6
= control target key start
LH: loop header
LB: loop body
LE: loop exit
PB: predicated region body
PF: predicated region fallthrough
CT: control target
= control target key end

     0   :  { %v548_v4 = vmov 0   ;;  %v549_v60 = vmov 128.0   ;;  %vm400_vm2 = vcmask 7168   ;;  %s759_s0 = inlined_call_operand.vmem [shape: bf16[256,128], index: 0, kind: input, shape index: {}]   ;;  %s760_s2 = inlined_call_operand.vmem [shape: f32[32,1], index: 2, kind: input, shape index: {}]   ;;  %s761_s1 = inlined_call_operand.vmem [shape: bf16[32,256], index: 1, kind: input, shape index: {}]   ;;  %s762_s3 = inlined_call_operand.vmem [shape: f32[32,1], index: 3, kind: input, shape index: {}]   ;;  %s763_s4 = inlined_call_operand.vmem [shape: f32[32,1], index: 4, kind: input, shape index: {}]   ;;  %s764_s7 = inlined_call_operand.vmem [shape: f32[32,1], index: 7, kind: output, shape index: {2}]   ;;  %s765_s6 = inlined_call_operand.vmem [shape: f32[32,128], index: 6, kind: output, shape index: {1}]   ;;  %s766_s5 = inlined_call_operand.vmem [shape: f32[32,128], index: 5, kind: output, shape index: {0}]  }
   0x1   :  { %v508_v0 = vld [vmem:[%s759_s0 + $0x38] sm:$0xff]  ;;  %v507_v2 = vld [vmem:[%s759_s0 + $0x30] sm:$0xff]  ;;  %535 = vset.pattern.permute.xlu0 %v548_v4  ;;  %536 = vset.pattern.permute.xlu1 %v548_v4  ;;  %v506_v5 = vld [vmem:[%s759_s0 + $0x28] sm:$0xff]  ;;  %538 = vrcp.f32 %v549_v60 }
   0x2   :  { %v516_v1 = vld [vmem:[%s759_s0 + $0x78] sm:$0xff]  ;;  %207 = vmatpush.bf16.msra.mxu0 %v508_v0  ;;  %517 = vmatpush.bf16.msra.mxu2 %v508_v0  ;;  %v515_v3 = vld [vmem:[%s759_s0 + $0x70] sm:$0xff]  ;;  %v514_v6 = vld [vmem:[%s759_s0 + $0x68] sm:$0xff] }
   0x3   :  { %226 = vmatpush.bf16.msra.mxu1 %v516_v1  ;;  %525 = vmatpush.bf16.msra.mxu3 %v516_v1  ;;  %v67_v7 = vld [vmem:[%s760_s2] sm:$0xff]  ;;  %v69_v8 = vld [vmem:[%s760_s2 + $0x10] sm:$0xff]  ;;  %v504_v11 = vld [vmem:[%s759_s0 + $0x18] sm:$0xff] }
   0x4   :  { %537 = vset.pattern.permute.xlu2 %v548_v4  ;;  %73 = vperm.xlu0 %535, %v67_v7   ;;  %v505_v9 = vld [vmem:[%s759_s0 + $0x20] sm:$0xff]  ;;  %v68_v12 = vld [vmem:[%s760_s2 + $0x8] sm:$0xff]  ;;  %v70_v13 = vld [vmem:[%s760_s2 + $0x18] sm:$0xff] }
   0x5   :  { %83 = vperm.xlu1 %536, %v69_v8   ;;  %v513_v10 = vld [vmem:[%s759_s0 + $0x60] sm:$0xff]  ;;  %v512_v14 = vld [vmem:[%s759_s0 + $0x58] sm:$0xff]  ;;  %v503_v15 = vld [vmem:[%s759_s0 + $0x10] sm:$0xff] }
   0x6   :  { %208 = vmatpush.bf16.msra.mxu0 %v507_v2  ;;  %518 = vmatpush.bf16.msra.mxu2 %v507_v2  ;;  %v511_v16 = vld [vmem:[%s759_s0 + $0x50] sm:$0xff]  ;;  %v502_v17 = vld [vmem:[%s759_s0 + $0x8] sm:$0xff]  ;;  %v501_v19 = vld [vmem:[%s759_s0] sm:$0xff] }
   0x7   :  { %227 = vmatpush.bf16.msra.mxu1 %v515_v3  ;;  %526 = vmatpush.bf16.msra.mxu3 %v515_v3  ;;  %v510_v18 = vld [vmem:[%s759_s0 + $0x48] sm:$0xff]  ;;  %v509_v20 = vld [vmem:[%s759_s0 + $0x40] sm:$0xff]  ;;  %v427_v23 = vld [vmem:[%s761_s1 + $0x10] sm:$0xf]  ;;  %v539_v61 = vpop.eup %538 }
   0x8   :  { %v419_v21 = vld [vmem:[%s761_s1] sm:$0xf]  ;;  %v498_v22 = vld [vmem:[%s761_s1 + $0x4] sm:$0xf0]  ;;  %v500_v24 = vld [vmem:[%s761_s1 + $0x14] sm:$0xf0]  ;;  %vm258_vm0 = vweird.f32 %v539_v61 }
   0x9   :  { %v497_v25 = vld [vmem:[%s761_s1 + $0x4] sm:$0xf]  ;;  %v421_v26 = vld [vmem:[%s761_s1 + $0x8] sm:$0xf0]  ;;  %v499_v27 = vld [vmem:[%s761_s1 + $0x14] sm:$0xf]  ;;  %v420_v29 = vor.u32 %v498_v22, %v419_v21  ;;  %v428_v30 = vor.u32 %v500_v24, %v427_v23 }
   0xa   :  { %209 = vmatpush.bf16.msra.mxu0 %v506_v5  ;;  %519 = vmatpush.bf16.msra.mxu2 %v506_v5  ;;  %v429_v28 = vld [vmem:[%s761_s1 + $0x18] sm:$0xf0]  ;;  %v424_v31 = vor.u32 %v497_v25, %v421_v26  ;;  %v24_v53 = vld [vmem:[%s762_s3 + $0x8] sm:$0xff]  ;;  %v23_v54 = vld [vmem:[%s762_s3] sm:$0xff]  ;;  %v254_v62 = vmul.f32 128.0, %v539_v61 }
   0xb   :  { %228 = vmatpush.bf16.msra.mxu1 %v514_v6  ;;  %527 = vmatpush.bf16.msra.mxu3 %v514_v6  ;;  %v432_v32 = vor.u32 %v499_v27, %v429_v28  ;;  %v27_v55 = vld [vmem:[%s763_s4] sm:$0xff]  ;;  %v25_v56 = vld [vmem:[%s762_s3 + $0x10] sm:$0xff]  ;;  %v26_v57 = vld [vmem:[%s762_s3 + $0x18] sm:$0xff] }
   0xc   :  { %78 = vperm.xlu0 %535, %v68_v12   ;;  %v30_v58 = vld [vmem:[%s763_s4 + $0x18] sm:$0xff]  ;;  %v29_v59 = vld [vmem:[%s763_s4 + $0x10] sm:$0xff]  ;;  %v255_v63 = vsub.f32 1.0, %v254_v62 }
   0xd   :  { %88 = vperm.xlu1 %536, %v70_v13  }
   0xe   :  { %210 = vmatpush.bf16.msra.mxu0 %v505_v9  ;;  %520 = vmatpush.bf16.msra.mxu2 %v505_v9  ;;  %v256_v0 = vmul.f32 %v539_v61, %v255_v63 }
   0xf   :  { %229 = vmatpush.bf16.msra.mxu1 %v513_v10  ;;  %528 = vmatpush.bf16.msra.mxu3 %v513_v10 }
  0x10   :  { %v257_v1 = vadd.f32 %v539_v61, %v256_v0 }
  0x12   :  { %211 = vmatpush.bf16.msra.mxu0 %v504_v11  ;;  %521 = vmatpush.bf16.msra.mxu2 %v504_v11  ;;  %v259_v2 = vsel %vm258_vm0, %v539_v61, %v257_v1 }
  0x13   :  { %230 = vmatpush.bf16.msra.mxu1 %v512_v14  ;;  %529 = vmatpush.bf16.msra.mxu3 %v512_v14 }
  0x16   :  { %212 = vmatpush.bf16.msra.mxu0 %v503_v15  ;;  %522 = vmatpush.bf16.msra.mxu2 %v503_v15 }
  0x17   :  { %231 = vmatpush.bf16.msra.mxu1 %v511_v16  ;;  %530 = vmatpush.bf16.msra.mxu3 %v511_v16 }
  0x1a   :  { %213 = vmatpush.bf16.msra.mxu0 %v502_v17  ;;  %523 = vmatpush.bf16.msra.mxu2 %v502_v17 }
  0x1b   :  { %232 = vmatpush.bf16.msra.mxu1 %v510_v18  ;;  %531 = vmatpush.bf16.msra.mxu3 %v510_v18 }
  0x1e   :  { %214 = vmatpush.bf16.msra.mxu0 %v501_v19  ;;  %524 = vmatpush.bf16.msra.mxu2 %v501_v19  ;;  %v28_v19 = vld [vmem:[%s763_s4 + $0x8] sm:$0xff] }
  0x1f   :  { %233 = vmatpush.bf16.msra.mxu1 %v509_v20  ;;  %532 = vmatpush.bf16.msra.mxu3 %v509_v20 }
  0x21   :  { %215 = vmatmul.bf16.vlgmr.msra.gmra.mxu0 %v420_v29  ;;  %220 = vmatmul.bf16.vlgmr.msra.gmra.mxu2 %v428_v30 }
  0x22   :  { %234 = vmatmul.bf16.vlgmr.msra.gmra.mxu1 %v424_v31  ;;  %239 = vmatmul.bf16.vlgmr.msra.gmra.mxu3 %v432_v32 }
  0x76   :  { %v74_v33 = vpop.permute.xlu0 %73 }
  0x77   :  { %v84_v38 = vpop.permute.xlu1 %83 }
  0x7e   :  { %v79_v42 = vpop.permute.xlu0 %78 }
  0x7f   :  { %v89_v48 = vpop.permute.xlu1 %88 }
  0x9e   :  { %v216_v34 = vpop.f32.mrf.mxu0 }
  0x9f   :  { %v217_v35 = vadd.f32 %v216_v34, %v74_v33  ;;  %v235_v36 = vpop.f32.mrf.mxu1 }
  0xa1   :  { %v236_v37 = vadd.f32 %v235_v36, %v217_v35 }
  0xa3   :  { %245 = vadd.xlane.f32.xlu2 %v236_v37 }
  0xa4   :  { %v221_v39 = vpop.f32.mrf.mxu2 }
  0xa5   :  { %v222_v40 = vadd.f32 %v221_v39, %v84_v38  ;;  %v240_v41 = vpop.f32.mrf.mxu3 }
  0xa6   :  { %v218_v43 = vpop.f32.mrf.mxu0 }
  0xa7   :  { %v241_v44 = vadd.f32 %v240_v41, %v222_v40  ;;  %v219_v45 = vadd.f32 %v218_v43, %v79_v42  ;;  %v237_v46 = vpop.f32.mrf.mxu1 }
  0xa9   :  { %v238_v47 = vadd.f32 %v237_v46, %v219_v45  ;;  %249 = vadd.xlane.f32.xlu0 %v241_v44 }
  0xab   :  { %247 = vadd.xlane.f32.xlu2 %v238_v47 }
  0xac   :  { %v223_v49 = vpop.f32.mrf.mxu2 }
  0xad   :  { %v224_v50 = vadd.f32 %v223_v49, %v89_v48  ;;  %v242_v51 = vpop.f32.mrf.mxu3 }
  0xaf   :  { %v243_v52 = vadd.f32 %v242_v51, %v224_v50 }
  0xb1   :  { %251 = vadd.xlane.f32.xlu1 %v243_v52 }
  0xbd   :  { %339 = vperm.xlu0 %535, %v24_v53  }
  0xc3   :  { %334 = vperm.xlu2 %537, %v23_v54  }
  0xc5   :  { %358 = vperm.xlu0 %535, %v27_v55  }
  0xca   :  { %344 = vperm.xlu1 %536, %v25_v56  }
  0xcb   :  { %349 = vperm.xlu2 %537, %v26_v57  }
  0xcd   :  { %373 = vperm.xlu0 %535, %v30_v58  }
  0xd2   :  { %368 = vperm.xlu1 %536, %v29_v59  }
 0x116   :  { %v246_v3 = vpop.xlane.xlu2 %245 }
 0x117   :  { %v260_v4 = vmul.f32 %v259_v2, %v246_v3 }
 0x119   :  { %v264_v5 = vsub.f32 %v236_v37, %v260_v4 }
 0x11b   :  { %v268_v6 = vmul.f32 %v264_v5, %v264_v5 }
 0x11c   :  { %v250_v7 = vpop.xlane.xlu0 %249 }
 0x11d   :  { %v262_v8 = vmul.f32 %v259_v2, %v250_v7  ;;  %272 = vadd.xlane.f32.xlu2 %v268_v6 }
 0x11e   :  { %v248_v10 = vpop.xlane.xlu2 %247 }
 0x11f   :  { %v695_v9 = vsub.f32 %v241_v44, %v262_v8  ;;  %v261_v11 = vmul.f32 %v259_v2, %v248_v10 }
 0x121   :  { %v270_v12 = vmul.f32 %v695_v9, %v695_v9  ;;  %v699_v13 = vsub.f32 %v238_v47, %v261_v11 }
 0x123   :  { %v269_v16 = vmul.f32 %v699_v13, %v699_v13 }
 0x124   :  { %v252_v14 = vpop.xlane.xlu1 %251 }
 0x125   :  { %276 = vadd.xlane.f32.xlu2 %v270_v12  ;;  %v263_v15 = vmul.f32 %v259_v2, %v252_v14 }
 0x126   :  { %v335_v20 = vpop.permute.xlu2 %334 }
 0x127   :  { %v703_v17 = vsub.f32 %v243_v52, %v263_v15 }
 0x129   :  { %v271_v18 = vmul.f32 %v703_v17, %v703_v17 }
 0x12d   :  { %274 = vadd.xlane.f32.xlu2 %v269_v16 }
 0x12e   :  { %v710_v21 = vpop.permute.xlu2 %349 }
 0x12f   :  { %v712_v31 = vpop.permute.xlu0 %339 }
 0x135   :  { %278 = vadd.xlane.f32.xlu2 %v271_v18 }
 0x137   :  { %v359_v48 = vpop.permute.xlu0 %358 }
 0x13c   :  { %v345_v43 = vpop.permute.xlu1 %344 }
 0x144   :  { %v369_v62 = vpop.permute.xlu1 %368 }
 0x14d   :  { %363 = vperm.xlu2 %537, %v28_v19  }
 0x190   :  { %v273_v22 = vpop.xlane.xlu2 %272 }
 0x191   :  { %v280_v23 = vmul.f32 %v273_v22, %v259_v2  ;;  %v374_v22 = vpop.permute.xlu0 %373 }
 0x193   :  { %v284_v24 = vadd.f32 1e-05, %v280_v23 }
 0x195   :  { %540 = vrsqrt.f32 %v284_v24  ;;  %vm294_vm3 = vweird.f32 %v284_v24 }
 0x198   :  { %v277_v25 = vpop.xlane.xlu2 %276 }
 0x199   :  { %v282_v26 = vmul.f32 %v277_v25, %v259_v2 }
 0x19b   :  { %v541_v27 = vpop.eup %540  ;;  %v286_v28 = vadd.f32 1e-05, %v282_v26 }
 0x19c   :  { %v289_v29 = vmul.f32 %v541_v27, %v284_v24  ;;  %vm295_vm1 = vweird.f32 %v541_v27 }
 0x19d   :  { %542 = vrsqrt.f32 %v286_v28  ;;  %vm296_vm4 = vmor %vm294_vm3, %vm295_vm1  ;;  %vm314_vm6 = vweird.f32 %v286_v28 }
 0x19e   :  { %v290_v30 = vmul.f32 %v541_v27, %v289_v29 }
 0x1a0   :  { %v291_v32 = vmul.f32 0.5, %v290_v30  ;;  %v275_v33 = vpop.xlane.xlu2 %274 }
 0x1a1   :  { %v281_v34 = vmul.f32 %v275_v33, %v259_v2 }
 0x1a2   :  { %v292_v35 = vsub.f32 1.5, %v291_v32 }
 0x1a3   :  { %v543_v36 = vpop.eup %542  ;;  %v285_v37 = vadd.f32 1e-05, %v281_v34 }
 0x1a4   :  { %v293_v38 = vmul.f32 %v541_v27, %v292_v35  ;;  %v309_v39 = vmul.f32 %v543_v36, %v286_v28  ;;  %vm315_vm5 = vweird.f32 %v543_v36 }
 0x1a5   :  { %544 = vrsqrt.f32 %v285_v37  ;;  %vm316_vm7 = vmor %vm314_vm6, %vm315_vm5  ;;  %vm304_vm10 = vweird.f32 %v285_v37 }
 0x1a6   :  { %v297_v40 = vsel %vm296_vm4, %v541_v27, %v293_v38  ;;  %v310_v41 = vmul.f32 %v543_v36, %v309_v39 }
 0x1a7   :  { %v328_v42 = vmul.f32 %v297_v40, %v264_v5  ;;  %401 = vst.msk [vmem:[%s764_s7] sm:$0xff] %vm400_vm2, %v297_v40 }
 0x1a8   :  { %v311_v44 = vmul.f32 0.5, %v310_v41  ;;  %v279_v45 = vpop.xlane.xlu2 %278 }
 0x1a9   :  { %v352_v46 = vmul.f32 %v335_v20, %v328_v42  ;;  %v283_v47 = vmul.f32 %v279_v45, %v259_v2  ;;  %396 = vst [vmem:[%s765_s6] sm:$0xff] %v328_v42 }
 0x1aa   :  { %v312_v49 = vsub.f32 1.5, %v311_v44 }
 0x1ab   :  { %v545_v50 = vpop.eup %544  ;;  %v376_v51 = vadd.f32 %v359_v48, %v352_v46  ;;  %v287_v52 = vadd.f32 1e-05, %v283_v47 }
 0x1ac   :  { %v313_v53 = vmul.f32 %v543_v36, %v312_v49  ;;  %v299_v54 = vmul.f32 %v545_v50, %v285_v37  ;;  %vm305_vm9 = vweird.f32 %v545_v50 }
 0x1ad   :  { %v384_v55 = vmul.f32 0.2, %v376_v51  ;;  %546 = vrsqrt.f32 %v287_v52  ;;  %vm380_vm8 = vcmp.ge.f32.partialorder %v376_v51, 0.0  ;;  %vm306_vm11 = vmor %vm304_vm10, %vm305_vm9  ;;  %vm324_vm14 = vweird.f32 %v287_v52 }
 0x1ae   :  { %v317_v56 = vsel %vm316_vm7, %v543_v36, %v313_v53  ;;  %v300_v57 = vmul.f32 %v545_v50, %v299_v54 }
 0x1af   :  { %v330_v58 = vmul.f32 %v317_v56, %v695_v9  ;;  %403 = vst.msk [vmem:[%s764_s7 + $0x10] sm:$0xff] %vm400_vm2, %v317_v56  ;;  %v388_v59 = vsel %vm380_vm8, %v376_v51, %v384_v55 }
 0x1b0   :  { %v301_v60 = vmul.f32 0.5, %v300_v57  ;;  %392 = vst [vmem:[%s766_s5] sm:$0xff] %v388_v59  ;;  %v364_v12 = vpop.permute.xlu2 %363 }
 0x1b1   :  { %v354_v61 = vmul.f32 %v345_v43, %v330_v58  ;;  %398 = vst [vmem:[%s765_s6 + $0x10] sm:$0xff] %v330_v58 }
 0x1b2   :  { %v302_v63 = vsub.f32 1.5, %v301_v60 }
 0x1b3   :  { %v547_v0 = vpop.eup %546  ;;  %v378_v1 = vadd.f32 %v369_v62, %v354_v61 }
 0x1b4   :  { %v319_v2 = vmul.f32 %v547_v0, %v287_v52  ;;  %v303_v3 = vmul.f32 %v545_v50, %v302_v63  ;;  %vm325_vm13 = vweird.f32 %v547_v0 }
 0x1b5   :  { %v386_v4 = vmul.f32 0.2, %v378_v1  ;;  %vm382_vm12 = vcmp.ge.f32.partialorder %v378_v1, 0.0  ;;  %vm326_vm15 = vmor %vm324_vm14, %vm325_vm13 }
 0x1b6   :  { %v320_v5 = vmul.f32 %v547_v0, %v319_v2  ;;  %v307_v6 = vsel %vm306_vm11, %v545_v50, %v303_v3 }
 0x1b7   :  { %v329_v7 = vmul.f32 %v307_v6, %v699_v13  ;;  %v390_v8 = vsel %vm382_vm12, %v378_v1, %v386_v4  ;;  %402 = vst.msk [vmem:[%s764_s7 + $0x8] sm:$0xff] %vm400_vm2, %v307_v6 }
 0x1b8   :  { %v321_v9 = vmul.f32 0.5, %v320_v5  ;;  %394 = vst [vmem:[%s766_s5 + $0x10] sm:$0xff] %v390_v8 }
 0x1b9   :  { %v353_v10 = vmul.f32 %v712_v31, %v329_v7  ;;  %397 = vst [vmem:[%s765_s6 + $0x8] sm:$0xff] %v329_v7 }
 0x1ba   :  { %v322_v11 = vsub.f32 1.5, %v321_v9 }
 0x1bb   :  { %v377_v13 = vadd.f32 %v364_v12, %v353_v10 }
 0x1bc   :  { %v323_v14 = vmul.f32 %v547_v0, %v322_v11 }
 0x1bd   :  { %vm381_vm0 = vcmp.ge.f32.partialorder %v377_v13, 0.0  ;;  %v385_v15 = vmul.f32 0.2, %v377_v13 }
 0x1be   :  { %v327_v16 = vsel %vm326_vm15, %v547_v0, %v323_v14 }
 0x1bf   :  { %v331_v18 = vmul.f32 %v327_v16, %v703_v17  ;;  %404 = vst.msk [vmem:[%s764_s7 + $0x18] sm:$0xff] %vm400_vm2, %v327_v16  ;;  %v389_v19 = vsel %vm381_vm0, %v377_v13, %v385_v15 }
 0x1c0   :  { %393 = vst [vmem:[%s766_s5 + $0x8] sm:$0xff] %v389_v19 }
 0x1c1   :  { %v355_v20 = vmul.f32 %v710_v21, %v331_v18  ;;  %399 = vst [vmem:[%s765_s6 + $0x18] sm:$0xff] %v331_v18 }
 0x1c3   :  { %v379_v23 = vadd.f32 %v374_v22, %v355_v20 }
 0x1c5   :  { %v387_v24 = vmul.f32 0.2, %v379_v23  ;;  %vm383_vm1 = vcmp.ge.f32.partialorder %v379_v23, 0.0 }
 0x1c7   :  { %v391_v17 = vsel %vm383_vm1, %v379_v23, %v387_v24 }
 0x1c8   :  { %395 = vst [vmem:[%s766_s5 + $0x18] sm:$0xff] %v391_v17 }

// kernel: jvp__.7
= control target key start
LH: loop header
LB: loop body
LE: loop exit
PB: predicated region body
PF: predicated region fallthrough
CT: control target
= control target key end

     0   :  { %v1159_v3 = vmov 0   ;;  %vm555_vm0 = vcmask 261120   ;;  %vm875_vm3 = vcmask 7168   ;;  %s1706_s0 = inlined_call_operand.vmem [shape: bf16[512,32], index: 0, kind: input, shape index: {}]   ;;  %s1707_s2 = inlined_call_operand.vmem [shape: f32[64,1], index: 2, kind: input, shape index: {}]   ;;  %s1708_s1 = inlined_call_operand.vmem [shape: bf16[64,512], index: 1, kind: input, shape index: {}]   ;;  %s1709_s3 = inlined_call_operand.vmem [shape: f32[64,1], index: 3, kind: input, shape index: {}]   ;;  %s1710_s4 = inlined_call_operand.vmem [shape: f32[64,1], index: 4, kind: input, shape index: {}]   ;;  %s1711_s7 = inlined_call_operand.vmem [shape: f32[64,1], index: 7, kind: output, shape index: {2}]   ;;  %s1712_s6 = inlined_call_operand.vmem [shape: f32[64,32], index: 6, kind: output, shape index: {1}]   ;;  %s1713_s5 = inlined_call_operand.vmem [shape: f32[64,32], index: 5, kind: output, shape index: {0}]  }
   0x1   :  { %v1111_v0 = vld [vmem:[%s1706_s0 + $0x38] sm:$0xff]  ;;  %1138 = vset.pattern.permute.xlu0 %v1159_v3  ;;  %1139 = vset.pattern.permute.xlu1 %v1159_v3  ;;  %v1110_v5 = vld [vmem:[%s1706_s0 + $0x30] sm:$0xff]  ;;  %v1109_v9 = vld [vmem:[%s1706_s0 + $0x28] sm:$0xff] }
   0x2   :  { %v1119_v1 = vld [vmem:[%s1706_s0 + $0x78] sm:$0xff]  ;;  %1140 = vset.pattern.permute.xlu2 %v1159_v3  ;;  %439 = vmatpush.bf16.msra.mxu0 %v1111_v0  ;;  %v1118_v6 = vld [vmem:[%s1706_s0 + $0x70] sm:$0xff]  ;;  %v1117_v10 = vld [vmem:[%s1706_s0 + $0x68] sm:$0xff] }
   0x3   :  { %v1127_v2 = vld [vmem:[%s1706_s0 + $0xb8] sm:$0xff]  ;;  %468 = vmatpush.bf16.msra.mxu1 %v1119_v1  ;;  %v1126_v7 = vld [vmem:[%s1706_s0 + $0xb0] sm:$0xff]  ;;  %v1125_v11 = vld [vmem:[%s1706_s0 + $0xa8] sm:$0xff] }
   0x4   :  { %v1135_v4 = vld [vmem:[%s1706_s0 + $0xf8] sm:$0xff]  ;;  %497 = vmatpush.bf16.msra.mxu2 %v1127_v2  ;;  %v1134_v8 = vld [vmem:[%s1706_s0 + $0xf0] sm:$0xff]  ;;  %v1133_v12 = vld [vmem:[%s1706_s0 + $0xe8] sm:$0xff] }
   0x5   :  { %526 = vmatpush.bf16.msra.mxu3 %v1135_v4  ;;  %v119_v13 = vld [vmem:[%s1707_s2] sm:$0xff]  ;;  %v121_v18 = vld [vmem:[%s1707_s2 + $0x10] sm:$0xff]  ;;  %v1107_v19 = vld [vmem:[%s1706_s0 + $0x18] sm:$0xff] }
   0x6   :  { %440 = vmatpush.bf16.msra.mxu0 %v1110_v5  ;;  %v1108_v14 = vld [vmem:[%s1706_s0 + $0x20] sm:$0xff]  ;;  %129 = vperm.xlu0 %1138, %v119_v13   ;;  %v1115_v20 = vld [vmem:[%s1706_s0 + $0x58] sm:$0xff]  ;;  %v120_v23 = vld [vmem:[%s1707_s2 + $0x8] sm:$0xff] }
   0x7   :  { %469 = vmatpush.bf16.msra.mxu1 %v1118_v6  ;;  %v1116_v15 = vld [vmem:[%s1706_s0 + $0x60] sm:$0xff]  ;;  %v1123_v21 = vld [vmem:[%s1706_s0 + $0x98] sm:$0xff]  ;;  %139 = vperm.xlu1 %1139, %v121_v18   ;;  %v1106_v24 = vld [vmem:[%s1706_s0 + $0x10] sm:$0xff] }
   0x8   :  { %498 = vmatpush.bf16.msra.mxu2 %v1126_v7  ;;  %v1124_v16 = vld [vmem:[%s1706_s0 + $0xa0] sm:$0xff]  ;;  %v1131_v22 = vld [vmem:[%s1706_s0 + $0xd8] sm:$0xff]  ;;  %v1114_v25 = vld [vmem:[%s1706_s0 + $0x50] sm:$0xff] }
   0x9   :  { %527 = vmatpush.bf16.msra.mxu3 %v1134_v8  ;;  %v1132_v17 = vld [vmem:[%s1706_s0 + $0xe0] sm:$0xff]  ;;  %v1122_v26 = vld [vmem:[%s1706_s0 + $0x90] sm:$0xff]  ;;  %v122_v28 = vld [vmem:[%s1707_s2 + $0x18] sm:$0xff] }
   0xa   :  { %441 = vmatpush.bf16.msra.mxu0 %v1109_v9  ;;  %v1130_v27 = vld [vmem:[%s1706_s0 + $0xd0] sm:$0xff]  ;;  %v1105_v29 = vld [vmem:[%s1706_s0 + $0x8] sm:$0xff]  ;;  %v1104_v33 = vld [vmem:[%s1706_s0] sm:$0xff] }
   0xb   :  { %470 = vmatpush.bf16.msra.mxu1 %v1117_v10  ;;  %v1113_v30 = vld [vmem:[%s1706_s0 + $0x48] sm:$0xff]  ;;  %v1112_v34 = vld [vmem:[%s1706_s0 + $0x40] sm:$0xff]  ;;  %v1090_v38 = vld [vmem:[%s1708_s1 + $0xc] sm:$0xf0] }
   0xc   :  { %499 = vmatpush.bf16.msra.mxu2 %v1125_v11  ;;  %v1121_v31 = vld [vmem:[%s1706_s0 + $0x88] sm:$0xff]  ;;  %v1120_v35 = vld [vmem:[%s1706_s0 + $0x80] sm:$0xff]  ;;  %v125_v39 = vld [vmem:[%s1707_s2 + $0x30] sm:$0xff] }
   0xd   :  { %528 = vmatpush.bf16.msra.mxu3 %v1133_v12  ;;  %v1129_v32 = vld [vmem:[%s1706_s0 + $0xc8] sm:$0xff]  ;;  %v1128_v36 = vld [vmem:[%s1706_s0 + $0xc0] sm:$0xff]  ;;  %v900_v41 = vld [vmem:[%s1708_s1 + $0x10] sm:$0xf0] }
   0xe   :  { %442 = vmatpush.bf16.msra.mxu0 %v1108_v14  ;;  %134 = vperm.xlu0 %1138, %v120_v23   ;;  %v898_v37 = vld [vmem:[%s1708_s1] sm:$0xf]  ;;  %v1088_v40 = vld [vmem:[%s1708_s1 + $0x4] sm:$0xf]  ;;  %v906_v42 = vld [vmem:[%s1708_s1 + $0x8] sm:$0xf] }
   0xf   :  { %471 = vmatpush.bf16.msra.mxu1 %v1116_v15  ;;  %144 = vperm.xlu1 %1139, %v122_v28   ;;  %v1091_v43 = vld [vmem:[%s1708_s1 + $0x14] sm:$0xf0]  ;;  %v1089_v44 = vld [vmem:[%s1708_s1 + $0xc] sm:$0xf]  ;;  %v908_v45 = vld [vmem:[%s1708_s1 + $0x18] sm:$0xf0]  ;;  %v899_v46 = vor.u32 %v1090_v38, %v898_v37  ;;  %v903_v47 = vor.u32 %v1088_v40, %v900_v41 }
  0x10   :  { %500 = vmatpush.bf16.msra.mxu2 %v1124_v16  ;;  %v126_v48 = vld [vmem:[%s1707_s2 + $0x38] sm:$0xff]  ;;  %v907_v49 = vor.u32 %v1091_v43, %v906_v42  ;;  %v911_v50 = vor.u32 %v1089_v44, %v908_v45  ;;  %v24_v51 = vld [vmem:[%s1709_s3 + $0x8] sm:$0xff]  ;;  %v25_v52 = vld [vmem:[%s1709_s3 + $0x10] sm:$0xff] }
  0x11   :  { %529 = vmatpush.bf16.msra.mxu3 %v1132_v17  ;;  %v914_v53 = vld [vmem:[%s1708_s1 + $0x20] sm:$0xf]  ;;  %v1094_v54 = vld [vmem:[%s1708_s1 + $0x2c] sm:$0xf0]  ;;  %v26_v55 = vld [vmem:[%s1709_s3 + $0x18] sm:$0xff] }
  0x12   :  { %443 = vmatpush.bf16.msra.mxu0 %v1107_v19  ;;  %v1092_v56 = vld [vmem:[%s1708_s1 + $0x24] sm:$0xf]  ;;  %v916_v57 = vld [vmem:[%s1708_s1 + $0x30] sm:$0xf0]  ;;  %v922_v58 = vld [vmem:[%s1708_s1 + $0x28] sm:$0xf]  ;;  %v915_v62 = vor.u32 %v1094_v54, %v914_v53 }
  0x13   :  { %472 = vmatpush.bf16.msra.mxu1 %v1115_v20  ;;  %v1095_v59 = vld [vmem:[%s1708_s1 + $0x34] sm:$0xf0]  ;;  %v1093_v60 = vld [vmem:[%s1708_s1 + $0x2c] sm:$0xf]  ;;  %v924_v61 = vld [vmem:[%s1708_s1 + $0x38] sm:$0xf0]  ;;  %v919_v63 = vor.u32 %v1092_v56, %v916_v57 }
  0x14   :  { %501 = vmatpush.bf16.msra.mxu2 %v1123_v21  ;;  %v28_v0 = vld [vmem:[%s1709_s3 + $0x28] sm:$0xff]  ;;  %v923_v1 = vor.u32 %v1095_v59, %v922_v58  ;;  %v927_v2 = vor.u32 %v1093_v60, %v924_v61  ;;  %v29_v3 = vld [vmem:[%s1709_s3 + $0x30] sm:$0xff]  ;;  %v123_v4 = vld [vmem:[%s1707_s2 + $0x20] sm:$0xff] }
  0x15   :  { %530 = vmatpush.bf16.msra.mxu3 %v1131_v22  ;;  %149 = vperm.xlu2 %1140, %v123_v4   ;;  %v31_v5 = vld [vmem:[%s1710_s4] sm:$0xff]  ;;  %v124_v6 = vld [vmem:[%s1707_s2 + $0x28] sm:$0xff]  ;;  %v1098_v8 = vld [vmem:[%s1708_s1 + $0x4c] sm:$0xf0] }
  0x16   :  { %444 = vmatpush.bf16.msra.mxu0 %v1106_v24  ;;  %159 = vperm.xlu0 %1138, %v125_v39   ;;  %v930_v7 = vld [vmem:[%s1708_s1 + $0x40] sm:$0xf]  ;;  %v32_v9 = vld [vmem:[%s1710_s4 + $0x8] sm:$0xff]  ;;  %v1096_v10 = vld [vmem:[%s1708_s1 + $0x44] sm:$0xf] }
  0x17   :  { %473 = vmatpush.bf16.msra.mxu1 %v1114_v25  ;;  %164 = vperm.xlu1 %1139, %v126_v48   ;;  %v932_v11 = vld [vmem:[%s1708_s1 + $0x50] sm:$0xf0]  ;;  %v938_v12 = vld [vmem:[%s1708_s1 + $0x48] sm:$0xf]  ;;  %v1099_v13 = vld [vmem:[%s1708_s1 + $0x54] sm:$0xf0]  ;;  %v931_v16 = vor.u32 %v1098_v8, %v930_v7 }
  0x18   :  { %502 = vmatpush.bf16.msra.mxu2 %v1122_v26  ;;  %v1097_v14 = vld [vmem:[%s1708_s1 + $0x4c] sm:$0xf]  ;;  %v940_v15 = vld [vmem:[%s1708_s1 + $0x58] sm:$0xf0]  ;;  %v935_v17 = vor.u32 %v1096_v10, %v932_v11  ;;  %v939_v18 = vor.u32 %v1099_v13, %v938_v12  ;;  %v23_v20 = vld [vmem:[%s1709_s3] sm:$0xff] }
  0x19   :  { %531 = vmatpush.bf16.msra.mxu3 %v1130_v27  ;;  %v943_v19 = vor.u32 %v1097_v14, %v940_v15  ;;  %v27_v21 = vld [vmem:[%s1709_s3 + $0x20] sm:$0xff]  ;;  %v1102_v23 = vld [vmem:[%s1708_s1 + $0x6c] sm:$0xf0]  ;;  %v948_v25 = vld [vmem:[%s1708_s1 + $0x70] sm:$0xf0] }
  0x1a   :  { %445 = vmatpush.bf16.msra.mxu0 %v1105_v29  ;;  %v946_v22 = vld [vmem:[%s1708_s1 + $0x60] sm:$0xf]  ;;  %v1100_v24 = vld [vmem:[%s1708_s1 + $0x64] sm:$0xf]  ;;  %v954_v26 = vld [vmem:[%s1708_s1 + $0x68] sm:$0xf] }
  0x1b   :  { %474 = vmatpush.bf16.msra.mxu1 %v1113_v30  ;;  %v1103_v27 = vld [vmem:[%s1708_s1 + $0x74] sm:$0xf0]  ;;  %v1101_v28 = vld [vmem:[%s1708_s1 + $0x6c] sm:$0xf]  ;;  %v956_v29 = vld [vmem:[%s1708_s1 + $0x78] sm:$0xf0]  ;;  %v947_v30 = vor.u32 %v1102_v23, %v946_v22 }
  0x1c   :  { %503 = vmatpush.bf16.msra.mxu2 %v1121_v31  ;;  %v951_v31 = vor.u32 %v1100_v24, %v948_v25 }
  0x1d   :  { %532 = vmatpush.bf16.msra.mxu3 %v1129_v32  ;;  %154 = vperm.xlu2 %1140, %v124_v6   ;;  %v955_v32 = vor.u32 %v1103_v27, %v954_v26 }
  0x1e   :  { %446 = vmatpush.bf16.msra.mxu0 %v1104_v33  ;;  %746 = vperm.xlu0 %1138, %v24_v51   ;;  %v959_v33 = vor.u32 %v1101_v28, %v956_v29 }
  0x1f   :  { %475 = vmatpush.bf16.msra.mxu1 %v1112_v34  ;;  %751 = vperm.xlu1 %1139, %v25_v52   ;;  %v30_v34 = vld [vmem:[%s1709_s3 + $0x38] sm:$0xff] }
  0x20   :  { %504 = vmatpush.bf16.msra.mxu2 %v1120_v35 }
  0x21   :  { %533 = vmatpush.bf16.msra.mxu3 %v1128_v36  ;;  %447 = vmatmul.bf16.vlgmr.msra.gmra.mxu0 %v899_v46 }
  0x22   :  { %476 = vmatmul.bf16.vlgmr.msra.gmra.mxu1 %v903_v47 }
  0x23   :  { %505 = vmatmul.bf16.vlgmr.msra.gmra.mxu2 %v907_v49 }
  0x24   :  { %534 = vmatmul.bf16.vlgmr.msra.gmra.mxu3 %v911_v50 }
  0x25   :  { %741 = vperm.xlu2 %1140, %v23_v20  }
  0x26   :  { %756 = vperm.xlu0 %1138, %v26_v55  }
  0x27   :  { %766 = vperm.xlu1 %1139, %v28_v0  }
  0x2d   :  { %761 = vperm.xlu2 %1140, %v27_v21  }
  0x2e   :  { %771 = vperm.xlu0 %1138, %v29_v3  }
  0x2f   :  { %789 = vperm.xlu1 %1139, %v31_v5  }
  0x31   :  { %452 = vmatmul.bf16.gmra.mxu0 %v915_v62 }
  0x32   :  { %481 = vmatmul.bf16.gmra.mxu1 %v919_v63 }
  0x33   :  { %510 = vmatmul.bf16.gmra.mxu2 %v923_v1 }
  0x34   :  { %539 = vmatmul.bf16.gmra.mxu3 %v927_v2 }
  0x35   :  { %776 = vperm.xlu2 %1140, %v30_v34  }
  0x36   :  { %794 = vperm.xlu0 %1138, %v32_v9  }
  0x41   :  { %457 = vmatmul.bf16.gmra.mxu0 %v931_v16 }
  0x42   :  { %486 = vmatmul.bf16.gmra.mxu1 %v935_v17 }
  0x43   :  { %515 = vmatmul.bf16.gmra.mxu2 %v939_v18 }
  0x44   :  { %544 = vmatmul.bf16.gmra.mxu3 %v943_v19 }
  0x51   :  { %462 = vmatmul.bf16.gmra.mxu0 %v947_v30 }
  0x52   :  { %491 = vmatmul.bf16.gmra.mxu1 %v951_v31 }
  0x53   :  { %520 = vmatmul.bf16.gmra.mxu2 %v955_v32 }
  0x54   :  { %549 = vmatmul.bf16.gmra.mxu3 %v959_v33 }
  0x6f   :  { %v150_v5 = vpop.permute.xlu2 %149 }
  0x77   :  { %v155_v20 = vpop.permute.xlu2 %154 }
  0x78   :  { %v130_v35 = vpop.permute.xlu0 %129 }
  0x79   :  { %v140_v49 = vpop.permute.xlu1 %139 }
  0x80   :  { %v135_v45 = vpop.permute.xlu0 %134 }
  0x81   :  { %v145_v1 = vpop.permute.xlu1 %144 }
  0x88   :  { %v160_v30 = vpop.permute.xlu0 %159 }
  0x9e   :  { %v448_v36 = vpop.f32.mrf.mxu0 }
  0x9f   :  { %v477_v37 = vpop.f32.mrf.mxu1  ;;  %v449_v38 = vadd.f32 %v448_v36, %v130_v35 }
  0xa1   :  { %v478_v39 = vadd.f32 %v477_v37, %v449_v38 }
  0xa6   :  { %v506_v40 = vpop.f32.mrf.mxu2  ;;  %v450_v43 = vpop.f32.mrf.mxu0 }
  0xa7   :  { %v535_v41 = vpop.f32.mrf.mxu3  ;;  %v507_v42 = vadd.f32 %v506_v40, %v478_v39  ;;  %v479_v44 = vpop.f32.mrf.mxu1  ;;  %v451_v47 = vadd.f32 %v450_v43, %v135_v45 }
  0xa8   :  { %v165_v40 = vpop.permute.xlu1 %164 }
  0xa9   :  { %v1447_v46 = vadd.f32 %v535_v41, %v507_v42  ;;  %v480_v50 = vadd.f32 %v479_v44, %v451_v47 }
  0xab   :  { %v556_v48 = vsel %vm555_vm0, %v1447_v46, 0.0 }
  0xac   :  { %557 = vadd.xlane.f32.xlu2 %v556_v48 }
  0xae   :  { %v508_v51 = vpop.f32.mrf.mxu2  ;;  %v453_v54 = vpop.f32.mrf.mxu0 }
  0xaf   :  { %v537_v52 = vpop.f32.mrf.mxu3  ;;  %v509_v53 = vadd.f32 %v508_v51, %v480_v50  ;;  %v482_v55 = vpop.f32.mrf.mxu1  ;;  %v454_v56 = vadd.f32 %v453_v54, %v140_v49  ;;  %v33_v54 = vld [vmem:[%s1710_s4 + $0x10] sm:$0xff] }
  0xb1   :  { %v1451_v57 = vadd.f32 %v537_v52, %v509_v53  ;;  %v483_v58 = vadd.f32 %v482_v55, %v454_v56  ;;  %v35_v52 = vld [vmem:[%s1710_s4 + $0x20] sm:$0xff]  ;;  %v34_v53 = vld [vmem:[%s1710_s4 + $0x18] sm:$0xff]  ;;  %v1488_v55 = vpop.permute.xlu0 %746  ;;  %v1490_v56 = vpop.permute.xlu2 %741 }
  0xb3   :  { %v559_v59 = vsel %vm555_vm0, %v1451_v57, 0.0 }
  0xb4   :  { %560 = vadd.xlane.f32.xlu0 %v559_v59 }
  0xb6   :  { %v511_v60 = vpop.f32.mrf.mxu2  ;;  %v455_v63 = vpop.f32.mrf.mxu0 }
  0xb7   :  { %v540_v61 = vpop.f32.mrf.mxu3  ;;  %v512_v62 = vadd.f32 %v511_v60, %v483_v58  ;;  %v484_v0 = vpop.f32.mrf.mxu1  ;;  %v456_v3 = vadd.f32 %v455_v63, %v145_v1  ;;  %v1160_v58 = vmov 32.0  }
  0xb8   :  { %1141 = vrcp.f32 %v1160_v58 }
  0xb9   :  { %v1455_v2 = vadd.f32 %v540_v61, %v512_v62  ;;  %v485_v6 = vadd.f32 %v484_v0, %v456_v3  ;;  %v1492_v60 = vpop.permute.xlu0 %756  ;;  %v1494_v61 = vpop.permute.xlu2 %761 }
  0xba   :  { %v1496_v0 = vpop.permute.xlu1 %751 }
  0xbb   :  { %v562_v4 = vsel %vm555_vm0, %v1455_v2, 0.0 }
  0xbc   :  { %563 = vadd.xlane.f32.xlu1 %v562_v4 }
  0xbe   :  { %v513_v7 = vpop.f32.mrf.mxu2  ;;  %v458_v10 = vpop.f32.mrf.mxu0 }
  0xbf   :  { %v542_v8 = vpop.f32.mrf.mxu3  ;;  %v514_v9 = vadd.f32 %v513_v7, %v485_v6  ;;  %v487_v11 = vpop.f32.mrf.mxu1  ;;  %v459_v12 = vadd.f32 %v458_v10, %v150_v5 }
  0xc0   :  { %v1142_v59 = vpop.eup %1141 }
  0xc1   :  { %v1459_v13 = vadd.f32 %v542_v8, %v514_v9  ;;  %v488_v14 = vadd.f32 %v487_v11, %v459_v12  ;;  %v581_v62 = vmul.f32 32.0, %v1142_v59  ;;  %v1498_v1 = vpop.permute.xlu0 %771  ;;  %v1500_v4 = vpop.permute.xlu2 %776  ;;  %vm585_vm1 = vweird.f32 %v1142_v59 }
  0xc2   :  { %v1502_v6 = vpop.permute.xlu1 %766 }
  0xc3   :  { %v565_v15 = vsel %vm555_vm0, %v1459_v13, 0.0  ;;  %v582_v63 = vsub.f32 1.0, %v581_v62 }
  0xc4   :  { %566 = vadd.xlane.f32.xlu2 %v565_v15 }
  0xc5   :  { %v583_v3 = vmul.f32 %v1142_v59, %v582_v63 }
  0xc6   :  { %v516_v16 = vpop.f32.mrf.mxu2  ;;  %v460_v19 = vpop.f32.mrf.mxu0 }
  0xc7   :  { %v545_v17 = vpop.f32.mrf.mxu3  ;;  %v517_v18 = vadd.f32 %v516_v16, %v488_v14  ;;  %v489_v21 = vpop.f32.mrf.mxu1  ;;  %v461_v23 = vadd.f32 %v460_v19, %v155_v20  ;;  %v584_v5 = vadd.f32 %v1142_v59, %v583_v3 }
  0xc9   :  { %v1463_v22 = vadd.f32 %v545_v17, %v517_v18  ;;  %v490_v25 = vadd.f32 %v489_v21, %v461_v23  ;;  %v1504_v7 = vsel %vm585_vm1, %v1142_v59, %v584_v5  ;;  %v1506_v8 = vpop.permute.xlu0 %794 }
  0xca   :  { %v1515_v15 = vpop.permute.xlu1 %789 }
  0xcb   :  { %v568_v24 = vsel %vm555_vm0, %v1463_v22, 0.0 }
  0xcc   :  { %569 = vadd.xlane.f32.xlu2 %v568_v24 }
  0xce   :  { %v518_v26 = vpop.f32.mrf.mxu2  ;;  %v463_v29 = vpop.f32.mrf.mxu0 }
  0xcf   :  { %v547_v27 = vpop.f32.mrf.mxu3  ;;  %v519_v28 = vadd.f32 %v518_v26, %v490_v25  ;;  %v464_v32 = vadd.f32 %v463_v29, %v160_v30  ;;  %v492_v33 = vpop.f32.mrf.mxu1 }
  0xd1   :  { %v1467_v31 = vadd.f32 %v547_v27, %v519_v28  ;;  %v493_v35 = vadd.f32 %v492_v33, %v464_v32 }
  0xd3   :  { %v571_v34 = vsel %vm555_vm0, %v1467_v31, 0.0 }
  0xd4   :  { %572 = vadd.xlane.f32.xlu0 %v571_v34 }
  0xd6   :  { %v521_v36 = vpop.f32.mrf.mxu2  ;;  %v465_v39 = vpop.f32.mrf.mxu0 }
  0xd7   :  { %v550_v37 = vpop.f32.mrf.mxu3  ;;  %v522_v38 = vadd.f32 %v521_v36, %v493_v35  ;;  %v466_v42 = vadd.f32 %v465_v39, %v165_v40  ;;  %v494_v44 = vpop.f32.mrf.mxu1 }
  0xd9   :  { %v1471_v41 = vadd.f32 %v550_v37, %v522_v38  ;;  %v495_v45 = vadd.f32 %v494_v44, %v466_v42 }
  0xdb   :  { %v574_v43 = vsel %vm555_vm0, %v1471_v41, 0.0 }
  0xdc   :  { %575 = vadd.xlane.f32.xlu1 %v574_v43 }
  0xde   :  { %v523_v47 = vpop.f32.mrf.mxu2 }
  0xdf   :  { %v524_v48 = vadd.f32 %v523_v47, %v495_v45  ;;  %v552_v49 = vpop.f32.mrf.mxu3 }
  0xe1   :  { %v1475_v50 = vadd.f32 %v552_v49, %v524_v48  ;;  %v38_v49 = vld [vmem:[%s1710_s4 + $0x38] sm:$0xff] }
  0xe3   :  { %v577_v51 = vsel %vm555_vm0, %v1475_v50, 0.0 }
  0xe4   :  { %578 = vadd.xlane.f32.xlu2 %v577_v51 }
  0xe8   :  { %809 = vperm.xlu0 %1138, %v35_v52  }
  0xf5   :  { %804 = vperm.xlu1 %1139, %v34_v53  }
  0xfc   :  { %799 = vperm.xlu2 %1140, %v33_v54  }
 0x11f   :  { %v558_v9 = vpop.xlane.xlu2 %557 }
 0x120   :  { %v587_v10 = vmul.f32 %v1504_v7, %v558_v9 }
 0x122   :  { %v1510_v11 = vsub.f32 %v1447_v46, %v587_v10 }
 0x124   :  { %v603_v12 = vmul.f32 %v1510_v11, %v1510_v11 }
 0x126   :  { %v611_v14 = vsel %vm555_vm0, %v603_v12, 0.0 }
 0x127   :  { %v561_v16 = vpop.xlane.xlu0 %560  ;;  %612 = vadd.xlane.f32.xlu0 %v611_v14 }
 0x128   :  { %v588_v17 = vmul.f32 %v1504_v7, %v561_v16 }
 0x12a   :  { %v1519_v18 = vsub.f32 %v1451_v57, %v588_v17 }
 0x12c   :  { %v604_v19 = vmul.f32 %v1519_v18, %v1519_v18 }
 0x12e   :  { %v614_v46 = vsel %vm555_vm0, %v604_v19, 0.0 }
 0x12f   :  { %v564_v20 = vpop.xlane.xlu1 %563  ;;  %615 = vadd.xlane.f32.xlu1 %v614_v46 }
 0x130   :  { %v589_v21 = vmul.f32 %v1504_v7, %v564_v20 }
 0x132   :  { %v1526_v23 = vsub.f32 %v1455_v2, %v589_v21 }
 0x134   :  { %v605_v24 = vmul.f32 %v1526_v23, %v1526_v23 }
 0x136   :  { %v617_v25 = vsel %vm555_vm0, %v605_v24, 0.0 }
 0x137   :  { %618 = vadd.xlane.f32.xlu2 %v617_v25  ;;  %v567_v57 = vpop.xlane.xlu2 %566 }
 0x138   :  { %v590_v26 = vmul.f32 %v1504_v7, %v567_v57 }
 0x13a   :  { %v1533_v27 = vsub.f32 %v1459_v13, %v590_v26 }
 0x13c   :  { %v606_v28 = vmul.f32 %v1533_v27, %v1533_v27 }
 0x13e   :  { %v620_v29 = vsel %vm555_vm0, %v606_v28, 0.0 }
 0x13f   :  { %621 = vadd.xlane.f32.xlu0 %v620_v29  ;;  %v570_v2 = vpop.xlane.xlu2 %569 }
 0x140   :  { %v591_v30 = vmul.f32 %v1504_v7, %v570_v2 }
 0x142   :  { %v1540_v32 = vsub.f32 %v1463_v22, %v591_v30 }
 0x144   :  { %v607_v33 = vmul.f32 %v1540_v32, %v1540_v32 }
 0x146   :  { %v623_v34 = vsel %vm555_vm0, %v607_v33, 0.0 }
 0x147   :  { %v573_v35 = vpop.xlane.xlu0 %572  ;;  %624 = vadd.xlane.f32.xlu1 %v623_v34 }
 0x148   :  { %v592_v13 = vmul.f32 %v1504_v7, %v573_v35 }
 0x14a   :  { %v1547_v36 = vsub.f32 %v1467_v31, %v592_v13 }
 0x14c   :  { %v608_v37 = vmul.f32 %v1547_v36, %v1547_v36 }
 0x14e   :  { %v626_v38 = vsel %vm555_vm0, %v608_v37, 0.0 }
 0x14f   :  { %v576_v39 = vpop.xlane.xlu1 %575  ;;  %627 = vadd.xlane.f32.xlu2 %v626_v38 }
 0x150   :  { %v593_v22 = vmul.f32 %v1504_v7, %v576_v39 }
 0x152   :  { %v1554_v40 = vsub.f32 %v1471_v41, %v593_v22  ;;  %v36_v41 = vld [vmem:[%s1710_s4 + $0x28] sm:$0xff] }
 0x154   :  { %v609_v42 = vmul.f32 %v1554_v40, %v1554_v40 }
 0x156   :  { %v629_v43 = vsel %vm555_vm0, %v609_v42, 0.0 }
 0x157   :  { %630 = vadd.xlane.f32.xlu0 %v629_v43  ;;  %v579_v31 = vpop.xlane.xlu2 %578 }
 0x158   :  { %v594_v44 = vmul.f32 %v1504_v7, %v579_v31 }
 0x15a   :  { %v1561_v45 = vsub.f32 %v1475_v50, %v594_v44  ;;  %v37_v50 = vld [vmem:[%s1710_s4 + $0x30] sm:$0xff]  ;;  %v1575_v51 = vpop.permute.xlu0 %809 }
 0x15c   :  { %v610_v47 = vmul.f32 %v1561_v45, %v1561_v45 }
 0x15e   :  { %v632_v48 = vsel %vm555_vm0, %v610_v47, 0.0 }
 0x15f   :  { %633 = vadd.xlane.f32.xlu1 %v632_v48  ;;  %v1580_v59 = vpop.permute.xlu2 %799 }
 0x167   :  { %814 = vperm.xlu2 %1140, %v36_v41   ;;  %v1577_v52 = vpop.permute.xlu1 %804 }
 0x16b   :  { %824 = vperm.xlu0 %1138, %v38_v49  }
 0x178   :  { %819 = vperm.xlu1 %1139, %v37_v50  }
 0x19a   :  { %v613_v53 = vpop.xlane.xlu0 %612 }
 0x19b   :  { %v635_v54 = vmul.f32 %v613_v53, %v1504_v7 }
 0x19d   :  { %v643_v58 = vadd.f32 1e-05, %v635_v54 }
 0x19f   :  { %1143 = vrsqrt.f32 %v643_v58  ;;  %vm657_vm4 = vweird.f32 %v643_v58 }
 0x1a2   :  { %v616_v62 = vpop.xlane.xlu1 %615 }
 0x1a3   :  { %v636_v63 = vmul.f32 %v616_v62, %v1504_v7 }
 0x1a5   :  { %v1144_v3 = vpop.eup %1143  ;;  %v644_v5 = vadd.f32 1e-05, %v636_v63 }
 0x1a6   :  { %v652_v9 = vmul.f32 %v1144_v3, %v643_v58  ;;  %vm658_vm2 = vweird.f32 %v1144_v3 }
 0x1a7   :  { %1145 = vrsqrt.f32 %v644_v5  ;;  %vm659_vm5 = vmor %vm657_vm4, %vm658_vm2  ;;  %vm667_vm7 = vweird.f32 %v644_v5 }
 0x1a8   :  { %v653_v10 = vmul.f32 %v1144_v3, %v652_v9 }
 0x1aa   :  { %v654_v12 = vmul.f32 0.5, %v653_v10  ;;  %v619_v14 = vpop.xlane.xlu2 %618 }
 0x1ab   :  { %v637_v16 = vmul.f32 %v619_v14, %v1504_v7 }
 0x1ac   :  { %v655_v17 = vsub.f32 1.5, %v654_v12 }
 0x1ad   :  { %v1146_v19 = vpop.eup %1145  ;;  %v645_v46 = vadd.f32 1e-05, %v637_v16 }
 0x1ae   :  { %v656_v20 = vmul.f32 %v1144_v3, %v655_v17  ;;  %v662_v21 = vmul.f32 %v1146_v19, %v644_v5  ;;  %vm668_vm6 = vweird.f32 %v1146_v19 }
 0x1af   :  { %1147 = vrsqrt.f32 %v645_v46  ;;  %vm669_vm9 = vmor %vm667_vm7, %vm668_vm6  ;;  %vm677_vm11 = vweird.f32 %v645_v46 }
 0x1b0   :  { %v660_v24 = vsel %vm659_vm5, %v1144_v3, %v656_v20  ;;  %v663_v25 = vmul.f32 %v1146_v19, %v662_v21 }
 0x1b1   :  { %v731_v57 = vmul.f32 %v660_v24, %v1510_v11  ;;  %876 = vst.msk [vmem:[%s1711_s7] sm:$0xff] %vm875_vm3, %v660_v24 }
 0x1b2   :  { %v664_v26 = vmul.f32 0.5, %v663_v25  ;;  %v622_v28 = vpop.xlane.xlu0 %621 }
 0x1b3   :  { %v779_v29 = vmul.f32 %v1490_v56, %v731_v57  ;;  %867 = vst.msk [vmem:[%s1712_s6] sm:$0xff] %vm555_vm0, %v731_v57  ;;  %v638_v2 = vmul.f32 %v622_v28, %v1504_v7 }
 0x1b4   :  { %v665_v30 = vsub.f32 1.5, %v664_v26 }
 0x1b5   :  { %v1148_v33 = vpop.eup %1147  ;;  %v827_v11 = vadd.f32 %v1515_v15, %v779_v29  ;;  %v646_v34 = vadd.f32 1e-05, %v638_v2 }
 0x1b6   :  { %v666_v35 = vmul.f32 %v1146_v19, %v665_v30  ;;  %v672_v13 = vmul.f32 %v1148_v33, %v645_v46  ;;  %vm678_vm10 = vweird.f32 %v1148_v33 }
 0x1b7   :  { %vm835_vm8 = vcmp.ge.f32.partialorder %v827_v11, 0.0  ;;  %v843_v37 = vmul.f32 0.2, %v827_v11  ;;  %1149 = vrsqrt.f32 %v646_v34  ;;  %vm679_vm13 = vmor %vm677_vm11, %vm678_vm10  ;;  %vm687_vm15 = vweird.f32 %v646_v34 }
 0x1b8   :  { %v670_v56 = vsel %vm669_vm9, %v1146_v19, %v666_v35  ;;  %v673_v38 = vmul.f32 %v1148_v33, %v672_v13 }
 0x1b9   :  { %v851_v39 = vsel %vm835_vm8, %v827_v11, %v843_v37  ;;  %v732_v22 = vmul.f32 %v670_v56, %v1519_v18  ;;  %877 = vst.msk [vmem:[%s1711_s7 + $0x8] sm:$0xff] %vm875_vm3, %v670_v56 }
 0x1ba   :  { %859 = vst.msk [vmem:[%s1713_s5] sm:$0xff] %vm555_vm0, %v851_v39  ;;  %v674_v15 = vmul.f32 0.5, %v673_v38  ;;  %v625_v42 = vpop.xlane.xlu1 %624 }
 0x1bb   :  { %v780_v43 = vmul.f32 %v1488_v55, %v732_v22  ;;  %868 = vst.msk [vmem:[%s1712_s6 + $0x8] sm:$0xff] %vm555_vm0, %v732_v22  ;;  %v639_v18 = vmul.f32 %v625_v42, %v1504_v7 }
 0x1bc   :  { %v675_v31 = vsub.f32 1.5, %v674_v15 }
 0x1bd   :  { %v1150_v44 = vpop.eup %1149  ;;  %v828_v47 = vadd.f32 %v1506_v8, %v780_v43  ;;  %v647_v48 = vadd.f32 1e-05, %v639_v18 }
 0x1be   :  { %v676_v41 = vmul.f32 %v1148_v33, %v675_v31  ;;  %v682_v49 = vmul.f32 %v1150_v44, %v646_v34  ;;  %vm688_vm14 = vweird.f32 %v1150_v44 }
 0x1bf   :  { %vm836_vm12 = vcmp.ge.f32.partialorder %v828_v47, 0.0  ;;  %v844_v50 = vmul.f32 0.2, %v828_v47  ;;  %1151 = vrsqrt.f32 %v647_v48  ;;  %vm689_vm2 = vmor %vm687_vm15, %vm688_vm14  ;;  %vm697_vm5 = vweird.f32 %v647_v48 }
 0x1c0   :  { %v680_v55 = vsel %vm679_vm13, %v1148_v33, %v676_v41  ;;  %v683_v53 = vmul.f32 %v1150_v44, %v682_v49 }
 0x1c1   :  { %v852_v54 = vsel %vm836_vm12, %v828_v47, %v844_v50  ;;  %v733_v58 = vmul.f32 %v680_v55, %v1526_v23  ;;  %878 = vst.msk [vmem:[%s1711_s7 + $0x10] sm:$0xff] %vm875_vm3, %v680_v55 }
 0x1c2   :  { %860 = vst.msk [vmem:[%s1713_s5 + $0x8] sm:$0xff] %vm555_vm0, %v852_v54  ;;  %v684_v8 = vmul.f32 0.5, %v683_v53  ;;  %v628_v62 = vpop.xlane.xlu2 %627 }
 0x1c3   :  { %v781_v63 = vmul.f32 %v1496_v0, %v733_v58  ;;  %869 = vst.msk [vmem:[%s1712_s6 + $0x10] sm:$0xff] %vm555_vm0, %v733_v58  ;;  %v640_v23 = vmul.f32 %v628_v62, %v1504_v7 }
 0x1c4   :  { %v685_v3 = vsub.f32 1.5, %v684_v8 }
 0x1c5   :  { %v1152_v5 = vpop.eup %1151  ;;  %v829_v9 = vadd.f32 %v1580_v59, %v781_v63  ;;  %v648_v10 = vadd.f32 1e-05, %v640_v23 }
 0x1c6   :  { %v686_v12 = vmul.f32 %v1150_v44, %v685_v3  ;;  %v692_v14 = vmul.f32 %v1152_v5, %v647_v48  ;;  %vm698_vm4 = vweird.f32 %v1152_v5 }
 0x1c7   :  { %vm837_vm1 = vcmp.ge.f32.partialorder %v829_v9, 0.0  ;;  %v845_v16 = vmul.f32 0.2, %v829_v9  ;;  %1153 = vrsqrt.f32 %v648_v10  ;;  %vm699_vm7 = vmor %vm697_vm5, %vm698_vm4  ;;  %vm707_vm9 = vweird.f32 %v648_v10 }
 0x1c8   :  { %v690_v0 = vsel %vm689_vm2, %v1150_v44, %v686_v12  ;;  %v693_v17 = vmul.f32 %v1152_v5, %v692_v14 }
 0x1c9   :  { %v853_v19 = vsel %vm837_vm1, %v829_v9, %v845_v16  ;;  %v734_v46 = vmul.f32 %v690_v0, %v1533_v27  ;;  %879 = vst.msk [vmem:[%s1711_s7 + $0x18] sm:$0xff] %vm875_vm3, %v690_v0 }
 0x1ca   :  { %861 = vst.msk [vmem:[%s1713_s5 + $0x10] sm:$0xff] %vm555_vm0, %v853_v19  ;;  %v694_v59 = vmul.f32 0.5, %v693_v17  ;;  %v631_v20 = vpop.xlane.xlu0 %630 }
 0x1cb   :  { %v782_v21 = vmul.f32 %v1492_v60, %v734_v46  ;;  %870 = vst.msk [vmem:[%s1712_s6 + $0x18] sm:$0xff] %vm555_vm0, %v734_v46  ;;  %v641_v27 = vmul.f32 %v631_v20, %v1504_v7 }
 0x1cc   :  { %v695_v24 = vsub.f32 1.5, %v694_v59 }
 0x1cd   :  { %v1154_v25 = vpop.eup %1153  ;;  %v830_v57 = vadd.f32 %v1577_v52, %v782_v21  ;;  %v649_v26 = vadd.f32 1e-05, %v641_v27 }
 0x1ce   :  { %v696_v28 = vmul.f32 %v1152_v5, %v695_v24  ;;  %v702_v29 = vmul.f32 %v1154_v25, %v648_v10  ;;  %vm708_vm8 = vweird.f32 %v1154_v25 }
 0x1cf   :  { %vm838_vm6 = vcmp.ge.f32.partialorder %v830_v57, 0.0  ;;  %v846_v2 = vmul.f32 0.2, %v830_v57  ;;  %1155 = vrsqrt.f32 %v649_v26  ;;  %vm709_vm11 = vmor %vm707_vm9, %vm708_vm8  ;;  %vm717_vm13 = vweird.f32 %v649_v26 }
 0x1d0   :  { %v700_v60 = vsel %vm699_vm7, %v1152_v5, %v696_v28  ;;  %v703_v30 = vmul.f32 %v1154_v25, %v702_v29 }
 0x1d1   :  { %v854_v33 = vsel %vm838_vm6, %v830_v57, %v846_v2  ;;  %v735_v11 = vmul.f32 %v700_v60, %v1540_v32  ;;  %880 = vst.msk [vmem:[%s1711_s7 + $0x20] sm:$0xff] %vm875_vm3, %v700_v60 }
 0x1d2   :  { %862 = vst.msk [vmem:[%s1713_s5 + $0x18] sm:$0xff] %vm555_vm0, %v854_v33  ;;  %v704_v52 = vmul.f32 0.5, %v703_v30  ;;  %v634_v34 = vpop.xlane.xlu1 %633 }
 0x1d3   :  { %v783_v35 = vmul.f32 %v1494_v61, %v735_v11  ;;  %871 = vst.msk [vmem:[%s1712_s6 + $0x20] sm:$0xff] %vm555_vm0, %v735_v11  ;;  %v642_v32 = vmul.f32 %v634_v34, %v1504_v7 }
 0x1d4   :  { %v705_v13 = vsub.f32 1.5, %v704_v52 }
 0x1d5   :  { %v1156_v37 = vpop.eup %1155  ;;  %v831_v56 = vadd.f32 %v1575_v51, %v783_v35  ;;  %v650_v38 = vadd.f32 1e-05, %v642_v32 }
 0x1d6   :  { %v712_v39 = vmul.f32 %v1156_v37, %v649_v26  ;;  %v706_v22 = vmul.f32 %v1154_v25, %v705_v13  ;;  %vm718_vm12 = vweird.f32 %v1156_v37 }
 0x1d7   :  { %vm839_vm10 = vcmp.ge.f32.partialorder %v831_v56, 0.0  ;;  %v847_v15 = vmul.f32 0.2, %v831_v56  ;;  %1157 = vrsqrt.f32 %v650_v38  ;;  %vm719_vm14 = vmor %vm717_vm13, %vm718_vm12  ;;  %vm727_vm2 = vweird.f32 %v650_v38 }
 0x1d8   :  { %v713_v61 = vmul.f32 %v1156_v37, %v712_v39  ;;  %v710_v42 = vsel %vm709_vm11, %v1154_v25, %v706_v22 }
 0x1d9   :  { %v855_v43 = vsel %vm839_vm10, %v831_v56, %v847_v15  ;;  %v736_v18 = vmul.f32 %v710_v42, %v1547_v36  ;;  %881 = vst.msk [vmem:[%s1711_s7 + $0x28] sm:$0xff] %vm875_vm3, %v710_v42  ;;  %v815_v36 = vpop.permute.xlu2 %814 }
 0x1da   :  { %863 = vst.msk [vmem:[%s1713_s5 + $0x20] sm:$0xff] %vm555_vm0, %v855_v43  ;;  %v714_v7 = vmul.f32 0.5, %v713_v61 }
 0x1db   :  { %v784_v51 = vmul.f32 %v1502_v6, %v736_v18  ;;  %872 = vst.msk [vmem:[%s1712_s6 + $0x28] sm:$0xff] %vm555_vm0, %v736_v18 }
 0x1dc   :  { %v715_v31 = vsub.f32 1.5, %v714_v7 }
 0x1dd   :  { %v1158_v44 = vpop.eup %1157  ;;  %v832_v47 = vadd.f32 %v815_v36, %v784_v51  ;;  %v825_v9 = vpop.permute.xlu0 %824 }
 0x1de   :  { %v722_v48 = vmul.f32 %v1158_v44, %v650_v38  ;;  %v716_v41 = vmul.f32 %v1156_v37, %v715_v31  ;;  %vm728_vm1 = vweird.f32 %v1158_v44 }
 0x1df   :  { %vm840_vm15 = vcmp.ge.f32.partialorder %v832_v47, 0.0  ;;  %v848_v49 = vmul.f32 0.2, %v832_v47  ;;  %vm729_vm4 = vmor %vm727_vm2, %vm728_vm1 }
 0x1e0   :  { %v723_v50 = vmul.f32 %v1158_v44, %v722_v48  ;;  %v720_v55 = vsel %vm719_vm14, %v1156_v37, %v716_v41 }
 0x1e1   :  { %v856_v53 = vsel %vm840_vm15, %v832_v47, %v848_v49  ;;  %v737_v6 = vmul.f32 %v720_v55, %v1554_v40  ;;  %882 = vst.msk [vmem:[%s1711_s7 + $0x30] sm:$0xff] %vm875_vm3, %v720_v55 }
 0x1e2   :  { %864 = vst.msk [vmem:[%s1713_s5 + $0x28] sm:$0xff] %vm555_vm0, %v856_v53  ;;  %v724_v54 = vmul.f32 0.5, %v723_v50 }
 0x1e3   :  { %873 = vst.msk [vmem:[%s1712_s6 + $0x30] sm:$0xff] %vm555_vm0, %v737_v6  ;;  %v785_v63 = vmul.f32 %v1498_v1, %v737_v6 }
 0x1e4   :  { %v725_v58 = vsub.f32 1.5, %v724_v54 }
 0x1e6   :  { %v726_v40 = vmul.f32 %v1158_v44, %v725_v58 }
 0x1e8   :  { %v730_v8 = vsel %vm729_vm4, %v1158_v44, %v726_v40 }
 0x1e9   :  { %v738_v62 = vmul.f32 %v730_v8, %v1561_v45  ;;  %883 = vst.msk [vmem:[%s1711_s7 + $0x38] sm:$0xff] %vm875_vm3, %v730_v8 }
 0x1ea   :  { %v820_v23 = vpop.permute.xlu1 %819 }
 0x1eb   :  { %v786_v3 = vmul.f32 %v1500_v4, %v738_v62  ;;  %874 = vst.msk [vmem:[%s1712_s6 + $0x38] sm:$0xff] %vm555_vm0, %v738_v62  ;;  %v833_v5 = vadd.f32 %v820_v23, %v785_v63 }
 0x1ed   :  { %v834_v10 = vadd.f32 %v825_v9, %v786_v3  ;;  %vm841_vm5 = vcmp.ge.f32.partialorder %v833_v5, 0.0  ;;  %v849_v45 = vmul.f32 0.2, %v833_v5 }
 0x1ef   :  { %vm842_vm6 = vcmp.ge.f32.partialorder %v834_v10, 0.0  ;;  %v850_v12 = vmul.f32 0.2, %v834_v10  ;;  %v857_v14 = vsel %vm841_vm5, %v833_v5, %v849_v45 }
 0x1f0   :  { %865 = vst.msk [vmem:[%s1713_s5 + $0x30] sm:$0xff] %vm555_vm0, %v857_v14 }
 0x1f1   :  { %v858_v1 = vsel %vm842_vm6, %v834_v10, %v850_v12 }
 0x1f2   :  { %866 = vst.msk [vmem:[%s1713_s5 + $0x38] sm:$0xff] %vm555_vm0, %v858_v1 }

// kernel: gradient_penalty_loss.3
= control target key start
LH: loop header
LB: loop body
LE: loop exit
PB: predicated region body
PF: predicated region fallthrough
CT: control target
= control target key end

     0   :  { %6 = vsyncpa [#allocation4], 0  ;;  %s358_s6 = smov 0   ;;  %s399_s0 = inlined_call_operand.vmem [shape: f32[2,12288], index: 0, kind: input, shape index: {}]   ;;  %s400_s1 = inlined_call_operand.hbm [shape: f32[1,1], index: 1, kind: output, shape index: {}]  }
   0x1 LB: > { %s364_s7 = sadd.s32 4294967295, %s344_s6   ;;  %p278_p0 = scmp.ge.s32.totalorder %s344_s6, 1  ;;  %s344_s6 = sphi %s358_s6, %s12_s6  }
   0x2   : > { %p84_p1 = scmp.lt.s32.totalorder %s344_s6, 7 }
   0x4   : > { %p85_p2 = pnand %p278_p0, %p84_p1 }
   0x5   : > { %s279_s8 = sshll.u32 (!%p85_p2), %s364_s7, 4  ;;  %p281_p4 = scmp.ne.s32.totalorder (!%p85_p2), %s364_s7, 0 }
   0x6   : > { %88 = sbr.rel (%p85_p2) target bundleno = 235 (0xeb), region = 24  ;;  %p100_p3 = scmp.lt.s32.totalorder (!%p85_p2), %s279_s8, 95 }
   0xb   : > { %s402_s8 = smov (!%p100_p3, %s279_s8), 95  ;;  %108 = sbr.rel (%p281_p4) target bundleno = 18 (0x12), region = 28 }
   0xc   : > { %s280_s9 = sshll.u32 %s402_s8, 1 }
   0xd   : > { %s103_s12 = scalar_lea.vmem %s399_s0, %s280_s9 }
  0x10   : > { %vm109_vm0 = vcmask 1024   ;;  %v346_v0 = vmov 0.0  }
  0x11   : > { %110 = vst.msk [vmem:[#allocation2] sm:$0x3] %vm109_vm0, %v346_v0 }
  0x12 PF: > { %v111_v1 = vld [vmem:[%s103_s12] sm:$0xff]  ;;  %v112_v2 = vld [vmem:[%s103_s12 + $0x8] sm:$0xff]  ;;  %v113_v5 = vld [vmem:[%s103_s12 + $0x10] sm:$0xff]  ;;  %vm161_vm1 = vcmask 1041408   ;;  %vm196_vm2 = vcmask 1024   ;;  %p282_p5 = scmp.ne.s32.totalorder %s364_s7, 5 }
  0x13   : > { %v116_v3 = vmul.f32 %v111_v1, %v111_v1  ;;  %v117_v4 = vmul.f32 %v112_v2, %v112_v2  ;;  %v114_v6 = vld [vmem:[%s103_s12 + $0x18] sm:$0xff]  ;;  %v118_v7 = vmul.f32 %v113_v5, %v113_v5 }
  0x14   : > { %v119_v10 = vmul.f32 %v114_v6, %v114_v6 }
  0x15   : > { %124 = vst [vmem:[#allocation1] ss:$4 sm:$0xff] %v116_v3 }
  0x16   : > { %126 = vst [vmem:[#allocation1 + $0x20] ss:$4 sm:$0xff] %v117_v4 }
  0x18   : > { %v115_v56 = vld [vmem:[#allocation2] sm:$0x3] }
  0x1c   : > { %v127_v8 = vld.sshfl [vmem:[#allocation1] sm:$0xff pattern:$0x73625140]  ;;  %v128_v9 = vld.sshfl [vmem:[#allocation1 + $0x8] sm:$0xff pattern:$0x73625140] }
  0x1d   : > { %v129_v11 = vld.sshfl [vmem:[#allocation1 + $0x10] sm:$0xff pattern:$0x73625140]  ;;  %v130_v12 = vld.sshfl [vmem:[#allocation1 + $0x18] sm:$0xff pattern:$0x73625140] }
  0x1e   : > { %v131_v13 = vld.sshfl [vmem:[#allocation1 + $0x20] sm:$0xff pattern:$0x73625140]  ;;  %v132_v14 = vld.sshfl [vmem:[#allocation1 + $0x28] sm:$0xff pattern:$0x73625140] }
  0x1f   : > { %v133_v15 = vld.sshfl [vmem:[#allocation1 + $0x30] sm:$0xff pattern:$0x73625140]  ;;  %v134_v16 = vld.sshfl [vmem:[#allocation1 + $0x38] sm:$0xff pattern:$0x73625140] }
  0x20   : > { %135 = vst [vmem:[#allocation1] ss:$4 sm:$0xff] %v118_v7  ;;  %v162_v17 = vsel %vm161_vm1, %v127_v8, 0.0  ;;  %v163_v18 = vsel %vm161_vm1, %v128_v9, 0.0  ;;  %v165_v19 = vsel %vm161_vm1, %v129_v11, 0.0  ;;  %v167_v21 = vsel %vm161_vm1, %v130_v12, 0.0 }
  0x21   : > { %136 = vst [vmem:[#allocation1 + $0x20] ss:$4 sm:$0xff] %v119_v10  ;;  %v164_v20 = vadd.f32 %v163_v18, %v162_v17  ;;  %v169_v23 = vsel %vm161_vm1, %v131_v13, 0.0  ;;  %v171_v25 = vsel %vm161_vm1, %v132_v14, 0.0  ;;  %v173_v27 = vsel %vm161_vm1, %v133_v15, 0.0 }
  0x22   : > { %v175_v30 = vsel %vm161_vm1, %v134_v16, 0.0 }
  0x23   : > { %v166_v22 = vadd.f32 %v165_v19, %v164_v20 }
  0x25   : > { %v168_v24 = vadd.f32 %v167_v21, %v166_v22 }
  0x27   : > { %v170_v26 = vadd.f32 %v169_v23, %v168_v24  ;;  %v137_v28 = vld.sshfl [vmem:[#allocation1] sm:$0xff pattern:$0x73625140]  ;;  %v138_v31 = vld.sshfl [vmem:[#allocation1 + $0x8] sm:$0xff pattern:$0x73625140] }
  0x28   : > { %v177_v33 = vsel %vm161_vm1, %v137_v28, 0.0  ;;  %v139_v34 = vld.sshfl [vmem:[#allocation1 + $0x10] sm:$0xff pattern:$0x73625140]  ;;  %v179_v36 = vsel %vm161_vm1, %v138_v31, 0.0 }
  0x29   : > { %v172_v29 = vadd.f32 %v171_v25, %v170_v26  ;;  %v140_v37 = vld.sshfl [vmem:[#allocation1 + $0x18] sm:$0xff pattern:$0x73625140]  ;;  %v181_v39 = vsel %vm161_vm1, %v139_v34, 0.0 }
  0x2a   : > { %v141_v40 = vld.sshfl [vmem:[#allocation1 + $0x20] sm:$0xff pattern:$0x73625140]  ;;  %v183_v42 = vsel %vm161_vm1, %v140_v37, 0.0 }
  0x2b   : > { %v174_v32 = vadd.f32 %v173_v27, %v172_v29  ;;  %v142_v43 = vld.sshfl [vmem:[#allocation1 + $0x28] sm:$0xff pattern:$0x73625140]  ;;  %v185_v45 = vsel %vm161_vm1, %v141_v40, 0.0 }
  0x2c   : > { %v143_v46 = vld.sshfl [vmem:[#allocation1 + $0x30] sm:$0xff pattern:$0x73625140]  ;;  %v187_v48 = vsel %vm161_vm1, %v142_v43, 0.0 }
  0x2d   : > { %v176_v35 = vadd.f32 %v175_v30, %v174_v32  ;;  %v144_v49 = vld.sshfl [vmem:[#allocation1 + $0x38] sm:$0xff pattern:$0x73625140]  ;;  %v189_v51 = vsel %vm161_vm1, %v143_v46, 0.0 }
  0x2e   : > { %v191_v53 = vsel %vm161_vm1, %v144_v49, 0.0 }
  0x2f   : > { %v178_v38 = vadd.f32 %v177_v33, %v176_v35 }
  0x31   : > { %v180_v41 = vadd.f32 %v179_v36, %v178_v38 }
  0x33   : > { %v182_v44 = vadd.f32 %v181_v39, %v180_v41 }
  0x35   : > { %v184_v47 = vadd.f32 %v183_v42, %v182_v44 }
  0x37   : > { %v186_v50 = vadd.f32 %v185_v45, %v184_v47 }
  0x39   : > { %v188_v52 = vadd.f32 %v187_v48, %v186_v50 }
  0x3b   : > { %v190_v54 = vadd.f32 %v189_v51, %v188_v52 }
  0x3d   : > { %v192_v55 = vadd.f32 %v191_v53, %v190_v54 }
  0x3f   : > { %193 = vadd.xlane.f32.xlu0 %v192_v55 }
  0xb1   : > { %201 = sbr.rel (%p282_p5) target bundleno = 230 (0xe6), region = 32 }
  0xb2   : > { %v194_v57 = vpop.xlane.xlu0 %193 }
  0xb3   : > { %v195_v58 = vadd.f32 %v194_v57, %v115_v56 }
  0xb5   : > { %197 = vst.msk [vmem:[#allocation2] sm:$0x3] %vm196_vm2, %v195_v58 }
  0xb6   : > { %vm225_vm5 = vcmask 0  }
  0xbc   : > { %v202_v59 = vld [vmem:[#allocation2] sm:$0x3] }
  0xbd   : > { %304 = vrsqrt.f32 %v202_v59  ;;  %vm210_vm3 = vcmp.eq.f32.partialorder %v202_v59, inf  ;;  %v213_v2 = vand.u32 2147483648, %v202_v59  ;;  %vm212_vm4 = vcmp.eq.f32.partialorder %v202_v59, 0.0 }
  0xc3   : > { %v305_v60 = vpop.eup %304 }
  0xc4   : > { %v204_v61 = vmul.f32 %v305_v60, %v202_v59 }
  0xc6   : > { %v205_v62 = vmul.f32 %v305_v60, %v204_v61 }
  0xc8   : > { %v206_v63 = vmul.f32 0.5, %v205_v62 }
  0xca   : > { %v207_v0 = vsub.f32 1.5, %v206_v63 }
  0xcc   : > { %v208_v1 = vmul.f32 %v305_v60, %v207_v0 }
  0xce   : > { %v209_v3 = vmul.f32 %v208_v1, %v202_v59 }
  0xd0   : > { %v211_v4 = vsel %vm210_vm3, %v202_v59, %v209_v3 }
  0xd1   : > { %v214_v5 = vsel %vm212_vm4, %v213_v2, %v211_v4 }
  0xd2   : > { %v283_v6 = vadd.f32 -1.0, %v214_v5 }
  0xd4   : > { %v216_v7 = vmul.f32 %v283_v6, %v283_v6 }
  0xd6   : > { %v217_v8 = vsel %vm196_vm2, %v216_v7, 0.0 }
  0xd7   : > { %v218_v9 = vrot.slane %v217_v8, 4 }
  0xd9   : > { %v219_v10 = vadd.f32 %v218_v9, %v217_v8 }
  0xdb   : > { %v220_v11 = vrot.slane %v219_v10, 2 }
  0xdd   : > { %v221_v12 = vadd.f32 %v220_v11, %v219_v10 }
  0xdf   : > { %v222_v13 = vrot.slane %v221_v12, 1 }
  0xe1   : > { %v223_v14 = vadd.f32 %v222_v13, %v221_v12 }
  0xe3   : > { %v224_v15 = vmul.f32 0.5, %v223_v14 }
  0xe5   : > { %226 = vst.msk [vmem:[#allocation3] sm:$0x1] %vm225_vm5, %v224_v15 }
  0xe6 PF: > { %p292_p6 = scmp.eq.s32.totalorder %s364_s7, 5  ;;  %s347_s13 = smov [#allocation3]  }
  0xe7   : > { %s233_s14 = sshll.u32 %s347_s13, 4  ;;  %s235_s17 = sshll.u32 %s400_s1, 4  ;;  %s234_s14 = int_to_ptr.vmem [resolvable:$true] %s233_s14  ;;  %s236_s17 = int_to_ptr.hbm [resolvable:$true] %s235_s17 }
  0xe8   : > { %289 = dma.vmem_to_hbm [thread:$0]  (%p292_p6), %s234_s14, 16, %s236_s17, [#allocation4]  }
  0xe9   : > { %339 = dma.done.wait (%p292_p6), [#allocation4], 16  }
  0xea   : > { %341 = vsyncadd (%p292_p6), [#allocation4], 4294967280 }
  0xeb PF: > { %s12_s6 = sadd.s32 1, %s344_s6  }
  0xec   : > { %p9_p7 = scmp.ge.s32.totalorder %s12_s6, 8  }
  0xee   :  { %11 = sbr.rel (!%p9_p7) target bundleno = 1 (0x1), region = 60 }
  0xf3   :  { %249 = vsyncpa [#allocation4], 1 }
  0xf4   :  { %251 = vsyncpa [#allocation4 + $0x1], 1 }

</bundles_post_ra>
